<compile_context>
chip_gen: v7x
topology: tpu7x:2x2x1
jax: 0.10.0
libtpu: 0.0.40
codegen_flags: <defaults>
</compile_context>

<pallas_src>
import functools

import jax
import jax.numpy as jnp
from jax.experimental import pallas as pl
from jax.experimental.pallas import tpu as pltpu


def _round_up(x, m):
    return ((x + m - 1) // m) * m


# ---------------------------------------------------------------------------
# Capability / sizing helpers
# ---------------------------------------------------------------------------

def _probe_kernel(x_ref, o_ref):
    o_ref[...] = x_ref[...] + 1.0


@functools.lru_cache(maxsize=1)
def _single_buffer_mode():
    """Return pl.Buffered(1) if single-buffered BlockSpecs are supported, else None."""
    try:
        spec = pl.BlockSpec((8, 128), lambda i: (0, 0), pipeline_mode=pl.Buffered(1))
        probe = pl.pallas_call(
            _probe_kernel,
            out_shape=jax.ShapeDtypeStruct((8, 128), jnp.float32),
            grid=(1,),
            in_specs=[spec],
            out_specs=pl.BlockSpec((8, 128), lambda i: (0, 0)))
        jax.block_until_ready(probe(jnp.zeros((8, 128), jnp.float32)))
        return pl.Buffered(1)
    except Exception:
        return None


def _vmem_budget_bytes():
    """Per-generation VMEM budget: ~48 MiB on v7x (64 MiB/TC), ~96 MiB on v5e/v6e."""
    try:
        cap = int(pltpu.get_tpu_info().vmem_capacity_bytes)
    except Exception:
        cap = 64 * 1024 * 1024                      # conservative (v7x-sized) fallback
    return int(min(cap * 3 // 4, 100 * 1024 * 1024))


def _choose_strip(H, W, Cin, Cout, cp, cpo, n_convs, budget, strip_rows=None):
    """Largest strip (multiple of 8 dividing H) whose working set fits the budget."""
    E, HB = n_convs, 8
    cands = [s for s in range(8, H + 1, 8) if H % s == 0]
    if strip_rows is not None:
        cands = [s for s in cands if s <= strip_rows] or [min(cands)]

    wbytes = n_convs * (3 * 3 * cp * cpo * 2 + cpo * 4)   # VMEM-resident weights/bias

    def need(s):
        l = s + 2 * E
        return ((l + 2) * W * 3 * cp * 2              # bf16 im2row slab
                + l * W * cpo * 4                      # f32 accumulator
                + 2 * (s + 2 * HB) * W * Cin * 4       # 2x-buffered x strip + halo blocks
                + 2 * s * W * Cout * 4                 # 2x-buffered skip block
                + 2 * (s // 2) * (W // 2) * Cout * 4)  # 2x-buffered down block

    fit = [s for s in cands if wbytes + need(s) <= budget]
    return max(fit) if fit else min(cands)


# ---------------------------------------------------------------------------
# Fused kernel (conv stack + ReLU + 2x2 max-pool) for one (batch, strip) tile
# ---------------------------------------------------------------------------

def _make_downblock_kernel(n_convs, strip, W, c_in, c_out, cp, cpo):
    E = n_convs                 # input-row halo per side (one row per 3x3 conv)
    L = strip + 2 * E           # extended row count computed per strip
    HB = 8                      # rows in each thin neighbour (halo) input block
    bf = jnp.bfloat16

    def kernel(*refs):
        x_top, x_mid, x_bot = refs[0], refs[1], refs[2]
        wb = refs[3:3 + 2 * n_convs]
        down_ref = refs[3 + 2 * n_convs]
        skip_ref = refs[4 + 2 * n_convs]
        slab_ref = refs[5 + 2 * n_convs]
        acc_ref = refs[6 + 2 * n_convs]

        s = pl.program_id(1)
        last = pl.num_programs(1) - 1

        # Scratch persists across grid steps: the full zero is only needed once per
        # batch element (covers the never-rewritten halo row / shifted-column / padded
        # lane regions; the interior is overwritten by write_slab every stage).
        @pl.when(s == 0)
        def _():
            slab_ref[...] = jnp.zeros(slab_ref.shape, slab_ref.dtype)

        def write_slab(src, c_src, r0, nrows):
            # slab[r0 + r + 1, w, kx*cp + c] = src[r, w + kx - 1, c] (OOB columns stay 0)
            slab_ref[1 + r0:1 + r0 + nrows, 1:W, 0:c_src] = src[:, 0:W - 1, :]
            slab_ref[1 + r0:1 + r0 + nrows, 0:W, cp:cp + c_src] = src
            slab_ref[1 + r0:1 + r0 + nrows, 0:W - 1, 2 * cp:2 * cp + c_src] = src[:, 1:W, :]

        def zero_rows(r0, nrows):
            slab_ref[1 + r0:1 + r0 + nrows, :, :] = jnp.zeros((nrows, W, 3 * cp), bf)

        def conv_stage(w_ref, b_ref):
            # acc[r, w, :] = relu( sum_ky slab[r+ky, :, :] @ W_slab[ky] + b ), f32 accum.
            for ky in range(3):                         # 3 fat bf16 matmuls, K = 3*cp
                rows = slab_ref[ky:ky + L, :, :].reshape(L * W, 3 * cp)
                part = jnp.dot(rows, w_ref[ky],
                               preferred_element_type=jnp.float32).reshape(L, W, cpo)
                if ky == 0:
                    acc_ref[...] = part
                else:
                    acc_ref[...] += part
            acc_ref[...] = jnp.maximum(acc_ref[...] + b_ref[...], 0.0)

        # ---- stage 0: build the slab from the strip + its input halos ---------------
        write_slab(x_mid[0].astype(bf), c_in, E, strip)

        @pl.when(s > 0)                  # top halo rows from the previous strip
        def _():
            write_slab(x_top[0][HB - E:HB].astype(bf), c_in, 0, E)
        # s == 0: top rows stay zero from the full zeroing ('same' top padding).

        @pl.when(s < last)               # bottom halo rows from the next strip
        def _():
            write_slab(x_bot[0][0:E].astype(bf), c_in, strip + E, E)

        @pl.when(s == last)              # 'same' bottom padding (else stale data)
        def _():
            zero_rows(strip + E, E)

        conv_stage(wb[0], wb[1])

        # ---- stages 1..n-1: re-slab the previous activation --------------------------
        for k in range(1, n_convs):
            write_slab(acc_ref[...].astype(bf), cpo, 0, L)

            @pl.when(s == 0)             # rows above the image must read as zero
            def _():
                zero_rows(0, E)

            @pl.when(s == last)          # rows below the image must read as zero
            def _():
                zero_rows(strip + E, E)

            conv_stage(wb[2 * k], wb[2 * k + 1])

        # ---- outputs: skip (central rows, real channels) + 2x2/stride-2 max pool -----
        a = acc_ref[E:E + strip, :, :]
        skip_ref[...] = a[None, :, :, :c_out]

        h2, w2 = strip // 2, W // 2
        p00 = acc_ref[pl.ds(E, h2, stride=2), pl.ds(0, w2, stride=2), :]
        p01 = acc_ref[pl.ds(E, h2, stride=2), pl.ds(1, w2, stride=2), :]
        p10 = acc_ref[pl.ds(E + 1, h2, stride=2), pl.ds(0, w2, stride=2), :]
        p11 = acc_ref[pl.ds(E + 1, h2, stride=2), pl.ds(1, w2, stride=2), :]
        pooled = jnp.maximum(jnp.maximum(p00, p01), jnp.maximum(p10, p11))
        down_ref[...] = pooled[None, :, :, :c_out]

    return kernel


# ---------------------------------------------------------------------------
# NHWC wrapper (single pallas_call)
# ---------------------------------------------------------------------------

def downblock_pallas_nhwc(x, params, strip_rows=None):
    """Fused DownBlock forward in NHWC.

    x: (B, H, W, Cin) f32; params: list of (w, b) with w: (3, 3, Ci, Cout), b: (Cout,).
    Returns (down, skip): ((B, H//2, W//2, Cout), (B, H, W, Cout)).
    """
    B, H, W, Cin = x.shape
    Cout = params[0][0].shape[-1]
    n_convs = len(params)
    assert H % 2 == 0 and W % 2 == 0, "MaxPool2d(2) requires even H and W"
    assert H % 8 == 0 and W % 8 == 0, "kernel assumes 8-aligned spatial dims"

    cp = _round_up(max(Cin, Cout), 128)    # lane-dense internal input-channel block
    cpo = _round_up(Cout, 128)             # lane-dense internal output width (matmul N)
    E, HB = n_convs, 8

    budget = _vmem_budget_bytes()
    strip = _choose_strip(H, W, Cin, Cout, cp, cpo, n_convs, budget, strip_rows)
    n_strips = H // strip
    SB = strip // HB
    L = strip + 2 * E

    # Pack each conv into the matmul slab layout (bf16 operands, zero padding in the
    # unused K rows / N lanes is what makes stale padded slab lanes harmless):
    #   w_slab[ky, kx*cp + ci, co] = w[ky, kx, ci, co]
    flat_wb = []
    for (w, b) in params:
        ci = w.shape[2]
        wp = jnp.zeros((3, 3, cp, cpo), jnp.bfloat16)
        wp = wp.at[:, :, :ci, :Cout].set(w.astype(jnp.bfloat16))
        bp = jnp.zeros((1, cpo), jnp.float32).at[0, :Cout].set(b)
        flat_wb += [wp.reshape(3, 3 * cp, cpo), bp]

    kernel = _make_downblock_kernel(n_convs, strip, W, Cin, Cout, cp, cpo)

    buffered1 = _single_buffer_mode()
    wkw = {"pipeline_mode": buffered1} if buffered1 is not None else {}

    in_specs = [
        # thin neighbour-row blocks for the conv halo (clamped at the image edges; the
        # kernel ignores / zeroes them there)
        pl.BlockSpec((1, HB, W, Cin),
                     lambda b, s: (b, jnp.maximum(s * SB - 1, 0), 0, 0)),
        pl.BlockSpec((1, strip, W, Cin), lambda b, s: (b, s, 0, 0)),
        pl.BlockSpec((1, HB, W, Cin),
                     lambda b, s: (b, jnp.minimum((s + 1) * SB, H // HB - 1), 0, 0)),
    ]
    for _ in range(n_convs):
        # Constant index_maps (+ single buffering when available) keep weights resident.
        in_specs += [pl.BlockSpec((3, 3 * cp, cpo), lambda b, s: (0, 0, 0), **wkw),
                     pl.BlockSpec((1, cpo), lambda b, s: (0, 0), **wkw)]

    out_shape = (jax.ShapeDtypeStruct((B, H // 2, W // 2, Cout), jnp.float32),
                 jax.ShapeDtypeStruct((B, H, W, Cout), jnp.float32))
    out_specs = (pl.BlockSpec((1, strip // 2, W // 2, Cout), lambda b, s: (b, s, 0, 0)),
                 pl.BlockSpec((1, strip, W, Cout), lambda b, s: (b, s, 0, 0)))

    scratch_shapes = [pltpu.VMEM((L + 2, W, 3 * cp), jnp.bfloat16),   # im2row slab
                      pltpu.VMEM((L, W, cpo), jnp.float32)]           # f32 accumulator

    flops = 0
    ci = Cin
    for _ in range(n_convs):
        flops += 2 * B * H * W * 9 * ci * Cout
        ci = Cout
    bytes_accessed = (x.size * 4 + B * H * W * Cout * 4
                      + B * (H // 2) * (W // 2) * Cout * 4
                      + sum(int(a.size) * a.dtype.itemsize for a in flat_wb))
    cost = pl.CostEstimate(flops=int(flops), transcendentals=0,
                           bytes_accessed=int(bytes_accessed))

    down, skip = pl.pallas_call(
        kernel,
        out_shape=out_shape,
        grid=(B, n_strips),
        in_specs=in_specs,
        out_specs=out_specs,
        scratch_shapes=scratch_shapes,
        cost_estimate=cost,
        compiler_params=pltpu.CompilerParams(
            dimension_semantics=("parallel", "arbitrary"),
            vmem_limit_bytes=budget),
    )(x, x, x, *flat_wb)
    return down, skip


# ---------------------------------------------------------------------------
# Public DownBlock forward (PyTorch NCHW layout at the boundary only)
# ---------------------------------------------------------------------------

def init_downblock_params(key, in_channels, out_channels, conv_type="double"):
    """Deterministic synthetic params. Conv weights stored as (3, 3, Cin, Cout)."""
    n_convs = {"double": 2, "triple": 3}[conv_type]
    params = []
    cin = in_channels
    for _ in range(n_convs):
        key, kw, kb = jax.random.split(key, 3)
        w = jax.random.normal(kw, (3, 3, cin, out_channels), jnp.float32) * 0.1
        b = jax.random.normal(kb, (out_channels,), jnp.float32) * 0.1
        params.append((w, b))
        cin = out_channels
    return params


@functools.partial(jax.jit, static_argnames=("strip_rows",))
def downblock_forward(x_nchw, params, strip_rows=None):
    """DownBlock forward. x_nchw: (B, Cin, H, W). Returns (down_out, skip_out), NCHW."""
    x = jnp.transpose(x_nchw, (0, 2, 3, 1))            # NCHW -> NHWC (boundary only)
    down, skip = downblock_pallas_nhwc(x, params, strip_rows=strip_rows)
    return jnp.transpose(down, (0, 3, 1, 2)), jnp.transpose(skip, (0, 3, 1, 2))


# ---------------------------------------------------------------------------
# Plain-JAX reference for a sanity check
# ---------------------------------------------------------------------------

def _reference_forward(x_nchw, params):
    x = x_nchw
    for (w, b) in params:
        x = jax.lax.conv_general_dilated(
            x, w, window_strides=(1, 1), padding="SAME",
            dimension_numbers=("NCHW", "HWIO", "NCHW"))
        x = jax.nn.relu(x + b[None, :, None, None])
    skip = x
    down = jax.lax.reduce_window(
        skip, -jnp.inf, jax.lax.max,
        window_dimensions=(1, 1, 2, 2), window_strides=(1, 1, 2, 2),
        padding="VALID")
    return down, skip


if __name__ == "__main__":
    _single_buffer_mode()                 # run the capability probe outside jit tracing

    key = jax.random.PRNGKey(0)
    kx, kp = jax.random.split(key)

    B, Cin, H, W, Cout = 2, 4, 16, 16, 8
    x = jax.random.normal(kx, (B, Cin, H, W), jnp.float32)

    params2 = init_downblock_params(kp, Cin, Cout, conv_type="double")
    params3 = init_downblock_params(kp, Cin, Cout, conv_type="triple")

    # bf16 MXU operands with f32 accumulation -> compare with a relaxed tolerance.
    ATOL = RTOL = 5e-2
    for name, params in (("double", params2), ("triple", params3)):
        ref_down, ref_skip = _reference_forward(x, params)
        for strip_rows in (None, 8):      # auto (single strip) and forced 2-strip halo path
            down_out, skip_out = downblock_forward(x, params, strip_rows=strip_rows)
            jax.block_until_ready((down_out, skip_out))
            assert down_out.shape == (B, Cout, H // 2, W // 2)
            assert skip_out.shape == (B, Cout, H, W)
            assert jnp.allclose(skip_out, ref_skip, atol=ATOL, rtol=RTOL), \
                (name, strip_rows, "skip mismatch")
            assert jnp.allclose(down_out, ref_down, atol=ATOL, rtol=RTOL), \
                (name, strip_rows, "down mismatch")

    print("KERNEL_OK")
</pallas_src>

<mosaic_0001>
module attributes {stable_mosaic.version = 11 : i64} {
  func.func @_probe_kernel(%arg0: i32, %arg1: memref<8x128xf32, #tpu.memory_space<vmem>>, %arg2: memref<8x128xf32, #tpu.memory_space<vmem>>) attributes {dimension_semantics = [#tpu.dimension_semantics<arbitrary>], iteration_bounds = array<i64: 1>, scalar_prefetch = 0 : i64, scratch_operands = 0 : i64, tpu.core_type = #tpu.core_type<tc>, window_params = [{pipeline_mode = #tpu.pipeline_mode<synchronous>, transform_indices = @transform_0, window_bounds = array<i64: 8, 128>}, {pipeline_mode = #tpu.pipeline_mode<synchronous>, transform_indices = @transform_1, window_bounds = array<i64: 8, 128>}]} {
    %c0 = arith.constant 0 : index
    %c0_0 = arith.constant 0 : index
    %0 = vector.load %arg1[%c0, %c0_0] : memref<8x128xf32, #tpu.memory_space<vmem>>, vector<8x128xf32>
    %cst = arith.constant 1.000000e+00 : f32
    %1 = vector.broadcast %cst : f32 to vector<8x128xf32>
    %2 = arith.addf %0, %1 : vector<8x128xf32>
    %c0_1 = arith.constant 0 : index
    %c0_2 = arith.constant 0 : index
    %3 = vector.load %arg2[%c0_1, %c0_2] : memref<8x128xf32, #tpu.memory_space<vmem>>, vector<8x128xf32>
    tpu.vector_store %arg2[%c0_1, %c0_2], %2 {strides = array<i32>} : memref<8x128xf32, #tpu.memory_space<vmem>>, vector<8x128xf32>,
    return
  }
  func.func @transform_0(%arg0: i32) -> (i32, i32) {
    %c0_i32 = arith.constant 0 : i32
    %c0_i32_0 = arith.constant 0 : i32
    %c0_i32_1 = arith.constant 0 : i32
    return %c0_i32, %c0_i32_0 : i32, i32
  }
  func.func @transform_1(%arg0: i32) -> (i32, i32) {
    %c0_i32 = arith.constant 0 : i32
    %c0_i32_0 = arith.constant 0 : i32
    %c0_i32_1 = arith.constant 0 : i32
    return %c0_i32, %c0_i32_0 : i32, i32
  }
}

module attributes {stable_mosaic.version = 11 : i64} {
  func.func @kernel(%arg0: i32, %arg1: i32, %arg2: memref<1x8x16x4xf32, #tpu.memory_space<vmem>>, %arg3: memref<1x16x16x4xf32, #tpu.memory_space<vmem>>, %arg4: memref<1x8x16x4xf32, #tpu.memory_space<vmem>>, %arg5: memref<3x384x128xbf16, #tpu.memory_space<vmem>>, %arg6: memref<1x128xf32, #tpu.memory_space<vmem>>, %arg7: memref<3x384x128xbf16, #tpu.memory_space<vmem>>, %arg8: memref<1x128xf32, #tpu.memory_space<vmem>>, %arg9: memref<1x8x8x8xf32, #tpu.memory_space<vmem>>, %arg10: memref<1x16x16x8xf32, #tpu.memory_space<vmem>>, %arg11: memref<22x16x384xbf16, #tpu.memory_space<vmem>>, %arg12: memref<20x16x128xf32, #tpu.memory_space<vmem>>) attributes {dimension_semantics = [#tpu.dimension_semantics<parallel>, #tpu.dimension_semantics<arbitrary>], iteration_bounds = array<i64: 2, 1>, scalar_prefetch = 0 : i64, scratch_operands = 2 : i64, tpu.core_type = #tpu.core_type<tc>, window_params = [{transform_indices = @transform_0, window_bounds = array<i64: 1, 8, 16, 4>}, {transform_indices = @transform_1, window_bounds = array<i64: 1, 16, 16, 4>}, {transform_indices = @transform_2, window_bounds = array<i64: 1, 8, 16, 4>}, {pipeline_mode = #tpu.pipeline_mode<synchronous>, transform_indices = @transform_3, window_bounds = array<i64: 3, 384, 128>}, {pipeline_mode = #tpu.pipeline_mode<synchronous>, transform_indices = @transform_4, window_bounds = array<i64: 1, 128>}, {pipeline_mode = #tpu.pipeline_mode<synchronous>, transform_indices = @transform_5, window_bounds = array<i64: 3, 384, 128>}, {pipeline_mode = #tpu.pipeline_mode<synchronous>, transform_indices = @transform_6, window_bounds = array<i64: 1, 128>}, {transform_indices = @transform_7, window_bounds = array<i64: 1, 8, 8, 8>}, {transform_indices = @transform_8, window_bounds = array<i64: 1, 16, 16, 8>}]} {
    %c0_i32 = arith.constant 0 : i32
    %0 = arith.cmpi eq, %arg1, %c0_i32 : i32
    %1 = arith.extui %0 : i1 to i32
    %c0_i32_0 = arith.constant 0 : i32
    %2 = arith.cmpi ne, %1, %c0_i32_0 : i32
    scf.if %2 {
      %cst_142 = arith.constant 0.000000e+00 : bf16
      %113 = vector.broadcast %cst_142 : bf16 to vector<22x16x384xbf16>
      %c0_143 = arith.constant 0 : index
      %c0_144 = arith.constant 0 : index
      %c0_145 = arith.constant 0 : index
      %114 = vector.load %arg11[%c0_143, %c0_144, %c0_145] : memref<22x16x384xbf16, #tpu.memory_space<vmem>>, vector<22x16x384xbf16>
      tpu.vector_store %arg11[%c0_143, %c0_144, %c0_145], %113 {strides = array<i32>} : memref<22x16x384xbf16, #tpu.memory_space<vmem>>, vector<22x16x384xbf16>,
    } else {
    }
    %c0 = arith.constant 0 : index
    %c0_1 = arith.constant 0 : index
    %c0_2 = arith.constant 0 : index
    %c0_3 = arith.constant 0 : index
    %3 = vector.load %arg3[%c0, %c0_1, %c0_2, %c0_3] : memref<1x16x16x4xf32, #tpu.memory_space<vmem>>, vector<1x16x16x4xf32>
    %4 = vector.shape_cast %3 : vector<1x16x16x4xf32> to vector<16x16x4xf32>
    %5 = arith.truncf %4 : vector<16x16x4xf32> to vector<16x16x4xbf16>
    %6 = vector.extract_strided_slice %5 {offsets = [0, 0, 0], sizes = [16, 15, 4], strides = [1, 1, 1]} : vector<16x16x4xbf16> to vector<16x15x4xbf16>
    %c3 = arith.constant 3 : index
    %c1 = arith.constant 1 : index
    %c0_4 = arith.constant 0 : index
    %7 = vector.load %arg11[%c3, %c1, %c0_4] : memref<22x16x384xbf16, #tpu.memory_space<vmem>>, vector<16x15x4xbf16>
    tpu.vector_store %arg11[%c3, %c1, %c0_4], %6 {strides = array<i32>} : memref<22x16x384xbf16, #tpu.memory_space<vmem>>, vector<16x15x4xbf16>,
    %c3_5 = arith.constant 3 : index
    %c0_6 = arith.constant 0 : index
    %c128 = arith.constant 128 : index
    %8 = vector.load %arg11[%c3_5, %c0_6, %c128] : memref<22x16x384xbf16, #tpu.memory_space<vmem>>, vector<16x16x4xbf16>
    tpu.vector_store %arg11[%c3_5, %c0_6, %c128], %5 {strides = array<i32>} : memref<22x16x384xbf16, #tpu.memory_space<vmem>>, vector<16x16x4xbf16>,
    %9 = vector.extract_strided_slice %5 {offsets = [0, 1, 0], sizes = [16, 15, 4], strides = [1, 1, 1]} : vector<16x16x4xbf16> to vector<16x15x4xbf16>
    %c3_7 = arith.constant 3 : index
    %c0_8 = arith.constant 0 : index
    %c256 = arith.constant 256 : index
    %10 = vector.load %arg11[%c3_7, %c0_8, %c256] : memref<22x16x384xbf16, #tpu.memory_space<vmem>>, vector<16x15x4xbf16>
    tpu.vector_store %arg11[%c3_7, %c0_8, %c256], %9 {strides = array<i32>} : memref<22x16x384xbf16, #tpu.memory_space<vmem>>, vector<16x15x4xbf16>,
    %c0_i32_9 = arith.constant 0 : i32
    %11 = arith.cmpi sgt, %arg1, %c0_i32_9 : i32
    %12 = arith.extui %11 : i1 to i32
    %c0_i32_10 = arith.constant 0 : i32
    %13 = arith.cmpi ne, %12, %c0_i32_10 : i32
    scf.if %13 {
      %c0_142 = arith.constant 0 : index
      %c0_143 = arith.constant 0 : index
      %c0_144 = arith.constant 0 : index
      %c0_145 = arith.constant 0 : index
      %113 = vector.load %arg2[%c0_142, %c0_143, %c0_144, %c0_145] : memref<1x8x16x4xf32, #tpu.memory_space<vmem>>, vector<1x8x16x4xf32>
      %114 = vector.shape_cast %113 : vector<1x8x16x4xf32> to vector<8x16x4xf32>
      %115 = vector.extract_strided_slice %114 {offsets = [6, 0, 0], sizes = [2, 16, 4], strides = [1, 1, 1]} : vector<8x16x4xf32> to vector<2x16x4xf32>
      %116 = arith.truncf %115 : vector<2x16x4xf32> to vector<2x16x4xbf16>
      %117 = vector.extract_strided_slice %116 {offsets = [0, 0, 0], sizes = [2, 15, 4], strides = [1, 1, 1]} : vector<2x16x4xbf16> to vector<2x15x4xbf16>
      %c1_146 = arith.constant 1 : index
      %c1_147 = arith.constant 1 : index
      %c0_148 = arith.constant 0 : index
      %118 = vector.load %arg11[%c1_146, %c1_147, %c0_148] : memref<22x16x384xbf16, #tpu.memory_space<vmem>>, vector<2x15x4xbf16>
      tpu.vector_store %arg11[%c1_146, %c1_147, %c0_148], %117 {strides = array<i32>} : memref<22x16x384xbf16, #tpu.memory_space<vmem>>, vector<2x15x4xbf16>,
      %c1_149 = arith.constant 1 : index
      %c0_150 = arith.constant 0 : index
      %c128_151 = arith.constant 128 : index
      %119 = vector.load %arg11[%c1_149, %c0_150, %c128_151] : memref<22x16x384xbf16, #tpu.memory_space<vmem>>, vector<2x16x4xbf16>
      tpu.vector_store %arg11[%c1_149, %c0_150, %c128_151], %116 {strides = array<i32>} : memref<22x16x384xbf16, #tpu.memory_space<vmem>>, vector<2x16x4xbf16>,
      %120 = vector.extract_strided_slice %116 {offsets = [0, 1, 0], sizes = [2, 15, 4], strides = [1, 1, 1]} : vector<2x16x4xbf16> to vector<2x15x4xbf16>
      %c1_152 = arith.constant 1 : index
      %c0_153 = arith.constant 0 : index
      %c256_154 = arith.constant 256 : index
      %121 = vector.load %arg11[%c1_152, %c0_153, %c256_154] : memref<22x16x384xbf16, #tpu.memory_space<vmem>>, vector<2x15x4xbf16>
      tpu.vector_store %arg11[%c1_152, %c0_153, %c256_154], %120 {strides = array<i32>} : memref<22x16x384xbf16, #tpu.memory_space<vmem>>, vector<2x15x4xbf16>,
    } else {
    }
    %c0_i32_11 = arith.constant 0 : i32
    %14 = arith.cmpi slt, %arg1, %c0_i32_11 : i32
    %15 = arith.extui %14 : i1 to i32
    %c0_i32_12 = arith.constant 0 : i32
    %16 = arith.cmpi ne, %15, %c0_i32_12 : i32
    scf.if %16 {
      %c0_142 = arith.constant 0 : index
      %c0_143 = arith.constant 0 : index
      %c0_144 = arith.constant 0 : index
      %c0_145 = arith.constant 0 : index
      %113 = vector.load %arg4[%c0_142, %c0_143, %c0_144, %c0_145] : memref<1x8x16x4xf32, #tpu.memory_space<vmem>>, vector<1x8x16x4xf32>
      %114 = vector.shape_cast %113 : vector<1x8x16x4xf32> to vector<8x16x4xf32>
      %115 = vector.extract_strided_slice %114 {offsets = [0, 0, 0], sizes = [2, 16, 4], strides = [1, 1, 1]} : vector<8x16x4xf32> to vector<2x16x4xf32>
      %116 = arith.truncf %115 : vector<2x16x4xf32> to vector<2x16x4xbf16>
      %117 = vector.extract_strided_slice %116 {offsets = [0, 0, 0], sizes = [2, 15, 4], strides = [1, 1, 1]} : vector<2x16x4xbf16> to vector<2x15x4xbf16>
      %c19 = arith.constant 19 : index
      %c1_146 = arith.constant 1 : index
      %c0_147 = arith.constant 0 : index
      %118 = vector.load %arg11[%c19, %c1_146, %c0_147] : memref<22x16x384xbf16, #tpu.memory_space<vmem>>, vector<2x15x4xbf16>
      tpu.vector_store %arg11[%c19, %c1_146, %c0_147], %117 {strides = array<i32>} : memref<22x16x384xbf16, #tpu.memory_space<vmem>>, vector<2x15x4xbf16>,
      %c19_148 = arith.constant 19 : index
      %c0_149 = arith.constant 0 : index
      %c128_150 = arith.constant 128 : index
      %119 = vector.load %arg11[%c19_148, %c0_149, %c128_150] : memref<22x16x384xbf16, #tpu.memory_space<vmem>>, vector<2x16x4xbf16>
      tpu.vector_store %arg11[%c19_148, %c0_149, %c128_150], %116 {strides = array<i32>} : memref<22x16x384xbf16, #tpu.memory_space<vmem>>, vector<2x16x4xbf16>,
      %120 = vector.extract_strided_slice %116 {offsets = [0, 1, 0], sizes = [2, 15, 4], strides = [1, 1, 1]} : vector<2x16x4xbf16> to vector<2x15x4xbf16>
      %c19_151 = arith.constant 19 : index
      %c0_152 = arith.constant 0 : index
      %c256_153 = arith.constant 256 : index
      %121 = vector.load %arg11[%c19_151, %c0_152, %c256_153] : memref<22x16x384xbf16, #tpu.memory_space<vmem>>, vector<2x15x4xbf16>
      tpu.vector_store %arg11[%c19_151, %c0_152, %c256_153], %120 {strides = array<i32>} : memref<22x16x384xbf16, #tpu.memory_space<vmem>>, vector<2x15x4xbf16>,
    } else {
    }
    %c0_i32_13 = arith.constant 0 : i32
    %17 = arith.cmpi eq, %arg1, %c0_i32_13 : i32
    %18 = arith.extui %17 : i1 to i32
    %c0_i32_14 = arith.constant 0 : i32
    %19 = arith.cmpi ne, %18, %c0_i32_14 : i32
    scf.if %19 {
      %cst_142 = arith.constant 0.000000e+00 : bf16
      %113 = vector.broadcast %cst_142 : bf16 to vector<2x16x384xbf16>
      %c19 = arith.constant 19 : index
      %c0_143 = arith.constant 0 : index
      %c0_144 = arith.constant 0 : index
      %114 = vector.load %arg11[%c19, %c0_143, %c0_144] : memref<22x16x384xbf16, #tpu.memory_space<vmem>>, vector<2x16x384xbf16>
      tpu.vector_store %arg11[%c19, %c0_143, %c0_144], %113 {strides = array<i32>} : memref<22x16x384xbf16, #tpu.memory_space<vmem>>, vector<2x16x384xbf16>,
    } else {
    }
    %c0_15 = arith.constant 0 : index
    %c0_16 = arith.constant 0 : index
    %c0_17 = arith.constant 0 : index
    %20 = vector.load %arg11[%c0_15, %c0_16, %c0_17] : memref<22x16x384xbf16, #tpu.memory_space<vmem>>, vector<20x16x384xbf16>
    %21 = vector.shape_cast %20 : vector<20x16x384xbf16> to vector<320x384xbf16>
    %c0_18 = arith.constant 0 : index
    %c0_19 = arith.constant 0 : index
    %c0_20 = arith.constant 0 : index
    %22 = vector.load %arg5[%c0_18, %c0_19, %c0_20] : memref<3x384x128xbf16, #tpu.memory_space<vmem>>, vector<1x384x128xbf16>
    %23 = vector.shape_cast %22 : vector<1x384x128xbf16> to vector<384x128xbf16>
    %cst = arith.constant dense<0.000000e+00> : vector<320x128xf32>
    %24 = tpu.matmul %21, %23, %cst {dimension_numbers = #tpu.dot_dimension_numbers<[1], [0], [0], [1], [0, 0, 1, 1], [], []>} : vector<320x384xbf16>, vector<384x128xbf16>, vector<320x128xf32> -> vector<320x128xf32>
    %25 = vector.shape_cast %24 : vector<320x128xf32> to vector<20x16x128xf32>
    %c0_21 = arith.constant 0 : index
    %c0_22 = arith.constant 0 : index
    %c0_23 = arith.constant 0 : index
    %26 = vector.load %arg12[%c0_21, %c0_22, %c0_23] : memref<20x16x128xf32, #tpu.memory_space<vmem>>, vector<20x16x128xf32>
    tpu.vector_store %arg12[%c0_21, %c0_22, %c0_23], %25 {strides = array<i32>} : memref<20x16x128xf32, #tpu.memory_space<vmem>>, vector<20x16x128xf32>,
    %c1_24 = arith.constant 1 : index
    %c0_25 = arith.constant 0 : index
    %c0_26 = arith.constant 0 : index
    %27 = vector.load %arg11[%c1_24, %c0_25, %c0_26] : memref<22x16x384xbf16, #tpu.memory_space<vmem>>, vector<20x16x384xbf16>
    %28 = vector.shape_cast %27 : vector<20x16x384xbf16> to vector<320x384xbf16>
    %c1_27 = arith.constant 1 : index
    %c0_28 = arith.constant 0 : index
    %c0_29 = arith.constant 0 : index
    %29 = vector.load %arg5[%c1_27, %c0_28, %c0_29] : memref<3x384x128xbf16, #tpu.memory_space<vmem>>, vector<1x384x128xbf16>
    %30 = vector.shape_cast %29 : vector<1x384x128xbf16> to vector<384x128xbf16>
    %cst_30 = arith.constant dense<0.000000e+00> : vector<320x128xf32>
    %31 = tpu.matmul %28, %30, %cst_30 {dimension_numbers = #tpu.dot_dimension_numbers<[1], [0], [0], [1], [0, 0, 1, 1], [], []>} : vector<320x384xbf16>, vector<384x128xbf16>, vector<320x128xf32> -> vector<320x128xf32>
    %32 = vector.shape_cast %31 : vector<320x128xf32> to vector<20x16x128xf32>
    %c0_31 = arith.constant 0 : index
    %c0_32 = arith.constant 0 : index
    %c0_33 = arith.constant 0 : index
    %33 = vector.load %arg12[%c0_31, %c0_32, %c0_33] : memref<20x16x128xf32, #tpu.memory_space<vmem>>, vector<20x16x128xf32>
    %34 = arith.addf %33, %32 : vector<20x16x128xf32>
    %c0_34 = arith.constant 0 : index
    %c0_35 = arith.constant 0 : index
    %c0_36 = arith.constant 0 : index
    %35 = vector.load %arg12[%c0_34, %c0_35, %c0_36] : memref<20x16x128xf32, #tpu.memory_space<vmem>>, vector<20x16x128xf32>
    tpu.vector_store %arg12[%c0_34, %c0_35, %c0_36], %34 {strides = array<i32>} : memref<20x16x128xf32, #tpu.memory_space<vmem>>, vector<20x16x128xf32>,
    %c2 = arith.constant 2 : index
    %c0_37 = arith.constant 0 : index
    %c0_38 = arith.constant 0 : index
    %36 = vector.load %arg11[%c2, %c0_37, %c0_38] : memref<22x16x384xbf16, #tpu.memory_space<vmem>>, vector<20x16x384xbf16>
    %37 = vector.shape_cast %36 : vector<20x16x384xbf16> to vector<320x384xbf16>
    %c2_39 = arith.constant 2 : index
    %c0_40 = arith.constant 0 : index
    %c0_41 = arith.constant 0 : index
    %38 = vector.load %arg5[%c2_39, %c0_40, %c0_41] : memref<3x384x128xbf16, #tpu.memory_space<vmem>>, vector<1x384x128xbf16>
    %39 = vector.shape_cast %38 : vector<1x384x128xbf16> to vector<384x128xbf16>
    %cst_42 = arith.constant dense<0.000000e+00> : vector<320x128xf32>
    %40 = tpu.matmul %37, %39, %cst_42 {dimension_numbers = #tpu.dot_dimension_numbers<[1], [0], [0], [1], [0, 0, 1, 1], [], []>} : vector<320x384xbf16>, vector<384x128xbf16>, vector<320x128xf32> -> vector<320x128xf32>
    %41 = vector.shape_cast %40 : vector<320x128xf32> to vector<20x16x128xf32>
    %c0_43 = arith.constant 0 : index
    %c0_44 = arith.constant 0 : index
    %c0_45 = arith.constant 0 : index
    %42 = vector.load %arg12[%c0_43, %c0_44, %c0_45] : memref<20x16x128xf32, #tpu.memory_space<vmem>>, vector<20x16x128xf32>
    %43 = arith.addf %42, %41 : vector<20x16x128xf32>
    %c0_46 = arith.constant 0 : index
    %c0_47 = arith.constant 0 : index
    %c0_48 = arith.constant 0 : index
    %44 = vector.load %arg12[%c0_46, %c0_47, %c0_48] : memref<20x16x128xf32, #tpu.memory_space<vmem>>, vector<20x16x128xf32>
    tpu.vector_store %arg12[%c0_46, %c0_47, %c0_48], %43 {strides = array<i32>} : memref<20x16x128xf32, #tpu.memory_space<vmem>>, vector<20x16x128xf32>,
    %c0_49 = arith.constant 0 : index
    %c0_50 = arith.constant 0 : index
    %c0_51 = arith.constant 0 : index
    %45 = vector.load %arg12[%c0_49, %c0_50, %c0_51] : memref<20x16x128xf32, #tpu.memory_space<vmem>>, vector<20x16x128xf32>
    %c0_52 = arith.constant 0 : index
    %c0_53 = arith.constant 0 : index
    %46 = vector.load %arg6[%c0_52, %c0_53] : memref<1x128xf32, #tpu.memory_space<vmem>>, vector<1x128xf32>
    %47 = vector.shape_cast %46 : vector<1x128xf32> to vector<1x1x128xf32>
    %48 = vector.broadcast %47 : vector<1x1x128xf32> to vector<20x16x128xf32>
    %49 = arith.addf %45, %48 : vector<20x16x128xf32>
    %cst_54 = arith.constant 0.000000e+00 : f32
    %50 = vector.broadcast %cst_54 : f32 to vector<20x16x128xf32>
    %51 = arith.maximumf %49, %50 : vector<20x16x128xf32>
    %c0_55 = arith.constant 0 : index
    %c0_56 = arith.constant 0 : index
    %c0_57 = arith.constant 0 : index
    %52 = vector.load %arg12[%c0_55, %c0_56, %c0_57] : memref<20x16x128xf32, #tpu.memory_space<vmem>>, vector<20x16x128xf32>
    tpu.vector_store %arg12[%c0_55, %c0_56, %c0_57], %51 {strides = array<i32>} : memref<20x16x128xf32, #tpu.memory_space<vmem>>, vector<20x16x128xf32>,
    %c0_58 = arith.constant 0 : index
    %c0_59 = arith.constant 0 : index
    %c0_60 = arith.constant 0 : index
    %53 = vector.load %arg12[%c0_58, %c0_59, %c0_60] : memref<20x16x128xf32, #tpu.memory_space<vmem>>, vector<20x16x128xf32>
    %54 = arith.truncf %53 : vector<20x16x128xf32> to vector<20x16x128xbf16>
    %55 = vector.extract_strided_slice %54 {offsets = [0, 0, 0], sizes = [20, 15, 128], strides = [1, 1, 1]} : vector<20x16x128xbf16> to vector<20x15x128xbf16>
    %c1_61 = arith.constant 1 : index
    %c1_62 = arith.constant 1 : index
    %c0_63 = arith.constant 0 : index
    %56 = vector.load %arg11[%c1_61, %c1_62, %c0_63] : memref<22x16x384xbf16, #tpu.memory_space<vmem>>, vector<20x15x128xbf16>
    tpu.vector_store %arg11[%c1_61, %c1_62, %c0_63], %55 {strides = array<i32>} : memref<22x16x384xbf16, #tpu.memory_space<vmem>>, vector<20x15x128xbf16>,
    %c1_64 = arith.constant 1 : index
    %c0_65 = arith.constant 0 : index
    %c128_66 = arith.constant 128 : index
    %57 = vector.load %arg11[%c1_64, %c0_65, %c128_66] : memref<22x16x384xbf16, #tpu.memory_space<vmem>>, vector<20x16x128xbf16>
    tpu.vector_store %arg11[%c1_64, %c0_65, %c128_66], %54 {strides = array<i32>} : memref<22x16x384xbf16, #tpu.memory_space<vmem>>, vector<20x16x128xbf16>,
    %58 = vector.extract_strided_slice %54 {offsets = [0, 1, 0], sizes = [20, 15, 128], strides = [1, 1, 1]} : vector<20x16x128xbf16> to vector<20x15x128xbf16>
    %c1_67 = arith.constant 1 : index
    %c0_68 = arith.constant 0 : index
    %c256_69 = arith.constant 256 : index
    %59 = vector.load %arg11[%c1_67, %c0_68, %c256_69] : memref<22x16x384xbf16, #tpu.memory_space<vmem>>, vector<20x15x128xbf16>
    tpu.vector_store %arg11[%c1_67, %c0_68, %c256_69], %58 {strides = array<i32>} : memref<22x16x384xbf16, #tpu.memory_space<vmem>>, vector<20x15x128xbf16>,
    %c0_i32_70 = arith.constant 0 : i32
    %60 = arith.cmpi eq, %arg1, %c0_i32_70 : i32
    %61 = arith.extui %60 : i1 to i32
    %c0_i32_71 = arith.constant 0 : i32
    %62 = arith.cmpi ne, %61, %c0_i32_71 : i32
    scf.if %62 {
      %cst_142 = arith.constant 0.000000e+00 : bf16
      %113 = vector.broadcast %cst_142 : bf16 to vector<2x16x384xbf16>
      %c1_143 = arith.constant 1 : index
      %c0_144 = arith.constant 0 : index
      %c0_145 = arith.constant 0 : index
      %114 = vector.load %arg11[%c1_143, %c0_144, %c0_145] : memref<22x16x384xbf16, #tpu.memory_space<vmem>>, vector<2x16x384xbf16>
      tpu.vector_store %arg11[%c1_143, %c0_144, %c0_145], %113 {strides = array<i32>} : memref<22x16x384xbf16, #tpu.memory_space<vmem>>, vector<2x16x384xbf16>,
    } else {
    }
    %c0_i32_72 = arith.constant 0 : i32
    %63 = arith.cmpi eq, %arg1, %c0_i32_72 : i32
    %64 = arith.extui %63 : i1 to i32
    %c0_i32_73 = arith.constant 0 : i32
    %65 = arith.cmpi ne, %64, %c0_i32_73 : i32
    scf.if %65 {
      %cst_142 = arith.constant 0.000000e+00 : bf16
      %113 = vector.broadcast %cst_142 : bf16 to vector<2x16x384xbf16>
      %c19 = arith.constant 19 : index
      %c0_143 = arith.constant 0 : index
      %c0_144 = arith.constant 0 : index
      %114 = vector.load %arg11[%c19, %c0_143, %c0_144] : memref<22x16x384xbf16, #tpu.memory_space<vmem>>, vector<2x16x384xbf16>
      tpu.vector_store %arg11[%c19, %c0_143, %c0_144], %113 {strides = array<i32>} : memref<22x16x384xbf16, #tpu.memory_space<vmem>>, vector<2x16x384xbf16>,
    } else {
    }
    %c0_74 = arith.constant 0 : index
    %c0_75 = arith.constant 0 : index
    %c0_76 = arith.constant 0 : index
    %66 = vector.load %arg11[%c0_74, %c0_75, %c0_76] : memref<22x16x384xbf16, #tpu.memory_space<vmem>>, vector<20x16x384xbf16>
    %67 = vector.shape_cast %66 : vector<20x16x384xbf16> to vector<320x384xbf16>
    %c0_77 = arith.constant 0 : index
    %c0_78 = arith.constant 0 : index
    %c0_79 = arith.constant 0 : index
    %68 = vector.load %arg7[%c0_77, %c0_78, %c0_79] : memref<3x384x128xbf16, #tpu.memory_space<vmem>>, vector<1x384x128xbf16>
    %69 = vector.shape_cast %68 : vector<1x384x128xbf16> to vector<384x128xbf16>
    %cst_80 = arith.constant dense<0.000000e+00> : vector<320x128xf32>
    %70 = tpu.matmul %67, %69, %cst_80 {dimension_numbers = #tpu.dot_dimension_numbers<[1], [0], [0], [1], [0, 0, 1, 1], [], []>} : vector<320x384xbf16>, vector<384x128xbf16>, vector<320x128xf32> -> vector<320x128xf32>
    %71 = vector.shape_cast %70 : vector<320x128xf32> to vector<20x16x128xf32>
    %c0_81 = arith.constant 0 : index
    %c0_82 = arith.constant 0 : index
    %c0_83 = arith.constant 0 : index
    %72 = vector.load %arg12[%c0_81, %c0_82, %c0_83] : memref<20x16x128xf32, #tpu.memory_space<vmem>>, vector<20x16x128xf32>
    tpu.vector_store %arg12[%c0_81, %c0_82, %c0_83], %71 {strides = array<i32>} : memref<20x16x128xf32, #tpu.memory_space<vmem>>, vector<20x16x128xf32>,
    %c1_84 = arith.constant 1 : index
    %c0_85 = arith.constant 0 : index
    %c0_86 = arith.constant 0 : index
    %73 = vector.load %arg11[%c1_84, %c0_85, %c0_86] : memref<22x16x384xbf16, #tpu.memory_space<vmem>>, vector<20x16x384xbf16>
    %74 = vector.shape_cast %73 : vector<20x16x384xbf16> to vector<320x384xbf16>
    %c1_87 = arith.constant 1 : index
    %c0_88 = arith.constant 0 : index
    %c0_89 = arith.constant 0 : index
    %75 = vector.load %arg7[%c1_87, %c0_88, %c0_89] : memref<3x384x128xbf16, #tpu.memory_space<vmem>>, vector<1x384x128xbf16>
    %76 = vector.shape_cast %75 : vector<1x384x128xbf16> to vector<384x128xbf16>
    %cst_90 = arith.constant dense<0.000000e+00> : vector<320x128xf32>
    %77 = tpu.matmul %74, %76, %cst_90 {dimension_numbers = #tpu.dot_dimension_numbers<[1], [0], [0], [1], [0, 0, 1, 1], [], []>} : vector<320x384xbf16>, vector<384x128xbf16>, vector<320x128xf32> -> vector<320x128xf32>
    %78 = vector.shape_cast %77 : vector<320x128xf32> to vector<20x16x128xf32>
    %c0_91 = arith.constant 0 : index
    %c0_92 = arith.constant 0 : index
    %c0_93 = arith.constant 0 : index
    %79 = vector.load %arg12[%c0_91, %c0_92, %c0_93] : memref<20x16x128xf32, #tpu.memory_space<vmem>>, vector<20x16x128xf32>
    %80 = arith.addf %79, %78 : vector<20x16x128xf32>
    %c0_94 = arith.constant 0 : index
    %c0_95 = arith.constant 0 : index
    %c0_96 = arith.constant 0 : index
    %81 = vector.load %arg12[%c0_94, %c0_95, %c0_96] : memref<20x16x128xf32, #tpu.memory_space<vmem>>, vector<20x16x128xf32>
    tpu.vector_store %arg12[%c0_94, %c0_95, %c0_96], %80 {strides = array<i32>} : memref<20x16x128xf32, #tpu.memory_space<vmem>>, vector<20x16x128xf32>,
    %c2_97 = arith.constant 2 : index
    %c0_98 = arith.constant 0 : index
    %c0_99 = arith.constant 0 : index
    %82 = vector.load %arg11[%c2_97, %c0_98, %c0_99] : memref<22x16x384xbf16, #tpu.memory_space<vmem>>, vector<20x16x384xbf16>
    %83 = vector.shape_cast %82 : vector<20x16x384xbf16> to vector<320x384xbf16>
    %c2_100 = arith.constant 2 : index
    %c0_101 = arith.constant 0 : index
    %c0_102 = arith.constant 0 : index
    %84 = vector.load %arg7[%c2_100, %c0_101, %c0_102] : memref<3x384x128xbf16, #tpu.memory_space<vmem>>, vector<1x384x128xbf16>
    %85 = vector.shape_cast %84 : vector<1x384x128xbf16> to vector<384x128xbf16>
    %cst_103 = arith.constant dense<0.000000e+00> : vector<320x128xf32>
    %86 = tpu.matmul %83, %85, %cst_103 {dimension_numbers = #tpu.dot_dimension_numbers<[1], [0], [0], [1], [0, 0, 1, 1], [], []>} : vector<320x384xbf16>, vector<384x128xbf16>, vector<320x128xf32> -> vector<320x128xf32>
    %87 = vector.shape_cast %86 : vector<320x128xf32> to vector<20x16x128xf32>
    %c0_104 = arith.constant 0 : index
    %c0_105 = arith.constant 0 : index
    %c0_106 = arith.constant 0 : index
    %88 = vector.load %arg12[%c0_104, %c0_105, %c0_106] : memref<20x16x128xf32, #tpu.memory_space<vmem>>, vector<20x16x128xf32>
    %89 = arith.addf %88, %87 : vector<20x16x128xf32>
    %c0_107 = arith.constant 0 : index
    %c0_108 = arith.constant 0 : index
    %c0_109 = arith.constant 0 : index
    %90 = vector.load %arg12[%c0_107, %c0_108, %c0_109] : memref<20x16x128xf32, #tpu.memory_space<vmem>>, vector<20x16x128xf32>
    tpu.vector_store %arg12[%c0_107, %c0_108, %c0_109], %89 {strides = array<i32>} : memref<20x16x128xf32, #tpu.memory_space<vmem>>, vector<20x16x128xf32>,
    %c0_110 = arith.constant 0 : index
    %c0_111 = arith.constant 0 : index
    %c0_112 = arith.constant 0 : index
    %91 = vector.load %arg12[%c0_110, %c0_111, %c0_112] : memref<20x16x128xf32, #tpu.memory_space<vmem>>, vector<20x16x128xf32>
    %c0_113 = arith.constant 0 : index
    %c0_114 = arith.constant 0 : index
    %92 = vector.load %arg8[%c0_113, %c0_114] : memref<1x128xf32, #tpu.memory_space<vmem>>, vector<1x128xf32>
    %93 = vector.shape_cast %92 : vector<1x128xf32> to vector<1x1x128xf32>
    %94 = vector.broadcast %93 : vector<1x1x128xf32> to vector<20x16x128xf32>
    %95 = arith.addf %91, %94 : vector<20x16x128xf32>
    %cst_115 = arith.constant 0.000000e+00 : f32
    %96 = vector.broadcast %cst_115 : f32 to vector<20x16x128xf32>
    %97 = arith.maximumf %95, %96 : vector<20x16x128xf32>
    %c0_116 = arith.constant 0 : index
    %c0_117 = arith.constant 0 : index
    %c0_118 = arith.constant 0 : index
    %98 = vector.load %arg12[%c0_116, %c0_117, %c0_118] : memref<20x16x128xf32, #tpu.memory_space<vmem>>, vector<20x16x128xf32>
    tpu.vector_store %arg12[%c0_116, %c0_117, %c0_118], %97 {strides = array<i32>} : memref<20x16x128xf32, #tpu.memory_space<vmem>>, vector<20x16x128xf32>,
    %c2_119 = arith.constant 2 : index
    %c0_120 = arith.constant 0 : index
    %c0_121 = arith.constant 0 : index
    %99 = vector.load %arg12[%c2_119, %c0_120, %c0_121] : memref<20x16x128xf32, #tpu.memory_space<vmem>>, vector<16x16x128xf32>
    %100 = vector.extract_strided_slice %99 {offsets = [0, 0, 0], sizes = [16, 16, 8], strides = [1, 1, 1]} : vector<16x16x128xf32> to vector<16x16x8xf32>
    %101 = vector.shape_cast %100 : vector<16x16x8xf32> to vector<1x16x16x8xf32>
    %c0_122 = arith.constant 0 : index
    %c0_123 = arith.constant 0 : index
    %c0_124 = arith.constant 0 : index
    %c0_125 = arith.constant 0 : index
    %102 = vector.load %arg10[%c0_122, %c0_123, %c0_124, %c0_125] : memref<1x16x16x8xf32, #tpu.memory_space<vmem>>, vector<1x16x16x8xf32>
    tpu.vector_store %arg10[%c0_122, %c0_123, %c0_124, %c0_125], %101 {strides = array<i32>} : memref<1x16x16x8xf32, #tpu.memory_space<vmem>>, vector<1x16x16x8xf32>,
    %c2_126 = arith.constant 2 : index
    %c0_127 = arith.constant 0 : index
    %c0_128 = arith.constant 0 : index
    %103 = tpu.strided_load %arg12[%c2_126, %c0_127, %c0_128] {strides = array<i32: 2, 2, 1>} : memref<20x16x128xf32, #tpu.memory_space<vmem>>, vector<8x8x128xf32>
    %c2_129 = arith.constant 2 : index
    %c1_130 = arith.constant 1 : index
    %c0_131 = arith.constant 0 : index
    %104 = tpu.strided_load %arg12[%c2_129, %c1_130, %c0_131] {strides = array<i32: 2, 2, 1>} : memref<20x16x128xf32, #tpu.memory_space<vmem>>, vector<8x8x128xf32>
    %c3_132 = arith.constant 3 : index
    %c0_133 = arith.constant 0 : index
    %c0_134 = arith.constant 0 : index
    %105 = tpu.strided_load %arg12[%c3_132, %c0_133, %c0_134] {strides = array<i32: 2, 2, 1>} : memref<20x16x128xf32, #tpu.memory_space<vmem>>, vector<8x8x128xf32>
    %c3_135 = arith.constant 3 : index
    %c1_136 = arith.constant 1 : index
    %c0_137 = arith.constant 0 : index
    %106 = tpu.strided_load %arg12[%c3_135, %c1_136, %c0_137] {strides = array<i32: 2, 2, 1>} : memref<20x16x128xf32, #tpu.memory_space<vmem>>, vector<8x8x128xf32>
    %107 = arith.maximumf %103, %104 : vector<8x8x128xf32>
    %108 = arith.maximumf %105, %106 : vector<8x8x128xf32>
    %109 = arith.maximumf %107, %108 : vector<8x8x128xf32>
    %110 = vector.extract_strided_slice %109 {offsets = [0, 0, 0], sizes = [8, 8, 8], strides = [1, 1, 1]} : vector<8x8x128xf32> to vector<8x8x8xf32>
    %111 = vector.shape_cast %110 : vector<8x8x8xf32> to vector<1x8x8x8xf32>
    %c0_138 = arith.constant 0 : index
    %c0_139 = arith.constant 0 : index
    %c0_140 = arith.constant 0 : index
    %c0_141 = arith.constant 0 : index
    %112 = vector.load %arg9[%c0_138, %c0_139, %c0_140, %c0_141] : memref<1x8x8x8xf32, #tpu.memory_space<vmem>>, vector<1x8x8x8xf32>
    tpu.vector_store %arg9[%c0_138, %c0_139, %c0_140, %c0_141], %111 {strides = array<i32>} : memref<1x8x8x8xf32, #tpu.memory_space<vmem>>, vector<1x8x8x8xf32>,
    return
  }
  func.func @transform_0(%arg0: i32, %arg1: i32) -> (i32, i32, i32, i32) {
    %c2_i32 = arith.constant 2 : i32
    %0 = arith.muli %arg1, %c2_i32 : i32
    %c1_i32 = arith.constant 1 : i32
    %1 = arith.subi %0, %c1_i32 : i32
    %c0_i32 = arith.constant 0 : i32
    %2 = arith.maxsi %1, %c0_i32 : i32
    %c0_i32_0 = arith.constant 0 : i32
    %c0_i32_1 = arith.constant 0 : i32
    %c0_i32_2 = arith.constant 0 : i32
    return %arg0, %2, %c0_i32_0, %c0_i32_1 : i32, i32, i32, i32
  }
  func.func @transform_1(%arg0: i32, %arg1: i32) -> (i32, i32, i32, i32) {
    %c0_i32 = arith.constant 0 : i32
    %c0_i32_0 = arith.constant 0 : i32
    %c0_i32_1 = arith.constant 0 : i32
    return %arg0, %arg1, %c0_i32, %c0_i32_0 : i32, i32, i32, i32
  }
  func.func @transform_2(%arg0: i32, %arg1: i32) -> (i32, i32, i32, i32) {
    %c1_i32 = arith.constant 1 : i32
    %0 = arith.addi %arg1, %c1_i32 : i32
    %c2_i32 = arith.constant 2 : i32
    %1 = arith.muli %0, %c2_i32 : i32
    %c1_i32_0 = arith.constant 1 : i32
    %2 = arith.minsi %1, %c1_i32_0 : i32
    %c0_i32 = arith.constant 0 : i32
    %c0_i32_1 = arith.constant 0 : i32
    %c0_i32_2 = arith.constant 0 : i32
    return %arg0, %2, %c0_i32, %c0_i32_1 : i32, i32, i32, i32
  }
  func.func @transform_3(%arg0: i32, %arg1: i32) -> (i32, i32, i32) {
    %c0_i32 = arith.constant 0 : i32
    %c0_i32_0 = arith.constant 0 : i32
    %c0_i32_1 = arith.constant 0 : i32
    %c0_i32_2 = arith.constant 0 : i32
    return %c0_i32, %c0_i32_0, %c0_i32_1 : i32, i32, i32
  }
  func.func @transform_4(%arg0: i32, %arg1: i32) -> (i32, i32) {
    %c0_i32 = arith.constant 0 : i32
    %c0_i32_0 = arith.constant 0 : i32
    %c0_i32_1 = arith.constant 0 : i32
    return %c0_i32, %c0_i32_0 : i32, i32
  }
  func.func @transform_5(%arg0: i32, %arg1: i32) -> (i32, i32, i32) {
    %c0_i32 = arith.constant 0 : i32
    %c0_i32_0 = arith.constant 0 : i32
    %c0_i32_1 = arith.constant 0 : i32
    %c0_i32_2 = arith.constant 0 : i32
    return %c0_i32, %c0_i32_0, %c0_i32_1 : i32, i32, i32
  }
  func.func @transform_6(%arg0: i32, %arg1: i32) -> (i32, i32) {
    %c0_i32 = arith.constant 0 : i32
    %c0_i32_0 = arith.constant 0 : i32
    %c0_i32_1 = arith.constant 0 : i32
    return %c0_i32, %c0_i32_0 : i32, i32
  }
  func.func @transform_7(%arg0: i32, %arg1: i32) -> (i32, i32, i32, i32) {
    %c0_i32 = arith.constant 0 : i32
    %c0_i32_0 = arith.constant 0 : i32
    %c0_i32_1 = arith.constant 0 : i32
    return %arg0, %arg1, %c0_i32, %c0_i32_0 : i32, i32, i32, i32
  }
  func.func @transform_8(%arg0: i32, %arg1: i32) -> (i32, i32, i32, i32) {
    %c0_i32 = arith.constant 0 : i32
    %c0_i32_0 = arith.constant 0 : i32
    %c0_i32_1 = arith.constant 0 : i32
    return %arg0, %arg1, %c0_i32, %c0_i32_0 : i32, i32, i32, i32
  }
}

</mosaic_0001>

<bundles_post_ra>
// kernel: tpu_custom_call.1
= control target key start
LH: loop header
LB: loop body
LE: loop exit
PB: predicated region body
PF: predicated region fallthrough
CT: control target
= control target key end

     0   :  { %6 = vsyncpa [#allocation3], 0  ;;  %s125_s0 = inlined_call_operand.hbm [shape: f32[8,128], index: 0, kind: input, shape index: {}]   ;;  %s126_s1 = inlined_call_operand.hbm [shape: f32[8,128], index: 1, kind: output, shape index: {}]  }
   0x1   :  { %7 = vsyncpa [#allocation4], 0  ;;  %s89_s6 = smov [#allocation2]   ;;  %s41_s10 = scalar_lea.hbm %s125_s0, 128 }
   0x2   :  { %s14_s7 = sshll.u32 %s89_s6, 4  ;;  %p42_p0 = scmp.ne.s32.totalorder %s125_s0, %s41_s10  ;;  %s15_s7 = int_to_ptr.vmem [resolvable:$true] %s14_s7 }
   0x3   :  { %p45_p1 = scmp.lt.u32.totalorder %s41_s10, %s125_s0 }
   0x5   :  { %p47_p2 = pnand %p45_p1, %p42_p0 }
   0x7   :  { %50 = shalt.err (!%p47_p2)
}
   0x8   :  { %s51_s15 = scalar_lea.vmem %s15_s7, 128  ;;  %p56_p4 = scmp.lt.s32.totalorder %s15_s7, %s15_s7 }
   0x9   :  { %p52_p3 = scmp.ne.s32.totalorder %s15_s7, %s51_s15  ;;  %p57_p5 = scmp.lt.s32.totalorder %s51_s15, %s51_s15 }
   0xb   :  { %p58_p6 = por %p57_p5, %p56_p4 }
   0xd   :  { %p59_p7 = pnand %p58_p6, %p52_p3 }
   0xf   :  { %62 = shalt.err (!%p59_p7)
}
  0x10   :  { %17 = dma.hbm_to_vmem [thread:$0]  %s125_s0, 128, %s15_s7, [#allocation3]  }
  0x11   :  { %85 = dma.done.wait [#allocation3], 128  }
  0x12   :  { %86 = vsyncadd [#allocation3], 4294967168  ;;  %s90_s18 = smov [#allocation5]   ;;  %v21_v0 = vld [vmem:[#allocation2] sm:$0xff] }
  0x13   :  { %s30_s19 = sshll.u32 %s90_s18, 4  ;;  %v22_v1 = vadd.f32 1.0, %v21_v0  ;;  %s31_s19 = int_to_ptr.vmem [resolvable:$true] %s30_s19 }
  0x14   :  { %s63_s20 = scalar_lea.vmem %s31_s19, 128  ;;  %p68_p9 = scmp.lt.s32.totalorder %s31_s19, %s31_s19 }
  0x15   :  { %23 = vst [vmem:[#allocation5] sm:$0xff] %v22_v1  ;;  %p64_p8 = scmp.ne.s32.totalorder %s31_s19, %s63_s20  ;;  %p69_p10 = scmp.lt.s32.totalorder %s63_s20, %s63_s20 }
  0x17   :  { %p70_p11 = por %p69_p10, %p68_p9 }
  0x19   :  { %p71_p12 = pnand %p70_p11, %p64_p8 }
  0x1b   :  { %74 = shalt.err (!%p71_p12)
}
  0x1c   :  { %s75_s23 = scalar_lea.hbm %s126_s1, 128 }
  0x1d   :  { %p76_p13 = scmp.ne.s32.totalorder %s126_s1, %s75_s23  ;;  %p79_p0 = scmp.lt.u32.totalorder %s75_s23, %s126_s1 }
  0x1f   :  { %p81_p1 = pnand %p79_p0, %p76_p13 }
  0x21   :  { %84 = shalt.err (!%p81_p1)
}
  0x22   :  { %33 = dma.vmem_to_hbm [thread:$0]  %s31_s19, 128, %s126_s1, [#allocation4]  }
  0x23   :  { %87 = dma.done.wait [#allocation4], 128  }
  0x24   :  { %88 = vsyncadd [#allocation4], 4294967168 }
  0x25   :  { %37 = vsyncpa [#allocation3], 1 }
  0x26   :  { %38 = vsyncpa [#allocation4], 1 }

// kernel: downblock_forward.1
= control target key start
LH: loop header
LB: loop body
LE: loop exit
PB: predicated region body
PF: predicated region fallthrough
CT: control target
= control target key end

     0   :  { %s7699_s26 = smov 0   ;;  %s7701_s2 = smov 0   ;;  %s10092_s0 = inlined_call_operand.vmem [shape: f32[2,16,16,4], index: 0, kind: input, shape index: {}, may-alias: {0,1,2}]   ;;  %s10093_s1 = inlined_call_operand.vmem [shape: f32[2,16,16,4], index: 1, kind: input, shape index: {}, may-alias: {0,1,2}]   ;;  %s10094_s2 = inlined_call_operand.vmem [shape: f32[2,16,16,4], index: 2, kind: input, shape index: {}, may-alias: {0,1,2}]   ;;  %s10095_s3 = inlined_call_operand.vmem [shape: bf16[3,384,128], index: 3, kind: input, shape index: {}]   ;;  %s10096_s4 = inlined_call_operand.vmem [shape: f32[1,128], index: 4, kind: input, shape index: {}]   ;;  %s10097_s5 = inlined_call_operand.vmem [shape: bf16[3,384,128], index: 5, kind: input, shape index: {}]   ;;  %s10098_s6 = inlined_call_operand.vmem [shape: f32[1,128], index: 6, kind: input, shape index: {}]   ;;  %s10099_s7 = inlined_call_operand.vmem [shape: f32[2,8,8,8], index: 7, kind: output, shape index: {0}]   ;;  %s10100_s8 = inlined_call_operand.vmem [shape: f32[2,16,16,8], index: 8, kind: output, shape index: {1}]  }
   0x1   :  { %s7703_s27 = smov 0  }
   0x2 LB: > { %s31_s28 = sadd.s32 1, %s7647_s2  ;;  %p6576_p0 = scmp.ge.s32.totalorder %s7651_s27, 1  ;;  %s7651_s27 = sphi %s7703_s27, %s19_s27   ;;  %s7647_s2 = sphi %s7701_s2, %s10134_s2   ;;  %s7643_s26 = sphi %s7699_s26, %s10133_s26  }
   0x3   : > { %p33_p1 = scmp.ge.s32.totalorder %s31_s28, 2  ;;  %p357_p2 = scmp.lt.s32.totalorder %s7651_s27, 3 }
   0x5   : > { %s10136_s28 = smov (%p33_p1, %s31_s28), 0  ;;  %p358_p3 = pnand %p6576_p0, %p357_p2 }
   0x7   : > { %361 = sbr.rel (%p358_p3) target bundleno = 1155 (0x483), region = 48 }
   0xe   : > { %v7462_v0 = vld [vmem:[%s10095_s3] sm:$0xff]   ;;  %v7653_v1 = vmov 0   ;;  %v7464_v3 = vld [vmem:[%s10095_s3 + $0x8] sm:$0xff]   ;;  %v7467_v5 = vld [vmem:[%s10095_s3 + $0x90] sm:$0xff]   ;;  %p458_p4 = scmp.lt.s32.totalorder %s7643_s26, 1  ;;  %vm756_vm0 = vcmask 31744  }
   0xf   : > { %1278 = vmatprep.subr.bf16.mxu0 %v7653_v1  ;;  %513 = vst [vmem:[#allocation2] sm:$0xff] %v7653_v1  ;;  %523 = vst [vmem:[#allocation2 + $0x50] sm:$0xff] %v7653_v1  ;;  %v7463_v2 = vld [vmem:[%s10095_s3 + $0x80] sm:$0xff]   ;;  %7117 = vmatprep.mubr.bf16.mxu1 %v7653_v1  ;;  %v7465_v4 = vld [vmem:[%s10095_s3 + $0x88] sm:$0xff]   ;;  %vm872_vm1 = vsmask.f32 7424 }
  0x10   : > { %526 = vst [vmem:[#allocation2 + $0x68] sm:$0xff] %v7653_v1  ;;  %529 = vst [vmem:[#allocation2 + $0x80] sm:$0xff] %v7653_v1  ;;  %1279 = vmatpush1.bf16.msra.mxu0 %v7462_v0  ;;  %1310 = vmatprep.mubr.bf16.mxu0 %v7653_v1  ;;  %v7466_v6 = vld [vmem:[%s10095_s3 + $0x10] sm:$0xff]   ;;  %v7469_v7 = vld [vmem:[%s10095_s3 + $0x98] sm:$0xff]   ;;  %s10138_s26 = smov (!%p458_p4, %s7643_s26), 1  ;;  %vm3611_vm5 = vcmask 1047552  }
  0x11   : > { %532 = vst [vmem:[#allocation2 + $0x98] sm:$0xff] %v7653_v1  ;;  %535 = vst [vmem:[#allocation2 + $0xb0] sm:$0xff] %v7653_v1  ;;  %7101 = vmatprep.subr.bf16.mxu1 %v7463_v2  ;;  %1280 = vmatprep.subr.bf16.mxu0 %v7653_v1  ;;  %v7468_v8 = vld [vmem:[%s10095_s3 + $0x18] sm:$0xff]   ;;  %v7471_v9 = vld [vmem:[%s10095_s3 + $0xa0] sm:$0xff]   ;;  %s6928_s24 = sshll.u32 %s10138_s26, 8  ;;  %vm6226_vm8 = vcmask 64512  }
  0x12   : > { %538 = vst [vmem:[#allocation2 + $0xc8] sm:$0xff] %v7653_v1  ;;  %541 = vst [vmem:[#allocation2 + $0xe0] sm:$0xff] %v7653_v1  ;;  %7102 = vmatpush3.bf16.msra.mxu1 %v7463_v2  ;;  %v7470_v10 = vld [vmem:[%s10095_s3 + $0x20] sm:$0xff]   ;;  %s7783_s10 = scalar_lea.vmem %s10093_s1, %s6928_s24  ;;  %v7473_v11 = vld [vmem:[%s10095_s3 + $0xa8] sm:$0xff]   ;;  %vm757_vm2 = vsmask.f32 7938  ;;  %s9902_s20 = scalar_lea.vmem %s10100_s8, %s6928_s24 }
  0x13   : > { %544 = vst [vmem:[#allocation2 + $0xf8] sm:$0xff] %v7653_v1  ;;  %547 = vst [vmem:[#allocation2 + $0x110] sm:$0xff] %v7653_v1  ;;  %7103 = vmatprep.subr.bf16.mxu1 %v7465_v4  ;;  %v7472_v12 = vld [vmem:[%s10095_s3 + $0x28] sm:$0xff]   ;;  %v579_v13 = vld [vmem:[%s7783_s10] sm:$0xff]  ;;  %s6931_s24 = sshll.u32 %s10138_s26, 6 }
  0x14   : > { %550 = vst [vmem:[#allocation2 + $0x128] sm:$0xff] %v7653_v1  ;;  %553 = vst [vmem:[#allocation2 + $0x140] sm:$0xff] %v7653_v1  ;;  %1281 = vmatpush1.bf16.msra.mxu0 %v7464_v3  ;;  %v580_v14 = vld [vmem:[%s7783_s10 + $0x8] sm:$0xff]  ;;  %v7474_v15 = vld [vmem:[%s10095_s3 + $0x30] sm:$0xff]   ;;  %s9947_s22 = scalar_lea.vmem %s10099_s7, %s6931_s24 }
  0x15   : > { %556 = vst [vmem:[#allocation2 + $0x158] sm:$0xff] %v7653_v1  ;;  %559 = vst [vmem:[#allocation2 + $0x170] sm:$0xff] %v7653_v1  ;;  %1282 = vmatprep.subr.bf16.mxu0 %v7653_v1  ;;  %v611_v16 = vpack.c.bf16 %v580_v14, %v579_v13  ;;  %v7475_v17 = vld [vmem:[%s10095_s3 + $0xb0] sm:$0xff]   ;;  %v582_v19 = vld [vmem:[%s7783_s10 + $0x18] sm:$0xff] }
  0x16   : > { %562 = vst [vmem:[#allocation2 + $0x188] sm:$0xff] %v7653_v1  ;;  %565 = vst [vmem:[#allocation2 + $0x1a0] sm:$0xff] %v7653_v1  ;;  %7104 = vmatpush3.bf16.msra.mxu1 %v7465_v4  ;;  %v581_v18 = vld [vmem:[%s7783_s10 + $0x10] sm:$0xff]  ;;  %v583_v23 = vld [vmem:[%s7783_s10 + $0x20] sm:$0xff] }
  0x17   : > { %568 = vst [vmem:[#allocation2 + $0x1b8] sm:$0xff] %v7653_v1  ;;  %7105 = vmatprep.subr.bf16.mxu1 %v7467_v5  ;;  %v628_v20 = vshrl.u32 %v611_v16, 16  ;;  %v631_v21 = vshll.u32 %v611_v16, 16  ;;  %808 = vst.msk [vmem:[#allocation2 + $0x50] sm:$0xff] %vm756_vm0, %v611_v16  ;;  %v612_v22 = vpack.c.bf16 %v582_v19, %v581_v18  ;;  %v584_v24 = vld [vmem:[%s7783_s10 + $0x28] sm:$0xff]  ;;  %v7477_v25 = vld [vmem:[%s10095_s3 + $0xb8] sm:$0xff]  }
  0x18   : > { %1283 = vmatpush1.bf16.msra.mxu0 %v7466_v6  ;;  %vm7811_vm3 = vmand %vm756_vm0, %vm872_vm1  ;;  %v613_v30 = vpack.c.bf16 %v584_v24, %v583_v23  ;;  %v7476_v31 = vld [vmem:[%s10095_s3 + $0x38] sm:$0xff]   ;;  %v585_v36 = vld [vmem:[%s7783_s10 + $0x30] sm:$0xff] }
  0x19   : > { %1284 = vmatprep.subr.bf16.mxu0 %v7653_v1  ;;  %v824_v26 = vrot.slane %v631_v21, 1  ;;  %v635_v28 = vshrl.u32 %v612_v22, 16  ;;  %v638_v29 = vshll.u32 %v612_v22, 16  ;;  %809 = vst.msk [vmem:[#allocation2 + $0x68] sm:$0xff] %vm756_vm0, %v612_v22  ;;  %v630_v37 = vrot.slane %v628_v20, 7  ;;  %vm7824_vm4 = vmand %vm756_vm0, %vm757_vm2  ;;  %v586_v43 = vld [vmem:[%s7783_s10 + $0x38] sm:$0xff] }
  0x1a   : > { %7106 = vmatpush3.bf16.msra.mxu1 %v7467_v5  ;;  %v642_v34 = vshrl.u32 %v613_v30, 16  ;;  %v645_v35 = vshll.u32 %v613_v30, 16  ;;  %810 = vst.msk [vmem:[#allocation2 + $0x80] sm:$0xff] %vm756_vm0, %v613_v30  ;;  %v614_v44 = vpack.c.bf16 %v586_v43, %v585_v36  ;;  %v587_v45 = vld [vmem:[%s7783_s10 + $0x40] sm:$0xff]  ;;  %v588_v46 = vld [vmem:[%s7783_s10 + $0x48] sm:$0xff]  ;;  %v589_v0 = vld [vmem:[%s7783_s10 + $0x50] sm:$0xff] }
  0x1b   : > { %7107 = vmatprep.subr.bf16.mxu1 %v7469_v7  ;;  %v825_v32 = vor.u32 %v824_v26, %v628_v20  ;;  %v826_v33 = vrot.slane %v638_v29, 1  ;;  %v637_v39 = vrot.slane %v635_v28, 7  ;;  %v633_v47 = vor.u32 %v631_v21, %v630_v37  ;;  %v7478_v50 = vld [vmem:[%s10095_s3 + $0x40] sm:$0xff]   ;;  %v590_v2 = vld [vmem:[%s7783_s10 + $0x58] sm:$0xff]  ;;  %v7479_v4 = vld [vmem:[%s10095_s3 + $0x48] sm:$0xff]  }
  0x1c   : > { %1285 = vmatpush1.bf16.msra.mxu0 %v7468_v8  ;;  %v828_v42 = vrot.slane %v645_v35, 1  ;;  %v644_v49 = vrot.slane %v642_v34, 7  ;;  %v615_v53 = vpack.c.bf16 %v588_v46, %v587_v45  ;;  %v649_v54 = vshrl.u32 %v614_v44, 16  ;;  %811 = vst.msk [vmem:[#allocation2 + $0x98] sm:$0xff] %vm756_vm0, %v614_v44  ;;  %v7483_v59 = vld [vmem:[%s10095_s3 + $0xc0] sm:$0xff]   ;;  %v7480_v13 = vld [vmem:[%s10095_s3 + $0x50] sm:$0xff]   ;;  %vm9117_vm6 = vmand %vm3611_vm5, %vm872_vm1 }
  0x1d   : > { %1286 = vmatprep.subr.bf16.mxu0 %v7653_v1  ;;  %v7830_v40 = vsel %vm7811_vm3, %v825_v32, 0  ;;  %v827_v41 = vor.u32 %v826_v33, %v635_v28  ;;  %v640_v48 = vor.u32 %v638_v29, %v637_v39  ;;  %v652_v55 = vshll.u32 %v614_v44, 16  ;;  %v7485_v14 = vld [vmem:[%s10095_s3 + $0xc8] sm:$0xff]   ;;  %v593_v20 = vld [vmem:[%s7783_s10 + $0x70] sm:$0xff]  ;;  %v594_v28 = vld [vmem:[%s7783_s10 + $0x78] sm:$0xff] }
  0x1e   : > { %7108 = vmatpush3.bf16.msra.mxu1 %v7469_v7  ;;  %876 = vst [vmem:[#allocation2 + $0x58] sm:$0xff] %v7830_v40  ;;  %v829_v52 = vor.u32 %v828_v42, %v642_v34  ;;  %v7848_v56 = vsel %vm7824_vm4, %v633_v47, 0  ;;  %v656_v60 = vshrl.u32 %v615_v53, 16  ;;  %v659_v61 = vshll.u32 %v615_v53, 16  ;;  %812 = vst.msk [vmem:[#allocation2 + $0xb0] sm:$0xff] %vm756_vm0, %v615_v53  ;;  %v595_v29 = vld [vmem:[%s7783_s10 + $0x80] sm:$0xff] }
  0x1f   : > { %7109 = vmatprep.subr.bf16.mxu1 %v7471_v9  ;;  %v7841_v51 = vsel %vm7811_vm3, %v827_v41, 0  ;;  %v7852_v57 = vsel %vm7824_vm4, %v640_v48, 0  ;;  %761 = vst [vmem:[#allocation2 + $0x48] sm:$0xff] %v7848_v56  ;;  %v647_v62 = vor.u32 %v645_v35, %v644_v49  ;;  %v830_v63 = vrot.slane %v652_v55, 1  ;;  %v596_v30 = vld [vmem:[%s7783_s10 + $0x88] sm:$0xff]  ;;  %v7481_v35 = vld [vmem:[%s10095_s3 + $0x58] sm:$0xff]   ;;  %vm9127_vm7 = vmand %vm3611_vm5, %vm757_vm2 }
  0x20   : > { %1287 = vmatpush1.bf16.msra.mxu0 %v7470_v10  ;;  %879 = vst [vmem:[#allocation2 + $0x70] sm:$0xff] %v7841_v51  ;;  %v7856_v58 = vsel %vm7811_vm3, %v829_v52, 0  ;;  %764 = vst [vmem:[#allocation2 + $0x60] sm:$0xff] %v7852_v57  ;;  %v651_v3 = vrot.slane %v649_v54, 7  ;;  %v832_v5 = vrot.slane %v659_v61, 1  ;;  %v7871_v6 = vpack.c.bf16 %v590_v2, %v589_v0  ;;  %v592_v10 = vld [vmem:[%s7783_s10 + $0x68] sm:$0xff] }
  0x21   : > { %1288 = vmatprep.subr.bf16.mxu0 %v7653_v1  ;;  %882 = vst [vmem:[#allocation2 + $0x88] sm:$0xff] %v7856_v58  ;;  %v7875_v7 = vsel %vm7824_vm4, %v647_v62, 0  ;;  %v831_v8 = vor.u32 %v830_v63, %v649_v54  ;;  %v7922_v32 = vpack.c.bf16 %v596_v30, %v595_v29  ;;  %v7487_v36 = vld [vmem:[%s10095_s3 + $0xd0] sm:$0xff]   ;;  %v598_v46 = vld [vmem:[%s7783_s10 + $0x98] sm:$0xff]  ;;  %v600_v52 = vld [vmem:[%s7783_s10 + $0xa8] sm:$0xff] }
  0x22   : > { %7110 = vmatpush3.bf16.msra.mxu1 %v7471_v9  ;;  %v591_v9 = vld [vmem:[%s7783_s10 + $0x60] sm:$0xff]  ;;  %767 = vst [vmem:[#allocation2 + $0x78] sm:$0xff] %v7875_v7  ;;  %v663_v16 = vshrl.u32 %v7871_v6, 16  ;;  %813 = vst.msk [vmem:[#allocation2 + $0xc8] sm:$0xff] %vm756_vm0, %v7871_v6  ;;  %v597_v45 = vld [vmem:[%s7783_s10 + $0x90] sm:$0xff] }
  0x23   : > { %7111 = vmatprep.subr.bf16.mxu1 %v7473_v11  ;;  %v7893_v18 = vpack.c.bf16 %v592_v10, %v591_v9  ;;  %v7898_v19 = vsel %vm7811_vm3, %v831_v8, 0  ;;  %v684_v43 = vshrl.u32 %v7922_v32, 16  ;;  %v687_v44 = vshll.u32 %v7922_v32, 16  ;;  %816 = vst.msk [vmem:[#allocation2 + $0x110] sm:$0xff] %vm756_vm0, %v7922_v32  ;;  %v7489_v54 = vld [vmem:[%s10095_s3 + $0xd8] sm:$0xff]   ;;  %v7484_v32 = vld [vmem:[%s10095_s3 + $0x68] sm:$0xff]  }
  0x24   : > { %1289 = vmatpush1.bf16.msra.mxu0 %v7472_v12  ;;  %v658_v12 = vrot.slane %v656_v60, 7  ;;  %885 = vst [vmem:[#allocation2 + $0xa0] sm:$0xff] %v7898_v19  ;;  %v665_v34 = vrot.slane %v663_v16, 7  ;;  %v7952_v49 = vpack.c.bf16 %v598_v46, %v597_v45  ;;  %v7502_v27 = vld [vmem:[%s10095_s3 + $0x150] sm:$0xff]  }
  0x25   : > { %1290 = vmatprep.subr.bf16.mxu0 %v7653_v1  ;;  %v673_v26 = vshll.u32 %v7893_v18, 16  ;;  %814 = vst.msk [vmem:[#allocation2 + $0xe0] sm:$0xff] %vm756_vm0, %v7893_v18  ;;  %v7513_v38 = vld [vmem:[%s10095_s3 + $0x170] sm:$0xff]  }
  0x26   : > { %7112 = vmatpush3.bf16.msra.mxu1 %v7473_v11  ;;  %v654_v11 = vor.u32 %v652_v55, %v651_v3  ;;  %v661_v22 = vor.u32 %v659_v61, %v658_v12  ;;  %v694_v62 = vshll.u32 %v7952_v49, 16  ;;  %817 = vst.msk [vmem:[#allocation2 + $0x128] sm:$0xff] %vm756_vm0, %v7952_v49 }
  0x27   : > { %7113 = vmatprep.subr.bf16.mxu1 %v7475_v17  ;;  %v836_v39 = vrot.slane %v673_v26, 1 }
  0x28   : > { %1291 = vmatpush1.bf16.msra.mxu0 %v7474_v15  ;;  %v833_v15 = vor.u32 %v832_v5, %v656_v60  ;;  %v7903_v21 = vsel %vm7824_vm4, %v654_v11, 0  ;;  %v7926_v33 = vsel %vm7824_vm4, %v661_v22, 0  ;;  %v842_v5 = vrot.slane %v694_v62, 1 }
  0x29   : > { %1292 = vmatprep.subr.bf16.mxu0 %v7653_v1  ;;  %770 = vst [vmem:[#allocation2 + $0x90] sm:$0xff] %v7903_v21  ;;  %773 = vst [vmem:[#allocation2 + $0xa8] sm:$0xff] %v7926_v33 }
  0x2a   : > { %7114 = vmatpush3.bf16.msra.mxu1 %v7475_v17  ;;  %v666_v17 = vshll.u32 %v7871_v6, 16  ;;  %v7908_v23 = vsel %vm7811_vm3, %v833_v15, 0  ;;  %v601_v6 = vld [vmem:[%s7783_s10 + $0xb0] sm:$0xff]  ;;  %v604_v15 = vld [vmem:[%s7783_s10 + $0xc8] sm:$0xff] }
  0x2b   : > { %7115 = vmatprep.subr.bf16.mxu1 %v7477_v25  ;;  %888 = vst [vmem:[#allocation2 + $0xb8] sm:$0xff] %v7908_v23 }
  0x2c   : > { %1293 = vmatpush1.bf16.msra.mxu0 %v7476_v31  ;;  %v834_v24 = vrot.slane %v666_v17, 1  ;;  %v7920_v31 = vpack.c.bf16 %v594_v28, %v593_v20  ;;  %v668_v53 = vor.u32 %v666_v17, %v665_v34  ;;  %v7491_v17 = vld [vmem:[%s10095_s3 + $0xe0] sm:$0xff]  }
  0x2d   : > { %1294 = vmatprep.subr.bf16.mxu0 %v7653_v1 }
  0x2e   : > { %7116 = vmatpush3.bf16.msra.mxu1 %v7477_v25  ;;  %v670_v25 = vshrl.u32 %v7893_v18, 16  ;;  %v835_v37 = vor.u32 %v834_v24, %v663_v16  ;;  %v677_v41 = vshrl.u32 %v7920_v31, 16  ;;  %v680_v42 = vshll.u32 %v7920_v31, 16  ;;  %815 = vst.msk [vmem:[#allocation2 + $0xf8] sm:$0xff] %vm756_vm0, %v7920_v31 }
  0x2f   : > { %1958 = vmatprep.subr.bf16.mxu1 %v7653_v1  ;;  %v7975_v63 = vsel %vm7824_vm4, %v668_v53, 0  ;;  %v686_v16 = vrot.slane %v684_v43, 7 }
  0x30   : > { %1295 = vmatpush1.bf16.msra.mxu0 %v7478_v50  ;;  %v7950_v47 = vsel %vm7811_vm3, %v835_v37, 0  ;;  %v837_v48 = vor.u32 %v836_v39, %v670_v25  ;;  %v599_v50 = vld [vmem:[%s7783_s10 + $0xa0] sm:$0xff]  ;;  %v838_v55 = vrot.slane %v680_v42, 1  ;;  %776 = vst [vmem:[#allocation2 + $0xc0] sm:$0xff] %v7975_v63  ;;  %v672_v8 = vrot.slane %v670_v25, 7  ;;  %v606_v37 = vld [vmem:[%s7783_s10 + $0xd8] sm:$0xff] }
  0x31   : > { %7118 = vmatmul.mubr.bf16.vlgmr.msra.gmra.mrb[0].mxu1 %v7653_v1  ;;  %1296 = vmatprep.subr.bf16.mxu0 %v7653_v1  ;;  %891 = vst [vmem:[#allocation2 + $0xd0] sm:$0xff] %v7950_v47  ;;  %v7962_v60 = vpack.c.bf16 %v600_v52, %v599_v50  ;;  %v679_v9 = vrot.slane %v677_v41, 7  ;;  %v689_v30 = vor.u32 %v687_v44, %v686_v16 }
  0x32   : > { %7121 = vmatprep.mubr.bf16.mxu1 %v7653_v1  ;;  %1959 = vmatpush1.bf16.msra.mxu1 %v7483_v59  ;;  %v840_v59 = vrot.slane %v687_v44, 1  ;;  %v7967_v61 = vsel %vm7811_vm3, %v837_v48, 0  ;;  %v675_v25 = vor.u32 %v673_v26, %v672_v8  ;;  %v608_v44 = vld [vmem:[%s7783_s10 + $0xe8] sm:$0xff] }
  0x33   : > { %1960 = vmatprep.subr.bf16.mxu1 %v7653_v1  ;;  %894 = vst [vmem:[#allocation2 + $0xe8] sm:$0xff] %v7967_v61  ;;  %v698_v2 = vshrl.u32 %v7962_v60, 16  ;;  %v701_v3 = vshll.u32 %v7962_v60, 16  ;;  %818 = vst.msk [vmem:[#allocation2 + $0x140] sm:$0xff] %vm756_vm0, %v7962_v60  ;;  %v682_v29 = vor.u32 %v680_v42, %v679_v9  ;;  %v7488_v60 = vld [vmem:[%s10095_s3 + $0x78] sm:$0xff]  }
  0x34   : > { %1297 = vmatpush1.bf16.msra.mxu0 %v7479_v4  ;;  %v841_v0 = vor.u32 %v840_v59, %v684_v43  ;;  %v7482_v4 = vld [vmem:[%s10095_s3 + $0x60] sm:$0xff]   ;;  %v8048_v45 = vsel %vm7824_vm4, %v675_v25, 0  ;;  %v7486_v59 = vld [vmem:[%s10095_s3 + $0x70] sm:$0xff]  }
  0x35   : > { %1298 = vmatprep.subr.bf16.mxu0 %v7653_v1  ;;  %v844_v12 = vrot.slane %v701_v3, 1  ;;  %v607_v43 = vld [vmem:[%s7783_s10 + $0xe0] sm:$0xff]  ;;  %779 = vst [vmem:[#allocation2 + $0xd8] sm:$0xff] %v8048_v45  ;;  %v8062_v50 = vsel %vm7824_vm4, %v682_v29, 0 }
  0x36   : > { %1961 = vmatpush1.bf16.msra.mxu1 %v7485_v14  ;;  %v7997_v11 = vsel %vm7811_vm3, %v841_v0, 0  ;;  %v603_v14 = vld [vmem:[%s7783_s10 + $0xc0] sm:$0xff]  ;;  %v8057_v48 = vpack.c.bf16 %v608_v44, %v607_v43  ;;  %782 = vst [vmem:[#allocation2 + $0xf0] sm:$0xff] %v8062_v50 }
  0x37   : > { %1962 = vmatprep.subr.bf16.mxu1 %v7653_v1  ;;  %900 = vst [vmem:[#allocation2 + $0x118] sm:$0xff] %v7997_v11  ;;  %v8011_v24 = vpack.c.bf16 %v604_v15, %v603_v14  ;;  %v845_v28 = vor.u32 %v844_v12, %v698_v2  ;;  %v7493_v12 = vld [vmem:[%s10095_s3 + $0xf0] sm:$0xff]   ;;  %v7495_v43 = vld [vmem:[%s10095_s3 + $0x100] sm:$0xff]  }
  0x38   : > { %1299 = vmatpush1.bf16.msra.mxu0 %v7480_v13  ;;  %v602_v13 = vld [vmem:[%s7783_s10 + $0xb8] sm:$0xff]  ;;  %v729_v0 = vshll.u32 %v8057_v48, 16  ;;  %822 = vst.msk [vmem:[#allocation2 + $0x1a0] sm:$0xff] %vm756_vm0, %v8057_v48 }
  0x39   : > { %7122 = vmatmul.mubr.bf16.gmra.mrb[4].mxu1 %v7830_v40  ;;  %1300 = vmatprep.subr.bf16.mxu0 %v7653_v1  ;;  %v691_v40 = vshrl.u32 %v7952_v49, 16  ;;  %v8009_v22 = vpack.c.bf16 %v602_v13, %v601_v6  ;;  %820 = vst.msk [vmem:[#allocation2 + $0x170] sm:$0xff] %vm756_vm0, %v8011_v24  ;;  %v8039_v39 = vsel %vm7811_vm3, %v845_v28, 0  ;;  %v700_v49 = vrot.slane %v698_v2, 7 }
  0x3a   : > { %7125 = vmatprep.mubr.bf16.mxu1 %v7841_v51  ;;  %1963 = vmatpush1.bf16.msra.mxu1 %v7487_v36  ;;  %v839_v51 = vor.u32 %v838_v55, %v677_v41  ;;  %v605_v36 = vld [vmem:[%s7783_s10 + $0xd0] sm:$0xff]  ;;  %v715_v41 = vshll.u32 %v8011_v24, 16  ;;  %906 = vst [vmem:[#allocation2 + $0x148] sm:$0xff] %v8039_v39  ;;  %v852_v2 = vrot.slane %v729_v0, 1 }
  0x3b   : > { %1964 = vmatprep.subr.bf16.mxu1 %v7653_v1  ;;  %v843_v20 = vor.u32 %v842_v5, %v691_v40  ;;  %v693_v31 = vrot.slane %v691_v40, 7  ;;  %v705_v26 = vshrl.u32 %v8009_v22, 16  ;;  %v708_v34 = vshll.u32 %v8009_v22, 16  ;;  %819 = vst.msk [vmem:[#allocation2 + $0x158] sm:$0xff] %vm756_vm0, %v8009_v22  ;;  %v610_v5 = vld [vmem:[%s7783_s10 + $0xf8] sm:$0xff] }
  0x3c   : > { %1301 = vmatpush1.bf16.msra.mxu0 %v7481_v35  ;;  %v7993_v10 = vsel %vm7811_vm3, %v839_v51, 0  ;;  %v712_v35 = vshrl.u32 %v8011_v24, 16  ;;  %v8042_v42 = vpack.c.bf16 %v606_v37, %v605_v36  ;;  %v848_v52 = vrot.slane %v715_v41, 1  ;;  %v7496_v24 = vld [vmem:[%s10095_s3 + $0x148] sm:$0xff]  }
  0x3d   : > { %1302 = vmatprep.subr.bf16.mxu0 %v7653_v1  ;;  %897 = vst [vmem:[#allocation2 + $0x100] sm:$0xff] %v7993_v10  ;;  %v8023_v18 = vsel %vm7811_vm3, %v843_v20, 0  ;;  %v846_v46 = vrot.slane %v708_v34, 1  ;;  %v696_v55 = vor.u32 %v694_v62, %v693_v31  ;;  %v726_v51 = vshrl.u32 %v8057_v48, 16  ;;  %v7499_v48 = vld [vmem:[%s10095_s3 + $0x118] sm:$0xff]  }
  0x3e   : > { %1965 = vmatpush1.bf16.msra.mxu1 %v7489_v54  ;;  %903 = vst [vmem:[#allocation2 + $0x130] sm:$0xff] %v8023_v18  ;;  %v719_v53 = vshrl.u32 %v8042_v42, 16  ;;  %v722_v54 = vshll.u32 %v8042_v42, 16  ;;  %821 = vst.msk [vmem:[#allocation2 + $0x188] sm:$0xff] %vm756_vm0, %v8042_v42  ;;  %v849_v62 = vor.u32 %v848_v52, %v712_v35  ;;  %v703_v14 = vor.u32 %v701_v3, %v700_v49  ;;  %v7505_v52 = vld [vmem:[%s10095_s3 + $0x158] sm:$0xff]  }
  0x3f   : > { %1966 = vmatprep.subr.bf16.mxu1 %v7653_v1  ;;  %v847_v40 = vor.u32 %v846_v46, %v705_v26  ;;  %v8097_v9 = vsel %vm7824_vm4, %v696_v55, 0  ;;  %v853_v3 = vor.u32 %v852_v2, %v726_v51  ;;  %v707_v28 = vrot.slane %v705_v26, 7  ;;  %v7497_v46 = vld [vmem:[%s10095_s3 + $0x108] sm:$0xff]   ;;  %v7504_v49 = vld [vmem:[%s10095_s3 + $0x138] sm:$0xff]   ;;  %v8321_v2 = vld [vmem:[#allocation2 + $0xe0] sm:$0xff] }
  0x40   : > { %1303 = vmatpush1.bf16.msra.mxu0 %v7482_v4  ;;  %v609_v4 = vld [vmem:[%s7783_s10 + $0xf0] sm:$0xff]  ;;  %v850_v6 = vrot.slane %v722_v54, 1  ;;  %788 = vst [vmem:[#allocation2 + $0x120] sm:$0xff] %v8097_v9  ;;  %v8115_v15 = vsel %vm7811_vm3, %v849_v62, 0  ;;  %v8129_v25 = vsel %vm7824_vm4, %v703_v14, 0  ;;  %v714_v29 = vrot.slane %v712_v35, 7 }
  0x41   : > { %7126 = vmatmul.mubr.bf16.gmra.mrb[8].mxu1 %v7856_v58  ;;  %1304 = vmatprep.subr.bf16.mxu0 %v7653_v1  ;;  %v7492_v58 = vld [vmem:[%s10095_s3 + $0xe8] sm:$0xff]   ;;  %v8093_v8 = vpack.c.bf16 %v610_v5, %v609_v4  ;;  %v8104_v13 = vsel %vm7811_vm3, %v847_v40, 0  ;;  %912 = vst [vmem:[#allocation2 + $0x178] sm:$0xff] %v8115_v15  ;;  %791 = vst [vmem:[#allocation2 + $0x138] sm:$0xff] %v8129_v25  ;;  %v8152_v26 = vsel %vm7811_vm3, %v853_v3, 0  ;;  %v721_v37 = vrot.slane %v719_v53, 7 }
  0x42   : > { %7129 = vmatprep.mubr.bf16.mxu1 %v7898_v19  ;;  %1967 = vmatpush1.bf16.msra.mxu1 %v7491_v17  ;;  %v8066_v19 = vsel %vm7824_vm4, %v689_v30, 0  ;;  %909 = vst [vmem:[#allocation2 + $0x160] sm:$0xff] %v8104_v13  ;;  %v851_v16 = vor.u32 %v850_v6, %v719_v53  ;;  %v7490_v30 = vld [vmem:[%s10095_s3 + $0x140] sm:$0xff]   ;;  %v710_v35 = vor.u32 %v708_v34, %v707_v28  ;;  %918 = vst [vmem:[#allocation2 + $0x1a8] sm:$0xff] %v8152_v26  ;;  %v8258_v4 = vld [vmem:[#allocation2 + $0x68] sm:$0xff] }
  0x43   : > { %1968 = vmatprep.subr.bf16.mxu1 %v7653_v1  ;;  %785 = vst [vmem:[#allocation2 + $0x108] sm:$0xff] %v8066_v19  ;;  %v733_v17 = vshrl.u32 %v8093_v8, 16  ;;  %v736_v20 = vshll.u32 %v8093_v8, 16  ;;  %823 = vst.msk [vmem:[#allocation2 + $0x1b8] sm:$0xff] %vm756_vm0, %v8093_v8  ;;  %v717_v36 = vor.u32 %v715_v41, %v714_v29  ;;  %v724_v34 = vor.u32 %v722_v54, %v721_v37  ;;  %v7507_v54 = vld [vmem:[%s10095_s3 + $0x160] sm:$0xff]   ;;  %v7516_v5 = vld [vmem:[%s10095_s3 + $0x178] sm:$0xff]  }
  0x44   : > { %1305 = vmatpush1.bf16.msra.mxu0 %v7484_v32  ;;  %v8140_v31 = vsel %vm7811_vm3, %v851_v16, 0  ;;  %v8164_v42 = vsel %vm7824_vm4, %v710_v35, 0  ;;  %v8275_v62 = vld [vmem:[#allocation2 + $0x80] sm:$0xff]  ;;  %v8289_v6 = vld [vmem:[#allocation2 + $0x98] sm:$0xff]  ;;  %v7607_v14 = vld [vmem:[#allocation2 + $0x48] sm:$0xff] }
  0x45   : > { %1306 = vmatprep.subr.bf16.mxu0 %v7653_v1  ;;  %v854_v32 = vrot.slane %v736_v20, 1  ;;  %915 = vst [vmem:[#allocation2 + $0x190] sm:$0xff] %v8140_v31  ;;  %v8168_v22 = vsel %vm7824_vm4, %v717_v36, 0  ;;  %794 = vst [vmem:[#allocation2 + $0x150] sm:$0xff] %v8164_v42  ;;  %v8185_v44 = vsel %vm7824_vm4, %v724_v34, 0  ;;  %v735_v55 = vrot.slane %v733_v17, 7 }
  0x46   : > { %1969 = vmatpush1.bf16.msra.mxu1 %v7492_v58  ;;  %797 = vst [vmem:[#allocation2 + $0x168] sm:$0xff] %v8168_v22  ;;  %800 = vst [vmem:[#allocation2 + $0x180] sm:$0xff] %v8185_v44  ;;  %v728_v58 = vrot.slane %v726_v51, 7  ;;  %v7500_v51 = vld [vmem:[%s10095_s3 + $0x120] sm:$0xff]   ;;  %v7514_v16 = vld [vmem:[%s10095_s3 + $0x1a8] sm:$0xff]  }
  0x47   : > { %1970 = vmatprep.subr.bf16.mxu1 %v7653_v1  ;;  %v738_v40 = vor.u32 %v736_v20, %v735_v55  ;;  %v7506_v8 = vld [vmem:[%s10095_s3 + $0x180] sm:$0xff]   ;;  %v7515_v20 = vld [vmem:[%s10095_s3 + $0x1b0] sm:$0xff]   ;;  %v7517_v3 = vld [vmem:[%s10095_s3 + $0x1b8] sm:$0xff]  }
  0x48   : > { %1307 = vmatpush1.bf16.msra.mxu0 %v7486_v59  ;;  %v8228_v59 = vld [vmem:[#allocation2 + $0x50] sm:$0xff]  ;;  %v7518_v29 = vld [vmem:[%s10095_s3 + $0x1c0] sm:$0xff]   ;;  %v7524_v37 = vld [vmem:[%s10095_s3 + $0x1d8] sm:$0xff]  }
  0x49   : > { %7130 = vmatmul.mubr.bf16.gmra.mrb[12].mxu1 %v7908_v23  ;;  %1308 = vmatprep.subr.bf16.mxu0 %v7653_v1  ;;  %v7494_v23 = vld [vmem:[%s10095_s3 + $0xf8] sm:$0xff]   ;;  %v8351_v28 = vld [vmem:[#allocation2 + $0x110] sm:$0xff]  ;;  %v7526_v34 = vld [vmem:[%s10095_s3 + $0x1e0] sm:$0xff]  }
  0x4a   : > { %7133 = vmatprep.mubr.bf16.mxu1 %v7950_v47  ;;  %1971 = vmatpush1.bf16.msra.mxu1 %v7493_v12  ;;  %v855_v47 = vor.u32 %v854_v32, %v733_v17  ;;  %v8307_v12 = vld [vmem:[#allocation2 + $0xc8] sm:$0xff]  ;;  %v8334_v17 = vld [vmem:[#allocation2 + $0xf8] sm:$0xff]  ;;  %v7522_v35 = vld [vmem:[%s10095_s3 + $0x1d0] sm:$0xff]  }
  0x4b   : > { %1972 = vmatprep.subr.bf16.mxu1 %v7653_v1  ;;  %v7520_v32 = vld [vmem:[%s10095_s3 + $0x1c8] sm:$0xff]   ;;  %v8375_v36 = vld [vmem:[#allocation2 + $0x90] sm:$0xff] }
  0x4c   : > { %1309 = vmatpush1.bf16.msra.mxu0 %v7488_v60  ;;  %v8175_v41 = vsel %vm7811_vm3, %v855_v47, 0  ;;  %v8343_v60 = vld [vmem:[#allocation2 + $0x60] sm:$0xff]  ;;  %v7531_v55 = vld [vmem:[%s10095_s3 + $0x228] sm:$0xff]  }
  0x4d   : > { %7157 = vmatprep.subr.bf16.mxu0 %v7490_v30  ;;  %921 = vst [vmem:[#allocation2 + $0x1c0] sm:$0xff] %v8175_v41  ;;  %v8383_v47 = vld [vmem:[#allocation2 + $0x140] sm:$0xff] }
  0x4e   : > { %1973 = vmatpush1.bf16.msra.mxu1 %v7494_v23  ;;  %v8367_v23 = vld [vmem:[#allocation2 + $0x128] sm:$0xff] }
  0x4f   : > { %1311 = vmatmul.mubr.bf16.vlgmr.msra.gmra.mrb[0].mxu0 %v7653_v1  ;;  %1974 = vmatprep.subr.bf16.mxu1 %v7653_v1 }
  0x50   : > { %7158 = vmatpush3.bf16.msra.mxu0 %v7490_v30  ;;  %1318 = vmatprep.mubr.bf16.mxu0 %v7653_v1  ;;  %v8359_v30 = vld [vmem:[#allocation2 + $0x78] sm:$0xff] }
  0x51   : > { %7134 = vmatmul.mubr.bf16.gmra.mrb[16].mxu1 %v7967_v61  ;;  %7159 = vmatprep.subr.bf16.mxu0 %v7496_v24  ;;  %v731_v61 = vor.u32 %v729_v0, %v728_v58  ;;  %v7501_v0 = vld [vmem:[%s10095_s3 + $0x128] sm:$0xff]   ;;  %v7529_v58 = vld [vmem:[%s10095_s3 + $0x1f0] sm:$0xff]  }
  0x52   : > { %7137 = vmatprep.mubr.bf16.mxu1 %v7993_v10  ;;  %1975 = vmatpush1.bf16.msra.mxu1 %v7495_v43  ;;  %v7498_v10 = vld [vmem:[%s10095_s3 + $0x110] sm:$0xff]   ;;  %v7527_v43 = vld [vmem:[%s10095_s3 + $0x1e8] sm:$0xff]  }
  0x53   : > { %1976 = vmatprep.subr.bf16.mxu1 %v7653_v1  ;;  %v8209_v53 = vsel %vm7824_vm4, %v731_v61, 0  ;;  %v8413_v61 = vld [vmem:[#allocation2 + $0x170] sm:$0xff] }
  0x54   : > { %7160 = vmatpush3.bf16.msra.mxu0 %v7496_v24  ;;  %803 = vst [vmem:[#allocation2 + $0x198] sm:$0xff] %v8209_v53  ;;  %v8391_v24 = vld [vmem:[#allocation2 + $0xa8] sm:$0xff] }
  0x55   : > { %7161 = vmatprep.subr.bf16.mxu0 %v7502_v27 }
  0x56   : > { %1977 = vmatpush1.bf16.msra.mxu1 %v7497_v46  ;;  %v7530_v46 = vld [vmem:[%s10095_s3 + $0x1f8] sm:$0xff]  }
  0x57   : > { %1319 = vmatmul.mubr.bf16.gmra.mrb[4].mxu0 %v7653_v1  ;;  %1978 = vmatprep.subr.bf16.mxu1 %v7653_v1 }
  0x58   : > { %1326 = vmatprep.mubr.bf16.mxu0 %v7653_v1  ;;  %7162 = vmatpush3.bf16.msra.mxu0 %v7502_v27  ;;  %v8230_v1 = vld [vmem:[#allocation2] sm:$0xff]  ;;  %v8399_v27 = vld [vmem:[#allocation2 + $0x158] sm:$0xff] }
  0x59   : > { %7138 = vmatmul.mubr.bf16.gmra.mrb[20].mxu1 %v7997_v11  ;;  %7163 = vmatprep.subr.bf16.mxu0 %v7505_v52  ;;  %v7510_v11 = vld [vmem:[%s10095_s3 + $0x168] sm:$0xff]  }
  0x5a   : > { %7141 = vmatprep.mubr.bf16.mxu1 %v8023_v18  ;;  %1979 = vmatpush1.bf16.msra.mxu1 %v7498_v10  ;;  %v8244_v18 = vsel %vm7824_vm4, %v738_v40, %v8230_v1  ;;  %v7525_v10 = vld [vmem:[%s10095_s3 + $0x218] sm:$0xff]   ;;  %v8488_v40 = vld [vmem:[#allocation2 + $0xe8] sm:$0xff] }
  0x5b   : > { %1980 = vmatprep.subr.bf16.mxu1 %v8230_v1  ;;  %806 = vst [vmem:[#allocation2 + $0x1b0] sm:$0xff] %v8244_v18 }
  0x5c   : > { %7164 = vmatpush3.bf16.msra.mxu0 %v7505_v52  ;;  %v8425_v52 = vld [vmem:[#allocation2 + $0x1a0] sm:$0xff] }
  0x5d   : > { %7165 = vmatprep.subr.bf16.mxu0 %v7507_v54 }
  0x5e   : > { %1981 = vmatpush1.bf16.msra.mxu1 %v7499_v48  ;;  %v8472_v48 = vld [vmem:[#allocation2 + $0xa0] sm:$0xff] }
  0x5f   : > { %1327 = vmatmul.mubr.bf16.gmra.mrb[8].mxu0 %v8230_v1  ;;  %1982 = vmatprep.subr.bf16.mxu1 %v8230_v1 }
  0x60   : > { %1334 = vmatprep.mubr.bf16.mxu0 %v8228_v59  ;;  %7166 = vmatpush3.bf16.msra.mxu0 %v7507_v54  ;;  %v8474_v54 = vld [vmem:[#allocation2 + $0xb8] sm:$0xff] }
  0x61   : > { %7142 = vmatmul.mubr.bf16.gmra.mrb[24].mxu1 %v8039_v39  ;;  %7167 = vmatprep.subr.bf16.mxu0 %v7510_v11  ;;  %v7503_v39 = vld [vmem:[%s10095_s3 + $0x130] sm:$0xff]  }
  0x62   : > { %7145 = vmatprep.mubr.bf16.mxu1 %v8104_v13  ;;  %1983 = vmatpush1.bf16.msra.mxu1 %v7500_v51  ;;  %v7509_v13 = vld [vmem:[%s10095_s3 + $0x190] sm:$0xff]  }
  0x63   : > { %1984 = vmatprep.subr.bf16.mxu1 %v8230_v1 }
  0x64   : > { %7168 = vmatpush3.bf16.msra.mxu0 %v7510_v11 }
  0x65   : > { %7169 = vmatprep.subr.bf16.mxu0 %v7513_v38 }
  0x66   : > { %1985 = vmatpush1.bf16.msra.mxu1 %v7501_v0  ;;  %v7533_v0 = vld [vmem:[%s10095_s3 + $0x238] sm:$0xff]  }
  0x67   : > { %1335 = vmatmul.mubr.bf16.gmra.mrb[12].mxu0 %v7848_v56  ;;  %1986 = vmatprep.subr.bf16.mxu1 %v8230_v1  ;;  %v8283_v56 = vld [vmem:[%s10095_s3 + $0x200] sm:$0xff]  }
  0x68   : > { %1342 = vmatprep.mubr.bf16.mxu0 %v8258_v4  ;;  %7170 = vmatpush3.bf16.msra.mxu0 %v7513_v38 }
  0x69   : > { %7146 = vmatmul.mubr.bf16.gmra.mrb[28].mxu1 %v8115_v15  ;;  %7171 = vmatprep.subr.bf16.mxu0 %v7516_v5 }
  0x6a   : > { %7149 = vmatprep.mubr.bf16.mxu1 %v8140_v31  ;;  %1987 = vmatpush1.bf16.msra.mxu1 %v7503_v39 }
  0x6b   : > { %1988 = vmatprep.subr.bf16.mxu1 %v8230_v1 }
  0x6c   : > { %7172 = vmatpush3.bf16.msra.mxu0 %v7516_v5  ;;  %v8497_v5 = vld [vmem:[#allocation2 + $0x100] sm:$0xff] }
  0x6d   : > { %7213 = vmatprep.subr.bf16.mxu0 %v8283_v56 }
  0x6e   : > { %1989 = vmatpush1.bf16.msra.mxu1 %v7504_v49  ;;  %v8501_v49 = vld [vmem:[#allocation2 + $0x118] sm:$0xff] }
  0x6f   : > { %1343 = vmatmul.mubr.bf16.gmra.mrb[16].mxu0 %v7852_v57  ;;  %2718 = vmatprep.subr.bf16.mxu1 %v8230_v1  ;;  %v8295_v57 = vld [vmem:[#allocation2 + $0xb0] sm:$0xff] }
  0x70   : > { %1350 = vmatprep.mubr.bf16.mxu0 %v8275_v62 }
  0x71   : > { %7150 = vmatmul.mubr.bf16.gmra.mrb[32].mxu1 %v8152_v26 }
  0x72   : > { %7153 = vmatprep.mubr.bf16.mxu1 %v8175_v41 }
  0x77   : > { %1351 = vmatmul.mubr.bf16.gmra.mrb[20].mxu0 %v7875_v7  ;;  %v7508_v7 = vld [vmem:[%s10095_s3 + $0x188] sm:$0xff]  }
  0x78   : > { %1358 = vmatprep.mubr.bf16.mxu0 %v8289_v6 }
  0x79   : > { %7154 = vmatmul.mubr.bf16.gmra.mrb[36].mxu1 %v8230_v1 }
  0x7a   : > { %1990 = vmatprep.mubr.bf16.mxu1 %v8230_v1 }
  0x7f   : > { %1359 = vmatmul.mubr.bf16.gmra.mrb[24].mxu0 %v7903_v21  ;;  %v7511_v21 = vld [vmem:[%s10095_s3 + $0x198] sm:$0xff]  }
  0x80   : > { %1366 = vmatprep.mubr.bf16.mxu0 %v8295_v57 }
  0x81   : > { %1991 = vmatmul.mubr.bf16.vlgmr.msra.gmra.mrb[40].mxu1 %v8230_v1 }
  0x82   : > { %1998 = vmatprep.mubr.bf16.mxu1 %v8230_v1  ;;  %2719 = vmatpush1.bf16.msra.mxu1 %v7506_v8 }
  0x83   : > { %2720 = vmatprep.subr.bf16.mxu1 %v8230_v1 }
  0x86   : > { %2721 = vmatpush1.bf16.msra.mxu1 %v7508_v7 }
  0x87   : > { %1367 = vmatmul.mubr.bf16.gmra.mrb[28].mxu0 %v7926_v33  ;;  %2722 = vmatprep.subr.bf16.mxu1 %v8230_v1  ;;  %v7512_v33 = vld [vmem:[%s10095_s3 + $0x1a0] sm:$0xff]  }
  0x88   : > { %1374 = vmatprep.mubr.bf16.mxu0 %v8307_v12 }
  0x89   : > { %1999 = vmatmul.mubr.bf16.gmra.mrb[44].mxu1 %v8230_v1 }
  0x8a   : > { %2006 = vmatprep.mubr.bf16.mxu1 %v8228_v59  ;;  %2723 = vmatpush1.bf16.msra.mxu1 %v7509_v13  ;;  %v8486_v59 = vld [vmem:[#allocation2 + $0xd0] sm:$0xff] }
  0x8b   : > { %2724 = vmatprep.subr.bf16.mxu1 %v8230_v1 }
  0x8e   : > { %2725 = vmatpush1.bf16.msra.mxu1 %v7511_v21 }
  0x8f   : > { %1375 = vmatmul.mubr.bf16.gmra.mrb[32].mxu0 %v7975_v63  ;;  %2726 = vmatprep.subr.bf16.mxu1 %v8230_v1 }
  0x90   : > { %1382 = vmatprep.mubr.bf16.mxu0 %v8321_v2 }
  0x91   : > { %2007 = vmatmul.mubr.bf16.gmra.mrb[48].mxu1 %v7607_v14 }
  0x92   : > { %2014 = vmatprep.mubr.bf16.mxu1 %v8258_v4  ;;  %2727 = vmatpush1.bf16.msra.mxu1 %v7512_v33  ;;  %v7612_v33 = vld [vmem:[#allocation2 + $0x130] sm:$0xff] }
  0x93   : > { %2728 = vmatprep.subr.bf16.mxu1 %v8230_v1 }
  0x96   : > { %2729 = vmatpush1.bf16.msra.mxu1 %v7514_v16  ;;  %v7613_v16 = vld [vmem:[#allocation2 + $0x148] sm:$0xff] }
  0x97   : > { %1383 = vmatmul.mubr.bf16.gmra.mrb[36].mxu0 %v8048_v45  ;;  %2730 = vmatprep.subr.bf16.mxu1 %v8230_v1 }
  0x98   : > { %1390 = vmatprep.mubr.bf16.mxu0 %v8334_v17 }
  0x99   : > { %2015 = vmatmul.mubr.bf16.gmra.mrb[52].mxu1 %v8343_v60 }
  0x9a   : > { %2022 = vmatprep.mubr.bf16.mxu1 %v8275_v62  ;;  %2731 = vmatpush1.bf16.msra.mxu1 %v7515_v20 }
  0x9b   : > { %2732 = vmatprep.subr.bf16.mxu1 %v8230_v1 }
  0x9e   : > { %2733 = vmatpush1.bf16.msra.mxu1 %v7517_v3 }
  0x9f   : > { %1391 = vmatmul.mubr.bf16.gmra.mrb[40].mxu0 %v8062_v50  ;;  %2734 = vmatprep.subr.bf16.mxu1 %v8230_v1 }
  0xa0   : > { %1398 = vmatprep.mubr.bf16.mxu0 %v8351_v28 }
  0xa1   : > { %2023 = vmatmul.mubr.bf16.gmra.mrb[56].mxu1 %v8359_v30 }
  0xa2   : > { %2030 = vmatprep.mubr.bf16.mxu1 %v8289_v6  ;;  %2735 = vmatpush1.bf16.msra.mxu1 %v7518_v29 }
  0xa3   : > { %2736 = vmatprep.subr.bf16.mxu1 %v8230_v1 }
  0xa6   : > { %2737 = vmatpush1.bf16.msra.mxu1 %v7520_v32  ;;  %v7614_v32 = vld [vmem:[#allocation2 + $0x160] sm:$0xff] }
  0xa7   : > { %1399 = vmatmul.mubr.bf16.gmra.mrb[44].mxu0 %v8066_v19  ;;  %2738 = vmatprep.subr.bf16.mxu1 %v8230_v1 }
  0xa8   : > { %1406 = vmatprep.mubr.bf16.mxu0 %v8367_v23 }
  0xa9   : > { %2031 = vmatmul.mubr.bf16.gmra.mrb[60].mxu1 %v8375_v36 }
  0xaa   : > { %2038 = vmatprep.mubr.bf16.mxu1 %v8295_v57  ;;  %2739 = vmatpush1.bf16.msra.mxu1 %v7522_v35  ;;  %v2469_v35 = vld [vmem:[#allocation2 + $0x50] sm:$0xff] }
  0xab   : > { %2740 = vmatprep.subr.bf16.mxu1 %v8230_v1 }
  0xae   : > { %2741 = vmatpush1.bf16.msra.mxu1 %v7524_v37 }
  0xaf   : > { %1407 = vmatmul.mubr.bf16.gmra.mrb[48].mxu0 %v8097_v9  ;;  %2742 = vmatprep.subr.bf16.mxu1 %v8230_v1 }
  0xb0   : > { %1414 = vmatprep.mubr.bf16.mxu0 %v8383_v47 }
  0xb1   : > { %2039 = vmatmul.mubr.bf16.gmra.mrb[64].mxu1 %v8391_v24 }
  0xb2   : > { %2046 = vmatprep.mubr.bf16.mxu1 %v8307_v12  ;;  %2743 = vmatpush1.bf16.msra.mxu1 %v7526_v34 }
  0xb3   : > { %2744 = vmatprep.subr.bf16.mxu1 %v8230_v1 }
  0xb6   : > { %2745 = vmatpush1.bf16.msra.mxu1 %v7527_v43 }
  0xb7   : > { %1415 = vmatmul.mubr.bf16.gmra.mrb[52].mxu0 %v8129_v25  ;;  %2746 = vmatprep.subr.bf16.mxu1 %v8230_v1 }
  0xb8   : > { %1422 = vmatprep.mubr.bf16.mxu0 %v8399_v27 }
  0xb9   : > { %2047 = vmatmul.mubr.bf16.gmra.mrb[68].mxu1 %v7975_v63  ;;  %v8419_v63 = vld [vmem:[#allocation2 + $0x188] sm:$0xff] }
  0xba   : > { %2054 = vmatprep.mubr.bf16.mxu1 %v8321_v2  ;;  %2747 = vmatpush1.bf16.msra.mxu1 %v7529_v58 }
  0xbb   : > { %2748 = vmatprep.subr.bf16.mxu1 %v8230_v1 }
  0xbe   : > { %2749 = vmatpush1.bf16.msra.mxu1 %v7530_v46 }
  0xbf   : > { %1423 = vmatmul.mubr.bf16.gmra.mrb[56].mxu0 %v8164_v42 }
  0xc0   : > { %1430 = vmatprep.mubr.bf16.mxu0 %v8413_v61 }
  0xc1   : > { %2055 = vmatmul.mubr.bf16.gmra.mrb[72].mxu1 %v8048_v45  ;;  %v8431_v45 = vld [vmem:[#allocation2 + $0x1b8] sm:$0xff] }
  0xc2   : > { %2062 = vmatprep.mubr.bf16.mxu1 %v8334_v17 }
  0xc7   : > { %1431 = vmatmul.mubr.bf16.gmra.mrb[60].mxu0 %v8168_v22 }
  0xc8   : > { %1438 = vmatprep.mubr.bf16.mxu0 %v8419_v63 }
  0xc9   : > { %2063 = vmatmul.mubr.bf16.gmra.mrb[76].mxu1 %v8062_v50  ;;  %v8445_v50 = vld [vmem:[#allocation2 + $0x58] sm:$0xff] }
  0xca   : > { %2070 = vmatprep.mubr.bf16.mxu1 %v8351_v28 }
  0xcf   : > { %1439 = vmatmul.mubr.bf16.gmra.mrb[64].mxu0 %v8185_v44 }
  0xd0   : > { %1446 = vmatprep.mubr.bf16.mxu0 %v8425_v52 }
  0xd1   : > { %2071 = vmatmul.mubr.bf16.gmra.mrb[80].mxu1 %v8066_v19  ;;  %v7521_v19 = vld [vmem:[%s10095_s3 + $0x208] sm:$0xff]  }
  0xd2   : > { %2078 = vmatprep.mubr.bf16.mxu1 %v8367_v23 }
  0xd7   : > { %1447 = vmatmul.mubr.bf16.gmra.mrb[68].mxu0 %v8209_v53 }
  0xd8   : > { %1454 = vmatprep.mubr.bf16.mxu0 %v8431_v45 }
  0xd9   : > { %2079 = vmatmul.mubr.bf16.gmra.mrb[84].mxu1 %v8097_v9  ;;  %v7523_v9 = vld [vmem:[%s10095_s3 + $0x210] sm:$0xff]  }
  0xda   : > { %2086 = vmatprep.mubr.bf16.mxu1 %v8383_v47 }
  0xdf   : > { %1455 = vmatmul.mubr.bf16.gmra.mrb[72].mxu0 %v8244_v18 }
  0xe0   : > { %1462 = vmatprep.mubr.bf16.mxu0 %v8230_v1 }
  0xe1   : > { %2087 = vmatmul.mubr.bf16.gmra.mrb[88].mxu1 %v8129_v25  ;;  %v8458_v25 = vld [vmem:[#allocation2 + $0x70] sm:$0xff] }
  0xe2   : > { %2094 = vmatprep.mubr.bf16.mxu1 %v8399_v27 }
  0xe7   : > { %1463 = vmatmul.mubr.bf16.gmra.mrb[76].mxu0 %v8230_v1 }
  0xe8   : > { %7173 = vmatprep.mubr.bf16.mxu0 %v8230_v1 }
  0xe9   : > { %2095 = vmatmul.mubr.bf16.gmra.mrb[92].mxu1 %v8164_v42  ;;  %v8460_v42 = vld [vmem:[#allocation2 + $0x88] sm:$0xff] }
  0xea   : > { %2102 = vmatprep.mubr.bf16.mxu1 %v8413_v61 }
  0xef   : > { %7174 = vmatmul.mubr.bf16.vlgmr.msra.gmra.mrb[80].mxu0 %v8230_v1 }
  0xf0   : > { %7214 = vmatpush3.bf16.msra.mxu0 %v8283_v56  ;;  %7177 = vmatprep.mubr.bf16.mxu0 %v8445_v50 }
  0xf1   : > { %2103 = vmatmul.mubr.bf16.gmra.mrb[96].mxu1 %v8168_v22  ;;  %7215 = vmatprep.subr.bf16.mxu0 %v7521_v19  ;;  %v7528_v22 = vld [vmem:[%s10095_s3 + $0x220] sm:$0xff]  }
  0xf2   : > { %2110 = vmatprep.mubr.bf16.mxu1 %v8419_v63 }
  0xf4   : > { %7216 = vmatpush3.bf16.msra.mxu0 %v7521_v19 }
  0xf5   : > { %7217 = vmatprep.subr.bf16.mxu0 %v7523_v9 }
  0xf7   : > { %7178 = vmatmul.mubr.bf16.gmra.mrb[84].mxu0 %v8458_v25 }
  0xf8   : > { %7181 = vmatprep.mubr.bf16.mxu0 %v8460_v42  ;;  %7218 = vmatpush3.bf16.msra.mxu0 %v7523_v9 }
  0xf9   : > { %2111 = vmatmul.mubr.bf16.gmra.mrb[100].mxu1 %v8185_v44  ;;  %7219 = vmatprep.subr.bf16.mxu0 %v7525_v10  ;;  %v7532_v44 = vld [vmem:[%s10095_s3 + $0x230] sm:$0xff]  }
  0xfa   : > { %2118 = vmatprep.mubr.bf16.mxu1 %v8425_v52 }
  0xfc   : > { %7220 = vmatpush3.bf16.msra.mxu0 %v7525_v10  ;;  %v2468_v10 = vld [vmem:[#allocation2 + $0x48] sm:$0xff] }
  0xfd   : > { %7221 = vmatprep.subr.bf16.mxu0 %v7528_v22 }
  0xff   : > { %7182 = vmatmul.mubr.bf16.gmra.mrb[88].mxu0 %v8472_v48 }
 0x100   : > { %7185 = vmatprep.mubr.bf16.mxu0 %v8474_v54  ;;  %7222 = vmatpush3.bf16.msra.mxu0 %v7528_v22 }
 0x101   : > { %2119 = vmatmul.mubr.bf16.gmra.mrb[104].mxu1 %v8209_v53  ;;  %7223 = vmatprep.subr.bf16.mxu0 %v7531_v55 }
 0x102   : > { %2126 = vmatprep.mubr.bf16.mxu1 %v8431_v45 }
 0x104   : > { %v7119_v11 = vpop.f32.mrb[0].mxu1  ;;  %7224 = vmatpush3.bf16.msra.mxu0 %v7531_v55 }
 0x105   : > { %v1505_v51 = vpop.f32.mrb[1].mxu1  ;;  %7225 = vmatprep.subr.bf16.mxu0 %v7532_v44 }
 0x106   : > { %v7120_v53 = vpop.f32.mrb[2].mxu1 }
 0x107   : > { %7186 = vmatmul.mubr.bf16.gmra.mrb[92].mxu0 %v8486_v59  ;;  %v1508_v38 = vpop.f32.mrb[3].mxu1 }
 0x108   : > { %7189 = vmatprep.mubr.bf16.mxu0 %v8488_v40  ;;  %7226 = vmatpush3.bf16.msra.mxu0 %v7532_v44 }
 0x109   : > { %2127 = vmatmul.mubr.bf16.gmra.mrb[108].mxu1 %v8244_v18  ;;  %7227 = vmatprep.subr.bf16.mxu0 %v7533_v0 }
 0x10a   : > { %2134 = vmatprep.mubr.bf16.mxu1 %v8230_v1 }
 0x10c   : > { %v8499_v39 = vpop.f32.mrb[4].mxu1  ;;  %7228 = vmatpush3.bf16.msra.mxu0 %v7533_v0 }
 0x10d   : > { %v1521_v56 = vpop.f32.mrb[5].mxu1  ;;  %4082 = vmatprep.subr.bf16.mxu0 %v8230_v1 }
 0x10e   : > { %v8504_v8 = vpop.f32.mrb[6].mxu1 }
 0x10f   : > { %7190 = vmatmul.mubr.bf16.gmra.mrb[96].mxu0 %v8497_v5  ;;  %v1524_v7 = vpop.f32.mrb[7].mxu1 }
 0x110   : > { %7193 = vmatprep.mubr.bf16.mxu0 %v8501_v49 }
 0x111   : > { %2135 = vmatmul.mubr.bf16.gmra.mrb[112].mxu1 %v8230_v1 }
 0x112   : > { %2142 = vmatprep.mubr.bf16.mxu1 %v8230_v1 }
 0x114   : > { %v8510_v18 = vpop.f32.mrb[8].mxu1 }
 0x115   : > { %v8512_v13 = vpop.f32.mrb[9].mxu1 }
 0x116   : > { %v8514_v21 = vpop.f32.mrb[10].mxu1 }
 0x117   : > { %7194 = vmatmul.mubr.bf16.gmra.mrb[100].mxu0 %v7612_v33  ;;  %v8516_v14 = vpop.f32.mrb[11].mxu1 }
 0x118   : > { %7197 = vmatprep.mubr.bf16.mxu0 %v7613_v16 }
 0x119   : > { %2143 = vmatmul.mubr.bf16.gmra.mrb[116].mxu1 %v8230_v1 }
 0x11a   : > { %2750 = vmatprep.mubr.bf16.mxu1 %v8230_v1 }
 0x11c   : > { %v8520_v20 = vpop.f32.mrb[12].mxu1 }
 0x11d   : > { %v8522_v3 = vpop.f32.mrb[13].mxu1 }
 0x11e   : > { %v8524_v29 = vpop.f32.mrb[14].mxu1 }
 0x11f   : > { %7198 = vmatmul.mubr.bf16.gmra.mrb[104].mxu0 %v7614_v32  ;;  %v8526_v37 = vpop.f32.mrb[15].mxu1 }
 0x120   : > { %7201 = vmatprep.mubr.bf16.mxu0 %v8115_v15 }
 0x121   : > { %2751 = vmatmul.mubr.bf16.vlgmr.msra.gmra.mrb[120].mxu1 %v8230_v1 }
 0x122   : > { %v1312_v34 = vpop.f32.mrb[0].mxu0  ;;  %2758 = vmatprep.mubr.bf16.mxu1 %v2469_v35 }
 0x123   : > { %v1314_v43 = vpop.f32.mrb[1].mxu0 }
 0x124   : > { %v1315_v58 = vpop.f32.mrb[2].mxu0  ;;  %v8530_v46 = vpop.f32.mrb[16].mxu1 }
 0x125   : > { %v1317_v19 = vpop.f32.mrb[3].mxu0  ;;  %v8532_v9 = vpop.f32.mrb[17].mxu1 }
 0x126   : > { %v8534_v22 = vpop.f32.mrb[18].mxu1 }
 0x127   : > { %7202 = vmatmul.mubr.bf16.gmra.mrb[108].mxu0 %v8140_v31  ;;  %v8537_v55 = vpop.f32.mrb[19].mxu1 }
 0x128   : > { %7205 = vmatprep.mubr.bf16.mxu0 %v8152_v26 }
 0x129   : > { %2759 = vmatmul.mubr.bf16.gmra.mrb[124].mxu1 %v2468_v10 }
 0x12a   : > { %v1320_v15 = vpop.f32.mrb[4].mxu0  ;;  %2766 = vmatprep.mubr.bf16.mxu1 %v8258_v4 }
 0x12b   : > { %v1322_v44 = vpop.f32.mrb[5].mxu0 }
 0x12c   : > { %v1323_v11 = vpop.f32.mrb[6].mxu0  ;;  %v8541_v51 = vpop.f32.mrb[20].mxu1 }
 0x12d   : > { %v1325_v0 = vpop.f32.mrb[7].mxu0  ;;  %v8543_v53 = vpop.f32.mrb[21].mxu1 }
 0x12e   : > { %v8545_v38 = vpop.f32.mrb[22].mxu1 }
 0x12f   : > { %7206 = vmatmul.mubr.bf16.gmra.mrb[112].mxu0 %v8175_v41  ;;  %v8548_v31 = vpop.f32.mrb[23].mxu1 }
 0x130   : > { %7209 = vmatprep.mubr.bf16.mxu0 %v8230_v1 }
 0x131   : > { %2767 = vmatmul.mubr.bf16.gmra.mrb[128].mxu1 %v8343_v60 }
 0x132   : > { %v1328_v26 = vpop.f32.mrb[8].mxu0  ;;  %2774 = vmatprep.mubr.bf16.mxu1 %v8275_v62 }
 0x133   : > { %v8553_v4 = vadd.f32 %v1521_v56, %v1328_v26  ;;  %v1330_v33 = vpop.f32.mrb[9].mxu0 }
 0x134   : > { %v1331_v16 = vpop.f32.mrb[10].mxu0  ;;  %v8555_v32 = vpop.f32.mrb[24].mxu1 }
 0x135   : > { %v8557_v35 = vadd.f32 %v1524_v7, %v1331_v16  ;;  %v1333_v34 = vpop.f32.mrb[11].mxu0  ;;  %v8559_v43 = vpop.f32.mrb[25].mxu1 }
 0x136   : > { %v8561_v41 = vpop.f32.mrb[26].mxu1 }
 0x137   : > { %7210 = vmatmul.mubr.bf16.gmra.mrb[116].mxu0 %v8230_v1  ;;  %v8564_v58 = vpop.f32.mrb[27].mxu1 }
 0x138   : > { %7229 = vmatprep.mubr.bf16.mxu0 %v8230_v1 }
 0x139   : > { %2775 = vmatmul.mubr.bf16.gmra.mrb[132].mxu1 %v8359_v30 }
 0x13a   : > { %v1336_v62 = vpop.f32.mrb[12].mxu0  ;;  %2782 = vmatprep.mubr.bf16.mxu1 %v8289_v6 }
 0x13b   : > { %v8570_v60 = vadd.f32 %v8499_v39, %v1336_v62  ;;  %v1338_v56 = vpop.f32.mrb[13].mxu0 }
 0x13c   : > { %v1339_v7 = vpop.f32.mrb[14].mxu0  ;;  %v8572_v19 = vpop.f32.mrb[28].mxu1 }
 0x13d   : > { %v8575_v10 = vadd.f32 %v8504_v8, %v1339_v7  ;;  %v1341_v15 = vpop.f32.mrb[15].mxu0  ;;  %v8577_v44 = vpop.f32.mrb[29].mxu1 }
 0x13e   : > { %v8579_v11 = vpop.f32.mrb[30].mxu1 }
 0x13f   : > { %7230 = vmatmul.mubr.bf16.vlgmr.msra.gmra.mrb[120].mxu0 %v8445_v50  ;;  %v8582_v30 = vpop.f32.mrb[31].mxu1 }
 0x140   : > { %7233 = vmatprep.mubr.bf16.mxu0 %v8458_v25 }
 0x141   : > { %2783 = vmatmul.mubr.bf16.gmra.mrb[136].mxu1 %v8375_v36 }
 0x142   : > { %v1344_v6 = vpop.f32.mrb[16].mxu0  ;;  %2790 = vmatprep.mubr.bf16.mxu1 %v8295_v57 }
 0x143   : > { %v8588_v39 = vadd.f32 %v8512_v13, %v1344_v6  ;;  %v1346_v8 = vpop.f32.mrb[17].mxu0 }
 0x144   : > { %v1347_v0 = vpop.f32.mrb[18].mxu0  ;;  %v8590_v26 = vpop.f32.mrb[32].mxu1 }
 0x145   : > { %v8593_v33 = vadd.f32 %v8516_v14, %v1347_v0  ;;  %v1349_v50 = vpop.f32.mrb[19].mxu0  ;;  %v8595_v16 = vpop.f32.mrb[33].mxu1  ;;  %v7535_v0 = vld [vmem:[%s10097_s5] sm:$0xff]  }
 0x146   : > { %v8597_v34 = vpop.f32.mrb[34].mxu1  ;;  %4083 = vmatpush1.bf16.msra.mxu0 %v7535_v0  ;;  %v7539_v0 = vld [vmem:[%s10097_s5 + $0x18] sm:$0xff]  }
 0x147   : > { %7234 = vmatmul.mubr.bf16.gmra.mrb[124].mxu0 %v8460_v42  ;;  %v8600_v36 = vpop.f32.mrb[35].mxu1  ;;  %4084 = vmatprep.subr.bf16.mxu0 %v8230_v1 }
 0x148   : > { %7237 = vmatprep.mubr.bf16.mxu0 %v8472_v48 }
 0x149   : > { %2791 = vmatmul.mubr.bf16.gmra.mrb[140].mxu1 %v8391_v24 }
 0x14a   : > { %v1352_v57 = vpop.f32.mrb[20].mxu0  ;;  %2798 = vmatprep.mubr.bf16.mxu1 %v8307_v12  ;;  %v7615_v12 = vld [vmem:[#allocation2 + $0xc0] sm:$0xff] }
 0x14b   : > { %v8606_v25 = vadd.f32 %v8510_v18, %v1352_v57  ;;  %v1354_v13 = vpop.f32.mrb[21].mxu0 }
 0x14c   : > { %v1355_v14 = vpop.f32.mrb[22].mxu0  ;;  %v8608_v62 = vpop.f32.mrb[36].mxu1  ;;  %v7616_v13 = vld [vmem:[#allocation2 + $0xd8] sm:$0xff] }
 0x14d   : > { %v8611_v56 = vadd.f32 %v8514_v21, %v1355_v14  ;;  %v1357_v42 = vpop.f32.mrb[23].mxu0  ;;  %v8613_v7 = vpop.f32.mrb[37].mxu1 }
 0x14e   : > { %v8615_v15 = vpop.f32.mrb[38].mxu1 }
 0x14f   : > { %7238 = vmatmul.mubr.bf16.gmra.mrb[128].mxu0 %v8474_v54  ;;  %v8618_v24 = vpop.f32.mrb[39].mxu1 }
 0x150   : > { %7241 = vmatprep.mubr.bf16.mxu0 %v8486_v59 }
 0x151   : > { %2799 = vmatmul.mubr.bf16.gmra.mrb[144].mxu1 %v7615_v12  ;;  %v7537_v12 = vld [vmem:[%s10097_s5 + $0x10] sm:$0xff]  }
 0x152   : > { %v1360_v48 = vpop.f32.mrb[24].mxu0  ;;  %2806 = vmatprep.mubr.bf16.mxu1 %v8321_v2 }
 0x153   : > { %v8623_v18 = vadd.f32 %v8522_v3, %v1360_v48  ;;  %v1362_v21 = vpop.f32.mrb[25].mxu0  ;;  %v7536_v3 = vld [vmem:[%s10097_s5 + $0x8] sm:$0xff]  }
 0x154   : > { %v1363_v6 = vpop.f32.mrb[26].mxu0  ;;  %v1992_v8 = vpop.f32.mrb[40].mxu1  ;;  %4085 = vmatpush1.bf16.msra.mxu0 %v7536_v3 }
 0x155   : > { %v8629_v54 = vadd.f32 %v8526_v37, %v1363_v6  ;;  %v1365_v50 = vpop.f32.mrb[27].mxu0  ;;  %v1994_v59 = vpop.f32.mrb[41].mxu1 }
 0x156   : > { %v1995_v57 = vpop.f32.mrb[42].mxu1  ;;  %v7618_v50 = vld [vmem:[#allocation2 + $0xf0] sm:$0xff] }
 0x157   : > { %7242 = vmatmul.mubr.bf16.gmra.mrb[132].mxu0 %v8488_v40  ;;  %v1997_v2 = vpop.f32.mrb[43].mxu1  ;;  %v8641_v40 = vld [vmem:[#allocation2] sm:$0xff] }
 0x158   : > { %7245 = vmatprep.mubr.bf16.mxu0 %v8497_v5  ;;  %4086 = vmatprep.subr.bf16.mxu0 %v8641_v40  ;;  %v2500_v2 = vld [vmem:[#allocation2 + $0x148] sm:$0xff] }
 0x159   : > { %2807 = vmatmul.mubr.bf16.gmra.mrb[148].mxu1 %v7616_v13  ;;  %4087 = vmatpush1.bf16.msra.mxu0 %v7537_v12  ;;  %v7540_v13 = vld [vmem:[%s10097_s5 + $0x20] sm:$0xff]  }
 0x15a   : > { %v1368_v14 = vpop.f32.mrb[28].mxu0  ;;  %2814 = vmatprep.mubr.bf16.mxu1 %v8334_v17  ;;  %v2497_v17 = vld [vmem:[#allocation2 + $0x130] sm:$0xff]  ;;  %4088 = vmatprep.subr.bf16.mxu0 %v8641_v40  ;;  %v7534_v12 = vld [vmem:[%s10097_s5 + $0x80] sm:$0xff]  }
 0x15b   : > { %v8639_v37 = vadd.f32 %v8520_v20, %v1368_v14  ;;  %v1370_v42 = vpop.f32.mrb[29].mxu0  ;;  %7269 = vmatprep.subr.bf16.mxu1 %v7534_v12 }
 0x15c   : > { %v1371_v1 = vpop.f32.mrb[30].mxu0  ;;  %v2000_v5 = vpop.f32.mrb[44].mxu1  ;;  %7270 = vmatpush3.bf16.msra.mxu1 %v7534_v12 }
 0x15d   : > { %v8648_v48 = vadd.f32 %v8524_v29, %v1371_v1  ;;  %v1373_v21 = vpop.f32.mrb[31].mxu0  ;;  %v2002_v6 = vpop.f32.mrb[45].mxu1  ;;  %4089 = vmatpush1.bf16.msra.mxu0 %v7539_v0  ;;  %v2503_v1 = vld [vmem:[#allocation2 + $0x160] sm:$0xff]  ;;  %v2506_v0 = vld [vmem:[#allocation2 + $0x178] sm:$0xff] }
 0x15e   : > { %v2003_v8 = vpop.f32.mrb[46].mxu1  ;;  %4090 = vmatprep.subr.bf16.mxu0 %v8641_v40  ;;  %v7619_v21 = vld [vmem:[#allocation2 + $0x108] sm:$0xff] }
 0x15f   : > { %7246 = vmatmul.mubr.bf16.gmra.mrb[136].mxu0 %v8501_v49  ;;  %v2005_v20 = vpop.f32.mrb[47].mxu1 }
 0x160   : > { %7249 = vmatprep.mubr.bf16.mxu0 %v2497_v17 }
 0x161   : > { %2815 = vmatmul.mubr.bf16.gmra.mrb[152].mxu1 %v7618_v50  ;;  %4091 = vmatpush1.bf16.msra.mxu0 %v7540_v13 }
 0x162   : > { %v1376_v59 = vpop.f32.mrb[32].mxu0  ;;  %2822 = vmatprep.mubr.bf16.mxu1 %v8351_v28  ;;  %4092 = vmatprep.subr.bf16.mxu0 %v8641_v40 }
 0x163   : > { %v8657_v29 = vadd.f32 %v8532_v9, %v1376_v59  ;;  %v1378_v57 = vpop.f32.mrb[33].mxu0  ;;  %v7542_v59 = vld [vmem:[%s10097_s5 + $0x30] sm:$0xff]  }
 0x164   : > { %v1379_v49 = vpop.f32.mrb[34].mxu0  ;;  %v8660_v3 = vpop.f32.mrb[48].mxu1 }
 0x165   : > { %v8666_v14 = vadd.f32 %v8537_v55, %v1379_v49  ;;  %v1381_v42 = vpop.f32.mrb[35].mxu0  ;;  %v2010_v28 = vpop.f32.mrb[49].mxu1  ;;  %v7541_v55 = vld [vmem:[%s10097_s5 + $0x28] sm:$0xff]  }
 0x166   : > { %v8668_v5 = vpop.f32.mrb[50].mxu1  ;;  %4093 = vmatpush1.bf16.msra.mxu0 %v7541_v55  ;;  %v7544_v42 = vld [vmem:[%s10097_s5 + $0x38] sm:$0xff]   ;;  %v7620_v28 = vld [vmem:[#allocation2 + $0x120] sm:$0xff] }
 0x167   : > { %7250 = vmatmul.mubr.bf16.gmra.mrb[140].mxu0 %v2500_v2  ;;  %v2013_v9 = vpop.f32.mrb[51].mxu1  ;;  %4094 = vmatprep.subr.bf16.mxu0 %v8641_v40  ;;  %v2509_v2 = vld [vmem:[#allocation2 + $0x190] sm:$0xff] }
 0x168   : > { %7253 = vmatprep.mubr.bf16.mxu0 %v2503_v1 }
 0x169   : > { %2823 = vmatmul.mubr.bf16.gmra.mrb[156].mxu1 %v7619_v21  ;;  %v2512_v21 = vld [vmem:[#allocation2 + $0x1a8] sm:$0xff] }
 0x16a   : > { %v1384_v17 = vpop.f32.mrb[36].mxu0  ;;  %2830 = vmatprep.mubr.bf16.mxu1 %v8367_v23  ;;  %4095 = vmatpush1.bf16.msra.mxu0 %v7542_v59  ;;  %v2515_v59 = vld [vmem:[#allocation2 + $0x1c0] sm:$0xff] }
 0x16b   : > { %v8679_v6 = vadd.f32 %v8530_v46, %v1384_v17  ;;  %v1386_v8 = vpop.f32.mrb[37].mxu0  ;;  %4096 = vmatprep.subr.bf16.mxu0 %v8641_v40  ;;  %v7545_v17 = vld [vmem:[%s10097_s5 + $0x40] sm:$0xff]  }
 0x16c   : > { %v1387_v20 = vpop.f32.mrb[38].mxu0  ;;  %v8681_v50 = vpop.f32.mrb[52].mxu1 }
 0x16d   : > { %v8688_v57 = vadd.f32 %v8534_v22, %v1387_v20  ;;  %v1389_v23 = vpop.f32.mrb[39].mxu0  ;;  %v2018_v49 = vpop.f32.mrb[53].mxu1 }
 0x16e   : > { %v8690_v46 = vpop.f32.mrb[54].mxu1  ;;  %4097 = vmatpush1.bf16.msra.mxu0 %v7544_v42  ;;  %v7538_v23 = vld [vmem:[%s10097_s5 + $0x88] sm:$0xff]   ;;  %v7621_v49 = vld [vmem:[#allocation2 + $0x138] sm:$0xff] }
 0x16f   : > { %7254 = vmatmul.mubr.bf16.gmra.mrb[144].mxu0 %v2506_v0  ;;  %v2021_v13 = vpop.f32.mrb[55].mxu1  ;;  %4098 = vmatprep.subr.bf16.mxu0 %v8641_v40 }
 0x170   : > { %7257 = vmatprep.mubr.bf16.mxu0 %v2509_v2  ;;  %7271 = vmatprep.subr.bf16.mxu1 %v7538_v23 }
 0x171   : > { %2831 = vmatmul.mubr.bf16.gmra.mrb[160].mxu1 %v7620_v28  ;;  %v7543_v28 = vld [vmem:[%s10097_s5 + $0x90] sm:$0xff]  }
 0x172   : > { %v1392_v1 = vpop.f32.mrb[40].mxu0  ;;  %2838 = vmatprep.mubr.bf16.mxu1 %v8383_v47  ;;  %4099 = vmatpush1.bf16.msra.mxu0 %v7545_v17 }
 0x173   : > { %v8698_v22 = vadd.f32 %v8543_v53, %v1392_v1  ;;  %v1394_v9 = vpop.f32.mrb[41].mxu0  ;;  %7272 = vmatpush3.bf16.msra.mxu1 %v7538_v23  ;;  %4100 = vmatprep.subr.bf16.mxu0 %v8641_v40 }
 0x174   : > { %v1395_v12 = vpop.f32.mrb[42].mxu0  ;;  %v8700_v55 = vpop.f32.mrb[56].mxu1  ;;  %7273 = vmatprep.subr.bf16.mxu1 %v7543_v28 }
 0x175   : > { %v8706_v8 = vadd.f32 %v8548_v31, %v1395_v12  ;;  %v1397_v20 = vpop.f32.mrb[43].mxu0  ;;  %v2026_v0 = vpop.f32.mrb[57].mxu1  ;;  %v7546_v31 = vld [vmem:[%s10097_s5 + $0x48] sm:$0xff]   ;;  %v7547_v12 = vld [vmem:[%s10097_s5 + $0x50] sm:$0xff]  }
 0x176   : > { %v8709_v47 = vpop.f32.mrb[58].mxu1  ;;  %4101 = vmatpush1.bf16.msra.mxu0 %v7546_v31  ;;  %v7548_v0 = vld [vmem:[%s10097_s5 + $0x98] sm:$0xff]  }
 0x177   : > { %v2029_v53 = vpop.f32.mrb[59].mxu1  ;;  %7258 = vmatmul.mubr.bf16.gmra.mrb[148].mxu0 %v2512_v21  ;;  %4102 = vmatprep.subr.bf16.mxu0 %v8641_v40 }
 0x178   : > { %7261 = vmatprep.mubr.bf16.mxu0 %v2515_v59  ;;  %7274 = vmatpush3.bf16.msra.mxu1 %v7543_v28  ;;  %v7622_v59 = vld [vmem:[#allocation2 + $0x150] sm:$0xff]  ;;  %v7550_v28 = vld [vmem:[%s10097_s5 + $0x60] sm:$0xff]  }
 0x179   : > { %2839 = vmatmul.mubr.bf16.gmra.mrb[164].mxu1 %v7621_v49  ;;  %7275 = vmatprep.subr.bf16.mxu1 %v7548_v0  ;;  %v7553_v49 = vld [vmem:[%s10097_s5 + $0xa0] sm:$0xff]  }
 0x17a   : > { %v1400_v2 = vpop.f32.mrb[44].mxu0  ;;  %2846 = vmatprep.mubr.bf16.mxu1 %v8399_v27  ;;  %4103 = vmatpush1.bf16.msra.mxu0 %v7547_v12 }
 0x17b   : > { %v8719_v13 = vadd.f32 %v8541_v51, %v1400_v2  ;;  %v1402_v42 = vpop.f32.mrb[45].mxu0  ;;  %4104 = vmatprep.subr.bf16.mxu0 %v8641_v40 }
 0x17c   : > { %v1403_v1 = vpop.f32.mrb[46].mxu0  ;;  %v8725_v9 = vpop.f32.mrb[60].mxu1  ;;  %7276 = vmatpush3.bf16.msra.mxu1 %v7548_v0 }
 0x17d   : > { %v8731_v27 = vadd.f32 %v8545_v38, %v1403_v1  ;;  %v1405_v51 = vpop.f32.mrb[47].mxu0  ;;  %v2034_v21 = vpop.f32.mrb[61].mxu1  ;;  %v7549_v38 = vld [vmem:[%s10097_s5 + $0x58] sm:$0xff]   ;;  %7277 = vmatprep.subr.bf16.mxu1 %v7553_v49 }
 0x17e   : > { %v8734_v17 = vpop.f32.mrb[62].mxu1  ;;  %4105 = vmatpush1.bf16.msra.mxu0 %v7549_v38  ;;  %v7555_v21 = vld [vmem:[%s10097_s5 + $0xa8] sm:$0xff]  }
 0x17f   : > { %v2037_v20 = vpop.f32.mrb[63].mxu1  ;;  %7262 = vmatmul.mubr.bf16.gmra.mrb[152].mxu0 %v8641_v40  ;;  %4106 = vmatprep.subr.bf16.mxu0 %v8641_v40 }
 0x180   : > { %7265 = vmatprep.mubr.bf16.mxu0 %v8641_v40  ;;  %7278 = vmatpush3.bf16.msra.mxu1 %v7553_v49  ;;  %v7623_v20 = vld [vmem:[#allocation2 + $0x168] sm:$0xff] }
 0x181   : > { %2847 = vmatmul.mubr.bf16.gmra.mrb[168].mxu1 %v7622_v59  ;;  %7279 = vmatprep.subr.bf16.mxu1 %v7555_v21 }
 0x182   : > { %v1408_v53 = vpop.f32.mrb[48].mxu0  ;;  %2854 = vmatprep.mubr.bf16.mxu1 %v8413_v61  ;;  %4107 = vmatpush1.bf16.msra.mxu0 %v7550_v28 }
 0x183   : > { %v8747_v23 = vadd.f32 %v8559_v43, %v1408_v53  ;;  %v1410_v31 = vpop.f32.mrb[49].mxu0  ;;  %4108 = vmatprep.subr.bf16.mxu0 %v8641_v40  ;;  %v7556_v53 = vld [vmem:[%s10097_s5 + $0xb0] sm:$0xff]  }
 0x184   : > { %v1411_v2 = vpop.f32.mrb[50].mxu0  ;;  %v8752_v42 = vpop.f32.mrb[64].mxu1  ;;  %7280 = vmatpush3.bf16.msra.mxu1 %v7555_v21  ;;  %v7554_v21 = vld [vmem:[%s10097_s5 + $0x78] sm:$0xff]  }
 0x185   : > { %v8758_v61 = vadd.f32 %v8564_v58, %v1411_v2  ;;  %v1413_v1 = vpop.f32.mrb[51].mxu0  ;;  %v2042_v43 = vpop.f32.mrb[65].mxu1  ;;  %v7551_v58 = vld [vmem:[%s10097_s5 + $0x68] sm:$0xff]   ;;  %v7552_v2 = vld [vmem:[%s10097_s5 + $0x70] sm:$0xff]   ;;  %7281 = vmatprep.subr.bf16.mxu1 %v7556_v53 }
 0x186   : > { %v8761_v12 = vpop.f32.mrb[66].mxu1  ;;  %4109 = vmatpush1.bf16.msra.mxu0 %v7551_v58 }
 0x187   : > { %v2045_v51 = vpop.f32.mrb[67].mxu1  ;;  %7266 = vmatmul.mubr.bf16.gmra.mrb[156].mxu0 %v8641_v40  ;;  %4110 = vmatprep.subr.bf16.mxu0 %v8641_v40 }
 0x188   : > { %4114 = vmatprep.mubr.bf16.mxu0 %v8641_v40  ;;  %7282 = vmatpush3.bf16.msra.mxu1 %v7556_v53  ;;  %v7558_v51 = vld [vmem:[%s10097_s5 + $0xb8] sm:$0xff]  }
 0x189   : > { %2855 = vmatmul.mubr.bf16.gmra.mrb[172].mxu1 %v7623_v20  ;;  %7283 = vmatprep.subr.bf16.mxu1 %v7558_v51 }
 0x18a   : > { %v1416_v0 = vpop.f32.mrb[52].mxu0  ;;  %2862 = vmatprep.mubr.bf16.mxu1 %v8419_v63  ;;  %4111 = vmatpush1.bf16.msra.mxu0 %v7552_v2 }
 0x18b   : > { %v8774_v38 = vadd.f32 %v8555_v32, %v1416_v0  ;;  %v1418_v59 = vpop.f32.mrb[53].mxu0  ;;  %4112 = vmatprep.subr.bf16.mxu0 %v8641_v40 }
 0x18c   : > { %v1419_v31 = vpop.f32.mrb[54].mxu0  ;;  %v8779_v49 = vpop.f32.mrb[68].mxu1  ;;  %7284 = vmatpush3.bf16.msra.mxu1 %v7558_v51 }
 0x18d   : > { %v8785_v63 = vadd.f32 %v8561_v41, %v1419_v31  ;;  %v1421_v28 = vpop.f32.mrb[55].mxu0  ;;  %v2050_v32 = vpop.f32.mrb[69].mxu1  ;;  %v7624_v41 = vld [vmem:[#allocation2 + $0x180] sm:$0xff]  ;;  %4761 = vmatprep.subr.bf16.mxu1 %v8641_v40 }
 0x18e   : > { %v8788_v1 = vpop.f32.mrb[70].mxu1  ;;  %4113 = vmatpush1.bf16.msra.mxu0 %v7554_v21 }
 0x18f   : > { %v2053_v43 = vpop.f32.mrb[71].mxu1 }
 0x191   : > { %2863 = vmatmul.mubr.bf16.gmra.mrb[176].mxu1 %v7624_v41  ;;  %4115 = vmatmul.mubr.bf16.vlgmr.msra.gmra.mrb[160].mxu0 %v8641_v40 }
 0x192   : > { %v1424_v58 = vpop.f32.mrb[56].mxu0  ;;  %2870 = vmatprep.mubr.bf16.mxu1 %v8425_v52  ;;  %4122 = vmatprep.mubr.bf16.mxu0 %v8641_v40 }
 0x193   : > { %v8799_v20 = vadd.f32 %v8577_v44, %v1424_v58  ;;  %v1426_v0 = vpop.f32.mrb[57].mxu0  ;;  %v7625_v44 = vld [vmem:[#allocation2 + $0x198] sm:$0xff] }
 0x194   : > { %v1427_v59 = vpop.f32.mrb[58].mxu0  ;;  %v8801_v53 = vpop.f32.mrb[72].mxu1 }
 0x195   : > { %10105 = vst [vmem:[#allocation4_spill] sm:$0xff] %v8799_v20  ;;  %v8805_v31 = vadd.f32 %v8582_v30, %v1427_v59  ;;  %v1429_v2 = vpop.f32.mrb[59].mxu0  ;;  %v2058_v28 = vpop.f32.mrb[73].mxu1 }
 0x196   : > { %v8807_v32 = vpop.f32.mrb[74].mxu1 }
 0x197   : > { %10106 = vst [vmem:[#allocation5_spill] sm:$0xff] %v8805_v31  ;;  %v2061_v52 = vpop.f32.mrb[75].mxu1 }
 0x199   : > { %2871 = vmatmul.mubr.bf16.gmra.mrb[180].mxu1 %v7625_v44  ;;  %4123 = vmatmul.mubr.bf16.gmra.mrb[164].mxu0 %v8641_v40 }
 0x19a   : > { %v1432_v43 = vpop.f32.mrb[60].mxu0  ;;  %2878 = vmatprep.mubr.bf16.mxu1 %v8431_v45  ;;  %4130 = vmatprep.mubr.bf16.mxu0 %v8641_v40  ;;  %v7626_v45 = vld [vmem:[#allocation2 + $0x1b0] sm:$0xff] }
 0x19b   : > { %v8813_v51 = vadd.f32 %v8572_v19, %v1432_v43  ;;  %v1434_v21 = vpop.f32.mrb[61].mxu0 }
 0x19c   : > { %v1435_v30 = vpop.f32.mrb[62].mxu0  ;;  %v8815_v41 = vpop.f32.mrb[76].mxu1 }
 0x19d   : > { %v8818_v58 = vadd.f32 %v8579_v11, %v1435_v30  ;;  %v1437_v0 = vpop.f32.mrb[63].mxu0  ;;  %v2066_v59 = vpop.f32.mrb[77].mxu1 }
 0x19e   : > { %v8820_v2 = vpop.f32.mrb[78].mxu1 }
 0x19f   : > { %10107 = vst [vmem:[#allocation6_spill] sm:$0xff] %v8818_v58  ;;  %v2069_v28 = vpop.f32.mrb[79].mxu1 }
 0x1a1   : > { %2879 = vmatmul.mubr.bf16.gmra.mrb[184].mxu1 %v7626_v45  ;;  %4131 = vmatmul.mubr.bf16.gmra.mrb[168].mxu0 %v8641_v40 }
 0x1a2   : > { %v1440_v19 = vpop.f32.mrb[64].mxu0  ;;  %2886 = vmatprep.mubr.bf16.mxu1 %v8641_v40 }
 0x1a3   : > { %v8826_v52 = vadd.f32 %v8595_v16, %v1440_v19  ;;  %v1442_v44 = vpop.f32.mrb[65].mxu0 }
 0x1a4   : > { %v1443_v11 = vpop.f32.mrb[66].mxu0  ;;  %v8828_v43 = vpop.f32.mrb[80].mxu1 }
 0x1a5   : > { %10108 = vst [vmem:[#allocation7_spill] sm:$0xff] %v8826_v52  ;;  %v8831_v21 = vadd.f32 %v8600_v36, %v1443_v11  ;;  %v1445_v30 = vpop.f32.mrb[67].mxu0  ;;  %v2074_v0 = vpop.f32.mrb[81].mxu1 }
 0x1a6   : > { %v8833_v59 = vpop.f32.mrb[82].mxu1 }
 0x1a7   : > { %10109 = vst [vmem:[#allocation8_spill] sm:$0xff] %v8831_v21  ;;  %v2077_v28 = vpop.f32.mrb[83].mxu1 }
 0x1a9   : > { %2887 = vmatmul.mubr.bf16.gmra.mrb[188].mxu1 %v8641_v40 }
 0x1aa   : > { %v1448_v45 = vpop.f32.mrb[68].mxu0  ;;  %2894 = vmatprep.mubr.bf16.mxu1 %v8641_v40 }
 0x1ab   : > { %v8839_v16 = vadd.f32 %v8590_v26, %v1448_v45  ;;  %v1450_v19 = vpop.f32.mrb[69].mxu0 }
 0x1ac   : > { %v1451_v44 = vpop.f32.mrb[70].mxu0  ;;  %v8841_v52 = vpop.f32.mrb[84].mxu1 }
 0x1ad   : > { %10110 = vst [vmem:[#allocation9_spill] sm:$0xff] %v8839_v16  ;;  %v8844_v36 = vadd.f32 %v8597_v34, %v1451_v44  ;;  %v1453_v11 = vpop.f32.mrb[71].mxu0  ;;  %v2082_v30 = vpop.f32.mrb[85].mxu1 }
 0x1ae   : > { %v8846_v0 = vpop.f32.mrb[86].mxu1 }
 0x1af   : > { %10111 = vst [vmem:[#allocation10_spill] sm:$0xff] %v8844_v36  ;;  %v2085_v28 = vpop.f32.mrb[87].mxu1 }
 0x1b1   : > { %2895 = vmatmul.mubr.bf16.gmra.mrb[192].mxu1 %v8641_v40 }
 0x1b2   : > { %v1456_v21 = vpop.f32.mrb[72].mxu0  ;;  %2902 = vmatprep.mubr.bf16.mxu1 %v8641_v40 }
 0x1b3   : > { %v8851_v26 = vadd.f32 %v8613_v7, %v1456_v21  ;;  %v1458_v45 = vpop.f32.mrb[73].mxu0 }
 0x1b4   : > { %v1459_v19 = vpop.f32.mrb[74].mxu0  ;;  %v8853_v16 = vpop.f32.mrb[88].mxu1 }
 0x1b5   : > { %10112 = vst [vmem:[#allocation11_spill] sm:$0xff] %v8851_v26  ;;  %v8856_v34 = vadd.f32 %v8618_v24, %v1459_v19  ;;  %v1461_v44 = vpop.f32.mrb[75].mxu0  ;;  %v2090_v11 = vpop.f32.mrb[89].mxu1 }
 0x1b6   : > { %v8858_v30 = vpop.f32.mrb[90].mxu1 }
 0x1b7   : > { %10113 = vst [vmem:[#allocation12_spill] sm:$0xff] %v8856_v34  ;;  %v2093_v28 = vpop.f32.mrb[91].mxu1 }
 0x1b9   : > { %2903 = vmatmul.mubr.bf16.gmra.mrb[196].mxu1 %v8641_v40 }
 0x1ba   : > { %v1464_v36 = vpop.f32.mrb[76].mxu0  ;;  %7285 = vmatprep.mubr.bf16.mxu1 %v8641_v40 }
 0x1bb   : > { %v8863_v7 = vadd.f32 %v8608_v62, %v1464_v36  ;;  %v1466_v21 = vpop.f32.mrb[77].mxu0  ;;  %v7557_v62 = vld [vmem:[%s10097_s5 + $0x140] sm:$0xff]  }
 0x1bc   : > { %v1467_v45 = vpop.f32.mrb[78].mxu0  ;;  %v8865_v26 = vpop.f32.mrb[92].mxu1  ;;  %7325 = vmatprep.subr.bf16.mxu0 %v7557_v62 }
 0x1bd   : > { %10114 = vst [vmem:[#allocation13_spill] sm:$0xff] %v8863_v7  ;;  %v8868_v24 = vadd.f32 %v8615_v15, %v1467_v45  ;;  %v1469_v19 = vpop.f32.mrb[79].mxu0  ;;  %v2098_v44 = vpop.f32.mrb[93].mxu1  ;;  %7326 = vmatpush3.bf16.msra.mxu0 %v7557_v62 }
 0x1be   : > { %v8870_v11 = vpop.f32.mrb[94].mxu1 }
 0x1bf   : > { %10115 = vst [vmem:[#allocation14_spill] sm:$0xff] %v8868_v24  ;;  %v2101_v28 = vpop.f32.mrb[95].mxu1 }
 0x1c1   : > { %7286 = vmatmul.mubr.bf16.vlgmr.msra.gmra.mrb[200].mxu1 %v8641_v40 }
 0x1c2   : > { %v7175_v34 = vpop.f32.mrb[80].mxu0  ;;  %7289 = vmatprep.mubr.bf16.mxu1 %v8641_v40 }
 0x1c3   : > { %v2185_v31 = vpop.f32.mrb[81].mxu0 }
 0x1c4   : > { %v7176_v36 = vpop.f32.mrb[82].mxu0  ;;  %v8877_v21 = vpop.f32.mrb[96].mxu1 }
 0x1c5   : > { %v2188_v15 = vpop.f32.mrb[83].mxu0  ;;  %v2106_v45 = vpop.f32.mrb[97].mxu1 }
 0x1c6   : > { %v8879_v19 = vpop.f32.mrb[98].mxu1 }
 0x1c7   : > { %10116 = vst [vmem:[#allocation15_spill] sm:$0xff] %v8879_v19  ;;  %v2109_v44 = vpop.f32.mrb[99].mxu1 }
 0x1ca   : > { %v7179_v28 = vpop.f32.mrb[84].mxu0 }
 0x1cb   : > { %v2210_v34 = vadd.f32 %v7179_v28, %v8681_v50  ;;  %v2201_v24 = vpop.f32.mrb[85].mxu0 }
 0x1cc   : > { %v2202_v31 = vadd.f32 %v2201_v24, %v8660_v3  ;;  %v7180_v7 = vpop.f32.mrb[86].mxu0  ;;  %v8883_v58 = vpop.f32.mrb[100].mxu1 }
 0x1cd   : > { %v8886_v36 = vadd.f32 %v2210_v34, %v8570_v60  ;;  %v2213_v15 = vadd.f32 %v7180_v7, %v8690_v46  ;;  %v2204_v45 = vpop.f32.mrb[87].mxu0  ;;  %v2114_v20 = vpop.f32.mrb[101].mxu1 }
 0x1ce   : > { %v8890_v19 = vadd.f32 %v2202_v31, %v8553_v4  ;;  %v2205_v62 = vadd.f32 %v2204_v45, %v8668_v5  ;;  %v8893_v44 = vpop.f32.mrb[102].mxu1  ;;  %v7559_v4 = vld [vmem:[%s10097_s5 + $0x148] sm:$0xff]  }
 0x1cf   : > { %v8896_v50 = vadd.f32 %v2213_v15, %v8575_v10  ;;  %v2117_v3 = vpop.f32.mrb[103].mxu1  ;;  %7327 = vmatprep.subr.bf16.mxu0 %v7559_v4 }
 0x1d0   : > { %v8899_v24 = vadd.f32 %v2205_v62, %v8557_v35  ;;  %7328 = vmatpush3.bf16.msra.mxu0 %v7559_v4 }
 0x1d2   : > { %v7183_v60 = vpop.f32.mrb[88].mxu0 }
 0x1d3   : > { %v2226_v28 = vadd.f32 %v7183_v60, %v8725_v9  ;;  %v2217_v46 = vpop.f32.mrb[89].mxu0 }
 0x1d4   : > { %v2218_v20 = vadd.f32 %v2217_v46, %v8700_v55  ;;  %v7184_v5 = vpop.f32.mrb[90].mxu0  ;;  %v8906_v7 = vpop.f32.mrb[104].mxu1 }
 0x1d5   : > { %v8909_v10 = vadd.f32 %v2226_v28, %v8606_v25  ;;  %v2229_v34 = vadd.f32 %v7184_v5, %v8734_v17  ;;  %v2220_v35 = vpop.f32.mrb[91].mxu0  ;;  %v2122_v31 = vpop.f32.mrb[105].mxu1 }
 0x1d6   : > { %v8913_v9 = vadd.f32 %v2218_v20, %v8588_v39  ;;  %v2221_v15 = vadd.f32 %v2220_v35, %v8709_v47  ;;  %v8916_v45 = vpop.f32.mrb[106].mxu1  ;;  %v7562_v47 = vld [vmem:[%s10097_s5 + $0xc0] sm:$0xff]  }
 0x1d7   : > { %v8919_v55 = vadd.f32 %v2229_v34, %v8611_v56  ;;  %v2125_v62 = vpop.f32.mrb[107].mxu1  ;;  %4762 = vmatpush1.bf16.msra.mxu1 %v7562_v47 }
 0x1d8   : > { %v8922_v25 = vadd.f32 %v2221_v15, %v8593_v33  ;;  %4763 = vmatprep.subr.bf16.mxu1 %v8641_v40 }
 0x1da   : > { %v7187_v3 = vpop.f32.mrb[92].mxu0 }
 0x1db   : > { %v2242_v17 = vadd.f32 %v7187_v3, %v8779_v49  ;;  %v2233_v60 = vpop.f32.mrb[93].mxu0 }
 0x1dc   : > { %v2234_v28 = vadd.f32 %v2233_v60, %v8752_v42  ;;  %v7188_v39 = vpop.f32.mrb[94].mxu0  ;;  %v8926_v46 = vpop.f32.mrb[108].mxu1 }
 0x1dd   : > { %v8932_v56 = vadd.f32 %v2242_v17, %v8639_v37  ;;  %v2245_v4 = vadd.f32 %v7188_v39, %v8788_v1  ;;  %v2236_v33 = vpop.f32.mrb[95].mxu0  ;;  %v2130_v20 = vpop.f32.mrb[109].mxu1  ;;  %v7563_v1 = vld [vmem:[%s10097_s5 + $0xc8] sm:$0xff]  }
 0x1de   : > { %v8936_v5 = vadd.f32 %v2234_v28, %v8623_v18  ;;  %v2237_v49 = vadd.f32 %v2236_v33, %v8761_v12  ;;  %v8939_v42 = vpop.f32.mrb[110].mxu1  ;;  %4764 = vmatpush1.bf16.msra.mxu1 %v7563_v1 }
 0x1df   : > { %v8942_v34 = vadd.f32 %v2245_v4, %v8648_v48  ;;  %v2133_v35 = vpop.f32.mrb[111].mxu1  ;;  %4765 = vmatprep.subr.bf16.mxu1 %v8641_v40 }
 0x1e0   : > { %v8946_v37 = vadd.f32 %v2237_v49, %v8629_v54  ;;  %v7564_v54 = vld [vmem:[%s10097_s5 + $0xd0] sm:$0xff]   ;;  %v7567_v35 = vld [vmem:[%s10097_s5 + $0xe0] sm:$0xff]  }
 0x1e2   : > { %v7191_v18 = vpop.f32.mrb[96].mxu0  ;;  %4766 = vmatpush1.bf16.msra.mxu1 %v7564_v54 }
 0x1e3   : > { %v2258_v12 = vadd.f32 %v7191_v18, %v8815_v41  ;;  %v2249_v31 = vpop.f32.mrb[97].mxu0  ;;  %4767 = vmatprep.subr.bf16.mxu1 %v8641_v40 }
 0x1e4   : > { %v2250_v48 = vadd.f32 %v2249_v31, %v8801_v53  ;;  %v7192_v15 = vpop.f32.mrb[98].mxu0  ;;  %v8954_v62 = vpop.f32.mrb[112].mxu1 }
 0x1e5   : > { %v2402_v3 = vadd.f32 %v2258_v12, %v8679_v6  ;;  %v2261_v17 = vadd.f32 %v7192_v15, %v8820_v2  ;;  %v2252_v60 = vpop.f32.mrb[99].mxu0  ;;  %v2138_v28 = vpop.f32.mrb[113].mxu1  ;;  %v7565_v2 = vld [vmem:[%s10097_s5 + $0xd8] sm:$0xff]  }
 0x1e6   : > { %v8962_v41 = vadd.f32 %v2250_v48, %v8657_v29  ;;  %v2253_v39 = vadd.f32 %v2252_v60, %v8807_v32  ;;  %v8965_v47 = vpop.f32.mrb[114].mxu1  ;;  %4768 = vmatpush1.bf16.msra.mxu1 %v7565_v2 }
 0x1e7   : > { %2442 = vst [vmem:[#allocation3 + $0x90] sm:$0xff] %v2402_v3  ;;  %v2403_v53 = vadd.f32 %v2261_v17, %v8688_v57  ;;  %v2141_v4 = vpop.f32.mrb[115].mxu1  ;;  %v7560_v57 = vld [vmem:[%s10097_s5 + $0x150] sm:$0xff]   ;;  %4769 = vmatprep.subr.bf16.mxu1 %v8641_v40 }
 0x1e8   : > { %v8970_v6 = vadd.f32 %v2253_v39, %v8666_v14  ;;  %7329 = vmatprep.subr.bf16.mxu0 %v7560_v57 }
 0x1e9   : > { %2443 = vst [vmem:[#allocation3 + $0x98] sm:$0xff] %v2403_v53  ;;  %7330 = vmatpush3.bf16.msra.mxu0 %v7560_v57 }
 0x1ea   : > { %v7195_v29 = vpop.f32.mrb[100].mxu0  ;;  %4770 = vmatpush1.bf16.msra.mxu1 %v7567_v35 }
 0x1eb   : > { %v2274_v32 = vadd.f32 %v7195_v29, %v8841_v52  ;;  %v2265_v33 = vpop.f32.mrb[101].mxu0  ;;  %4771 = vmatprep.subr.bf16.mxu1 %v8641_v40 }
 0x1ec   : > { %v2266_v20 = vadd.f32 %v2265_v33, %v8828_v43  ;;  %v7196_v14 = vpop.f32.mrb[102].mxu0  ;;  %v8981_v49 = vpop.f32.mrb[116].mxu1 }
 0x1ed   : > { %v2406_v1 = vadd.f32 %v2274_v32, %v8719_v13  ;;  %v2277_v52 = vadd.f32 %v7196_v14, %v8846_v0  ;;  %v2268_v18 = vpop.f32.mrb[103].mxu0  ;;  %v2146_v12 = vpop.f32.mrb[117].mxu1  ;;  %v7568_v0 = vld [vmem:[%s10097_s5 + $0xe8] sm:$0xff]   ;;  %v7571_v14 = vld [vmem:[%s10097_s5 + $0x100] sm:$0xff]  }
 0x1ee   : > { %v2404_v31 = vadd.f32 %v2266_v20, %v8698_v22  ;;  %v2269_v48 = vadd.f32 %v2268_v18, %v8833_v59  ;;  %v8990_v15 = vpop.f32.mrb[118].mxu1  ;;  %4772 = vmatpush1.bf16.msra.mxu1 %v7568_v0  ;;  %v10117_v18 = vld [vmem:[#allocation4_spill] sm:$0xff] }
 0x1ef   : > { %2446 = vst [vmem:[#allocation3 + $0xb0] sm:$0xff] %v2406_v1  ;;  %v2407_v43 = vadd.f32 %v2277_v52, %v8731_v27  ;;  %v2149_v54 = vpop.f32.mrb[119].mxu1  ;;  %4773 = vmatprep.subr.bf16.mxu1 %v8641_v40 }
 0x1f0   : > { %2444 = vst [vmem:[#allocation3 + $0xa0] sm:$0xff] %v2404_v31  ;;  %v2405_v13 = vadd.f32 %v2269_v48, %v8706_v8  ;;  %v7569_v8 = vld [vmem:[%s10097_s5 + $0xf0] sm:$0xff]   ;;  %v10118_v31 = vld [vmem:[#allocation15_spill] sm:$0xff] }
 0x1f1   : > { %2447 = vst [vmem:[#allocation3 + $0xb8] sm:$0xff] %v2407_v43 }
 0x1f2   : > { %2445 = vst [vmem:[#allocation3 + $0xa8] sm:$0xff] %v2405_v13  ;;  %v7199_v22 = vpop.f32.mrb[104].mxu0  ;;  %4774 = vmatpush1.bf16.msra.mxu1 %v7569_v8  ;;  %v7574_v8 = vld [vmem:[%s10097_s5 + $0x110] sm:$0xff]  }
 0x1f3   : > { %v2290_v59 = vadd.f32 %v7199_v22, %v8865_v26  ;;  %v2281_v3 = vpop.f32.mrb[105].mxu0  ;;  %4775 = vmatprep.subr.bf16.mxu1 %v8641_v40 }
 0x1f4   : > { %v2282_v27 = vadd.f32 %v2281_v3, %v8853_v16  ;;  %v7200_v17 = vpop.f32.mrb[106].mxu0  ;;  %v2752_v60 = vpop.f32.mrb[120].mxu1 }
 0x1f5   : > { %v2410_v28 = vadd.f32 %v2290_v59, %v8774_v38  ;;  %v2293_v39 = vadd.f32 %v7200_v17, %v8870_v11  ;;  %v2284_v53 = vpop.f32.mrb[107].mxu0  ;;  %v2754_v4 = vpop.f32.mrb[121].mxu1  ;;  %v7570_v38 = vld [vmem:[%s10097_s5 + $0xf8] sm:$0xff]  }
 0x1f6   : > { %v2408_v2 = vadd.f32 %v2282_v27, %v8747_v23  ;;  %v2285_v26 = vadd.f32 %v2284_v53, %v8858_v30  ;;  %v2755_v29 = vpop.f32.mrb[122].mxu1  ;;  %4776 = vmatpush1.bf16.msra.mxu1 %v7570_v38  ;;  %v10124_v38 = vld [vmem:[#allocation8_spill] sm:$0xff] }
 0x1f7   : > { %2450 = vst [vmem:[#allocation3 + $0xd0] sm:$0xff] %v2410_v28  ;;  %v2411_v16 = vadd.f32 %v2293_v39, %v8785_v63  ;;  %v2757_v32 = vpop.f32.mrb[123].mxu1  ;;  %v7561_v63 = vld [vmem:[%s10097_s5 + $0x158] sm:$0xff]   ;;  %4777 = vmatprep.subr.bf16.mxu1 %v8641_v40 }
 0x1f8   : > { %2448 = vst [vmem:[#allocation3 + $0xc0] sm:$0xff] %v2408_v2  ;;  %v2409_v33 = vadd.f32 %v2285_v26, %v8758_v61  ;;  %7331 = vmatprep.subr.bf16.mxu0 %v7561_v63  ;;  %v10121_v28 = vld [vmem:[#allocation9_spill] sm:$0xff]  ;;  %v10122_v26 = vld [vmem:[#allocation7_spill] sm:$0xff] }
 0x1f9   : > { %2451 = vst [vmem:[#allocation3 + $0xd8] sm:$0xff] %v2411_v16  ;;  %7332 = vmatpush3.bf16.msra.mxu0 %v7561_v63  ;;  %v7566_v63 = vld [vmem:[%s10097_s5 + $0x160] sm:$0xff]  }
 0x1fa   : > { %2449 = vst [vmem:[#allocation3 + $0xc8] sm:$0xff] %v2409_v33  ;;  %v7203_v23 = vpop.f32.mrb[108].mxu0  ;;  %4778 = vmatpush1.bf16.msra.mxu1 %v7571_v14  ;;  %v7576_v14 = vld [vmem:[%s10097_s5 + $0x120] sm:$0xff]   ;;  %7333 = vmatprep.subr.bf16.mxu0 %v7566_v63 }
 0x1fb   : > { %v2306_v30 = vadd.f32 %v7203_v23, %v8883_v58  ;;  %v2297_v11 = vpop.f32.mrb[109].mxu0  ;;  %4779 = vmatprep.subr.bf16.mxu1 %v8641_v40 }
 0x1fc   : > { %v2298_v57 = vadd.f32 %v2297_v11, %v8877_v21  ;;  %v7204_v61 = vpop.f32.mrb[110].mxu0  ;;  %v2760_v20 = vpop.f32.mrb[124].mxu1  ;;  %v10119_v21 = vld [vmem:[#allocation6_spill] sm:$0xff] }
 0x1fd   : > { %v2414_v35 = vadd.f32 %v2306_v30, %v8813_v51  ;;  %v2309_v1 = vadd.f32 %v7204_v61, %v8893_v44  ;;  %v2300_v58 = vpop.f32.mrb[111].mxu0  ;;  %v2762_v52 = vpop.f32.mrb[125].mxu1  ;;  %v10120_v51 = vld [vmem:[#allocation5_spill] sm:$0xff]  ;;  %v7573_v44 = vld [vmem:[%s10097_s5 + $0x108] sm:$0xff]   ;;  %7334 = vmatpush3.bf16.msra.mxu0 %v7566_v63 }
 0x1fe   : > { %v2412_v12 = vadd.f32 %v2298_v57, %v10117_v18  ;;  %v2301_v48 = vadd.f32 %v2300_v58, %v10118_v31  ;;  %v2763_v43 = vpop.f32.mrb[126].mxu1  ;;  %4780 = vmatpush1.bf16.msra.mxu1 %v7573_v44  ;;  %v10126_v18 = vld [vmem:[#allocation11_spill] sm:$0xff] }
 0x1ff   : > { %2454 = vst [vmem:[#allocation3 + $0xf0] sm:$0xff] %v2414_v35  ;;  %v2415_v54 = vadd.f32 %v2309_v1, %v10119_v21  ;;  %v2765_v13 = vpop.f32.mrb[127].mxu1  ;;  %4781 = vmatprep.subr.bf16.mxu1 %v8641_v40  ;;  %v10125_v35 = vld [vmem:[#allocation13_spill] sm:$0xff]  ;;  %v10127_v43 = vld [vmem:[#allocation14_spill] sm:$0xff] }
 0x200   : > { %2452 = vst [vmem:[#allocation3 + $0xe0] sm:$0xff] %v2412_v12  ;;  %v2413_v0 = vadd.f32 %v2301_v48, %v10120_v51 }
 0x201   : > { %2455 = vst [vmem:[#allocation3 + $0xf8] sm:$0xff] %v2415_v54 }
 0x202   : > { %2453 = vst [vmem:[#allocation3 + $0xe8] sm:$0xff] %v2413_v0  ;;  %v7207_v22 = vpop.f32.mrb[112].mxu0  ;;  %4782 = vmatpush1.bf16.msra.mxu1 %v7574_v8 }
 0x203   : > { %v2322_v59 = vadd.f32 %v7207_v22, %v8926_v46  ;;  %v2313_v3 = vpop.f32.mrb[113].mxu0  ;;  %4783 = vmatprep.subr.bf16.mxu1 %v8641_v40 }
 0x204   : > { %v2314_v27 = vadd.f32 %v2313_v3, %v8906_v7  ;;  %v7208_v17 = vpop.f32.mrb[114].mxu0  ;;  %v9036_v60 = vpop.f32.mrb[128].mxu1  ;;  %v10123_v7 = vld [vmem:[#allocation10_spill] sm:$0xff]  ;;  %v7579_v3 = vld [vmem:[%s10097_s5 + $0x130] sm:$0xff]  }
 0x205   : > { %v2418_v39 = vadd.f32 %v2322_v59, %v10121_v28  ;;  %v2325_v53 = vadd.f32 %v7208_v17, %v8939_v42  ;;  %v2316_v4 = vpop.f32.mrb[115].mxu0  ;;  %v2770_v2 = vpop.f32.mrb[129].mxu1  ;;  %v7575_v42 = vld [vmem:[%s10097_s5 + $0x118] sm:$0xff]   ;;  %v7578_v59 = vld [vmem:[%s10097_s5 + $0x170] sm:$0xff]  }
 0x206   : > { %v2416_v46 = vadd.f32 %v2314_v27, %v10122_v26  ;;  %v2317_v29 = vadd.f32 %v2316_v4, %v8916_v45  ;;  %v9045_v16 = vpop.f32.mrb[130].mxu1  ;;  %4784 = vmatpush1.bf16.msra.mxu1 %v7575_v42  ;;  %v7580_v28 = vld [vmem:[%s10097_s5 + $0x138] sm:$0xff]   ;;  %v9089_v26 = vld [vmem:[%s10096_s4] ss:$0 sm:$0xff] }
 0x207   : > { %2458 = vst [vmem:[#allocation3 + $0x110] sm:$0xff] %v2418_v39  ;;  %v2419_v32 = vadd.f32 %v2325_v53, %v10123_v7  ;;  %v2773_v33 = vpop.f32.mrb[131].mxu1  ;;  %4785 = vmatprep.subr.bf16.mxu1 %v8641_v40 }
 0x208   : > { %2456 = vst [vmem:[#allocation3 + $0x100] sm:$0xff] %v2416_v46  ;;  %v2417_v23 = vadd.f32 %v2317_v29, %v10124_v38 }
 0x209   : > { %2459 = vst [vmem:[#allocation3 + $0x118] sm:$0xff] %v2419_v32 }
 0x20a   : > { %2457 = vst [vmem:[#allocation3 + $0x108] sm:$0xff] %v2417_v23  ;;  %v7211_v30 = vpop.f32.mrb[116].mxu0  ;;  %4786 = vmatpush1.bf16.msra.mxu1 %v7576_v14 }
 0x20b   : > { %v2338_v45 = vadd.f32 %v7211_v30, %v8981_v49  ;;  %v2329_v11 = vpop.f32.mrb[117].mxu0  ;;  %4787 = vmatprep.subr.bf16.mxu1 %v8641_v40 }
 0x20c   : > { %v2330_v57 = vadd.f32 %v2329_v11, %v8954_v62  ;;  %v7212_v61 = vpop.f32.mrb[118].mxu0  ;;  %v2776_v20 = vpop.f32.mrb[132].mxu1  ;;  %v7572_v62 = vld [vmem:[%s10097_s5 + $0x168] sm:$0xff]  }
 0x20d   : > { %v2422_v1 = vadd.f32 %v2338_v45, %v10125_v35  ;;  %v2341_v58 = vadd.f32 %v7212_v61, %v8990_v15  ;;  %v2332_v49 = vpop.f32.mrb[119].mxu0  ;;  %v2778_v52 = vpop.f32.mrb[133].mxu1  ;;  %v10128_v15 = vld [vmem:[#allocation12_spill] sm:$0xff]  ;;  %7335 = vmatprep.subr.bf16.mxu0 %v7572_v62 }
 0x20e   : > { %v2420_v12 = vadd.f32 %v2330_v57, %v10126_v18  ;;  %v2333_v31 = vadd.f32 %v2332_v49, %v8965_v47  ;;  %v2779_v48 = vpop.f32.mrb[134].mxu1  ;;  %v7577_v47 = vld [vmem:[%s10097_s5 + $0x128] sm:$0xff]   ;;  %7336 = vmatpush3.bf16.msra.mxu0 %v7572_v62  ;;  %v7581_v62 = vld [vmem:[%s10097_s5 + $0x178] sm:$0xff]  }
 0x20f   : > { %2462 = vst [vmem:[#allocation3 + $0x130] sm:$0xff] %v2422_v1  ;;  %v2423_v21 = vadd.f32 %v2341_v58, %v10127_v43  ;;  %v2781_v54 = vpop.f32.mrb[135].mxu1  ;;  %4788 = vmatpush1.bf16.msra.mxu1 %v7577_v47  ;;  %7337 = vmatprep.subr.bf16.mxu0 %v7578_v59 }
 0x210   : > { %2460 = vst [vmem:[#allocation3 + $0x120] sm:$0xff] %v2420_v12  ;;  %v2421_v13 = vadd.f32 %v2333_v31, %v10128_v15  ;;  %4789 = vmatprep.subr.bf16.mxu1 %v8641_v40 }
 0x211   : > { %2463 = vst [vmem:[#allocation3 + $0x138] sm:$0xff] %v2423_v21 }
 0x212   : > { %2461 = vst [vmem:[#allocation3 + $0x128] sm:$0xff] %v2421_v13  ;;  %v7231_v51 = vpop.f32.mrb[120].mxu0  ;;  %7338 = vmatpush3.bf16.msra.mxu0 %v7578_v59 }
 0x213   : > { %v2945_v0 = vpop.f32.mrb[121].mxu0  ;;  %4790 = vmatpush1.bf16.msra.mxu1 %v7579_v3  ;;  %7339 = vmatprep.subr.bf16.mxu0 %v7581_v62 }
 0x214   : > { %v7232_v44 = vpop.f32.mrb[122].mxu0  ;;  %v2784_v22 = vpop.f32.mrb[136].mxu1  ;;  %4791 = vmatprep.subr.bf16.mxu1 %v8641_v40 }
 0x215   : > { %v2948_v27 = vpop.f32.mrb[123].mxu0  ;;  %v2786_v17 = vpop.f32.mrb[137].mxu1 }
 0x216   : > { %v2787_v8 = vpop.f32.mrb[138].mxu1  ;;  %7340 = vmatpush3.bf16.msra.mxu0 %v7581_v62 }
 0x217   : > { %v2789_v39 = vpop.f32.mrb[139].mxu1  ;;  %4792 = vmatpush1.bf16.msra.mxu1 %v7580_v28 }
 0x21a   : > { %v7235_v53 = vpop.f32.mrb[124].mxu0 }
 0x21b   : > { %v2970_v4 = vadd.f32 %v7235_v53, %v2776_v20  ;;  %v2961_v2 = vpop.f32.mrb[125].mxu0 }
 0x21c   : > { %v2962_v46 = vadd.f32 %v2961_v2, %v9036_v60  ;;  %v7236_v29 = vpop.f32.mrb[126].mxu0  ;;  %v2792_v7 = vpop.f32.mrb[140].mxu1 }
 0x21d   : > { %v3150_v32 = vadd.f32 %v2970_v4, %v8886_v36  ;;  %v2973_v33 = vadd.f32 %v7236_v29, %v2779_v48  ;;  %v2964_v38 = vpop.f32.mrb[127].mxu0  ;;  %v2794_v23 = vpop.f32.mrb[141].mxu1  ;;  %v3622_v29 = vld [vmem:[#allocation2 + $0x60] sm:$0xff] }
 0x21e   : > { %v3148_v40 = vadd.f32 %v2962_v46, %v8890_v19  ;;  %v2965_v42 = vadd.f32 %v2964_v38, %v9045_v16  ;;  %v2795_v30 = vpop.f32.mrb[142].mxu1  ;;  %v3763_v46 = vld [vmem:[#allocation2 + $0x70] sm:$0xff]  ;;  %v3760_v38 = vld [vmem:[#allocation2 + $0x58] sm:$0xff] }
 0x21f   : > { %v3277_v45 = vadd.f32 %v9089_v26, %v3150_v32  ;;  %v3151_v11 = vadd.f32 %v2973_v33, %v8896_v50  ;;  %v2797_v63 = vpop.f32.mrb[143].mxu1 }
 0x220   : > { %v3275_v57 = vadd.f32 %v9089_v26, %v3148_v40  ;;  %v3149_v60 = vadd.f32 %v2965_v42, %v8899_v24 }
 0x221   : > { %v3278_v61 = vadd.f32 %v9089_v26, %v3151_v11  ;;  %v3317_v14 = vmax.f32 %v3277_v45, 0.0 }
 0x222   : > { %v3276_v36 = vadd.f32 %v9089_v26, %v3149_v60  ;;  %v7239_v20 = vpop.f32.mrb[128].mxu0  ;;  %v3315_v16 = vmax.f32 %v3275_v57, 0.0 }
 0x223   : > { %v3318_v35 = vmax.f32 %v3278_v61, 0.0  ;;  %v2986_v19 = vadd.f32 %v7239_v20, %v2792_v7  ;;  %v2977_v1 = vpop.f32.mrb[129].mxu0 }
 0x224   : > { %v3316_v58 = vmax.f32 %v3276_v36, 0.0  ;;  %v2978_v49 = vadd.f32 %v2977_v1, %v2784_v22  ;;  %v7240_v52 = vpop.f32.mrb[130].mxu0  ;;  %v2800_v18 = vpop.f32.mrb[144].mxu1 }
 0x225   : > { %v9101_v50 = vpack.c.bf16 %v3318_v35, %v3317_v14  ;;  %v3154_v12 = vadd.f32 %v2986_v19, %v8909_v10  ;;  %v2989_v31 = vadd.f32 %v7240_v52, %v2795_v30  ;;  %v2980_v24 = vpop.f32.mrb[131].mxu0  ;;  %v2802_v48 = vpop.f32.mrb[145].mxu1 }
 0x226   : > { %v3433_v43 = vpack.c.bf16 %v3316_v58, %v3315_v16  ;;  %v3152_v21 = vadd.f32 %v2978_v49, %v8913_v9  ;;  %v2981_v54 = vadd.f32 %v2980_v24, %v2787_v8  ;;  %v2803_v15 = vpop.f32.mrb[146].mxu1  ;;  %v9122_v8 = vld [vmem:[#allocation2] sm:$0xff] }
 0x227   : > { %v3473_v13 = vshrl.u32 %v9101_v50, 16  ;;  %v3476_v47 = vshll.u32 %v9101_v50, 16  ;;  %3676 = vst [vmem:[#allocation2 + $0x68] sm:$0xff] %v9101_v50  ;;  %v3281_v10 = vadd.f32 %v9089_v26, %v3154_v12  ;;  %v3155_v51 = vadd.f32 %v2989_v31, %v8919_v55  ;;  %v2805_v0 = vpop.f32.mrb[147].mxu1  ;;  %5520 = vmatprep.subr.bf16.mxu0 %v9122_v8 }
 0x228   : > { %v3466_v44 = vshrl.u32 %v3433_v43, 16  ;;  %v3469_v22 = vshll.u32 %v3433_v43, 16  ;;  %3675 = vst [vmem:[#allocation2 + $0x50] sm:$0xff] %v3433_v43  ;;  %v3279_v59 = vadd.f32 %v9089_v26, %v3152_v21  ;;  %v3153_v9 = vadd.f32 %v2981_v54, %v8922_v25  ;;  %4138 = vmatprep.mubr.bf16.mxu0 %v3433_v43  ;;  %v3619_v21 = vld [vmem:[#allocation2 + $0x48] sm:$0xff] }
 0x229   : > { %v3475_v27 = vrot.slane %v3473_v13, 7  ;;  %v3699_v17 = vrot.slane %v3476_v47, 1  ;;  %v3282_v55 = vadd.f32 %v9089_v26, %v3155_v51  ;;  %v3321_v53 = vmax.f32 %v3281_v10, 0.0 }
 0x22a   : > { %v3468_v28 = vrot.slane %v3466_v44, 7  ;;  %v3697_v39 = vrot.slane %v3469_v22, 1  ;;  %v3280_v4 = vadd.f32 %v9089_v26, %v3153_v9  ;;  %v7243_v2 = vpop.f32.mrb[132].mxu0  ;;  %v3319_v7 = vmax.f32 %v3279_v59, 0.0 }
 0x22b   : > { %v3322_v32 = vmax.f32 %v3282_v55, 0.0  ;;  %v2993_v33 = vpop.f32.mrb[133].mxu0  ;;  %v3700_v23 = vor.u32 %v3699_v17, %v3473_v13  ;;  %v3478_v40 = vor.u32 %v3476_v47, %v3475_v27  ;;  %v3766_v27 = vld [vmem:[#allocation2 + $0x88] sm:$0xff]  ;;  %v3625_v55 = vld [vmem:[#allocation2 + $0x78] sm:$0xff] }
 0x22c   : > { %v3320_v42 = vmax.f32 %v3280_v4, 0.0  ;;  %v2808_v30 = vpop.f32.mrb[148].mxu1  ;;  %v2994_v45 = vadd.f32 %v2993_v33, %v2800_v18  ;;  %v7244_v11 = vpop.f32.mrb[134].mxu0  ;;  %v3698_v63 = vor.u32 %v3697_v39, %v3466_v44  ;;  %v3471_v57 = vor.u32 %v3469_v22, %v3468_v28  ;;  %v3769_v44 = vld [vmem:[#allocation2 + $0xa0] sm:$0xff]  ;;  %v3628_v28 = vld [vmem:[#allocation2 + $0x90] sm:$0xff] }
 0x22d   : > { %v9132_v60 = vpack.c.bf16 %v3322_v32, %v3321_v53  ;;  %v3002_v61 = vadd.f32 %v7243_v2, %v2808_v30  ;;  %v2810_v36 = vpop.f32.mrb[149].mxu1  ;;  %v2996_v20 = vpop.f32.mrb[135].mxu0  ;;  %v3764_v14 = vsel %vm9117_vm6, %v3700_v23, %v3763_v46  ;;  %v9138_v35 = vsel %vm9127_vm7, %v3478_v40, %v3622_v29  ;;  %v9168_v29 = vld [vmem:[%s10097_s5 + $0x200] sm:$0xff]  }
 0x22e   : > { %v9140_v19 = vpack.c.bf16 %v3320_v42, %v3319_v7  ;;  %v3156_v1 = vadd.f32 %v2994_v45, %v8936_v5  ;;  %v2811_v16 = vpop.f32.mrb[150].mxu1  ;;  %v2997_v58 = vadd.f32 %v2996_v20, %v2803_v15  ;;  %v3761_v49 = vsel %vm9117_vm6, %v3698_v63, %v3760_v38  ;;  %3765 = vst [vmem:[#allocation2 + $0x70] sm:$0xff] %v3764_v14 }
 0x22f   : > { %3624 = vst [vmem:[#allocation2 + $0x60] sm:$0xff] %v9138_v35  ;;  %v3487_v52 = vshrl.u32 %v9132_v60, 16  ;;  %v3490_v18 = vshll.u32 %v9132_v60, 16  ;;  %3678 = vst [vmem:[#allocation2 + $0x98] sm:$0xff] %v9132_v60  ;;  %v3158_v12 = vadd.f32 %v3002_v61, %v8932_v56  ;;  %v3005_v31 = vadd.f32 %v7244_v11, %v2811_v16  ;;  %v2813_v24 = vpop.f32.mrb[151].mxu1  ;;  %7290 = vmatmul.mubr.bf16.gmra.mrb[204].mxu1 %v3761_v49 }
 0x230   : > { %3762 = vst [vmem:[#allocation2 + $0x58] sm:$0xff] %v3761_v49  ;;  %v3480_v5 = vshrl.u32 %v9140_v19, 16  ;;  %v3483_v48 = vshll.u32 %v9140_v19, 16  ;;  %3677 = vst [vmem:[#allocation2 + $0x80] sm:$0xff] %v9140_v19  ;;  %v3283_v62 = vadd.f32 %v9089_v26, %v3156_v1  ;;  %v3157_v43 = vadd.f32 %v2997_v58, %v8946_v37  ;;  %7293 = vmatprep.mubr.bf16.mxu1 %v3764_v14 }
 0x231   : > { %v3489_v54 = vrot.slane %v3487_v52, 7  ;;  %v3703_v15 = vrot.slane %v3490_v18, 1  ;;  %v3285_v56 = vadd.f32 %v9089_v26, %v3158_v12  ;;  %v3159_v13 = vadd.f32 %v3005_v31, %v8942_v34  ;;  %7381 = vmatprep.subr.bf16.mxu1 %v9168_v29 }
 0x232   : > { %v3482_v47 = vrot.slane %v3480_v5, 7  ;;  %v3701_v10 = vrot.slane %v3483_v48, 1  ;;  %v3284_v51 = vadd.f32 %v9089_v26, %v3157_v43  ;;  %v9158_v0 = vpop.f32.mrb[136].mxu0  ;;  %v3323_v22 = vmax.f32 %v3283_v62, 0.0  ;;  %v3631_v62 = vld [vmem:[#allocation2 + $0xa8] sm:$0xff] }
 0x233   : > { %v3286_v59 = vadd.f32 %v9089_v26, %v3159_v13  ;;  %v3009_v9 = vpop.f32.mrb[137].mxu0  ;;  %v3620_v37 = vsel %vm9127_vm7, %v3471_v57, %v3619_v21  ;;  %v3704_v17 = vor.u32 %v3703_v15, %v3487_v52  ;;  %v3492_v46 = vor.u32 %v3490_v18, %v3489_v54 }
 0x234   : > { %v3324_v39 = vmax.f32 %v3284_v51, 0.0  ;;  %v2816_v34 = vpop.f32.mrb[152].mxu1  ;;  %v9163_v53 = vpop.f32.mrb[138].mxu0  ;;  %3621 = vst [vmem:[#allocation2 + $0x48] sm:$0xff] %v3620_v37  ;;  %4139 = vmatmul.mubr.bf16.gmra.mrb[172].mxu0 %v3620_v37  ;;  %v3702_v4 = vor.u32 %v3701_v10, %v3480_v5  ;;  %v3485_v2 = vor.u32 %v3483_v48, %v3482_v47  ;;  %v3325_v7 = vmax.f32 %v3285_v56, 0.0  ;;  %v3772_v48 = vld [vmem:[#allocation2 + $0xb8] sm:$0xff] }
 0x235   : > { %v3326_v32 = vmax.f32 %v3286_v59, 0.0  ;;  %v3010_v33 = vadd.f32 %v3009_v9, %v2816_v34  ;;  %v2818_v38 = vpop.f32.mrb[153].mxu1  ;;  %v3012_v23 = vpop.f32.mrb[139].mxu0  ;;  %4146 = vmatprep.mubr.bf16.mxu0 %v9101_v50  ;;  %v3770_v40 = vsel %vm9117_vm6, %v3704_v17, %v3769_v44  ;;  %v9183_v63 = vsel %vm9127_vm7, %v3492_v46, %v3628_v28  ;;  %v3775_v56 = vld [vmem:[#allocation2 + $0xd0] sm:$0xff]  ;;  %v3634_v59 = vld [vmem:[#allocation2 + $0xc0] sm:$0xff] }
 0x236   : > { %v9173_v42 = vpack.c.bf16 %v3324_v39, %v3323_v22  ;;  %v2819_v30 = vpop.f32.mrb[154].mxu1  ;;  %v3767_v45 = vsel %vm9117_vm6, %v3702_v4, %v3766_v27  ;;  %3771 = vst [vmem:[#allocation2 + $0xa0] sm:$0xff] %v3770_v40  ;;  %v9179_v11 = vsel %vm9127_vm7, %v3485_v2, %v3625_v55  ;;  %3630 = vst [vmem:[#allocation2 + $0x90] sm:$0xff] %v9183_v63  ;;  %v3122_v9 = vld [vmem:[#allocation3 + $0x90] sm:$0xff]  ;;  %v3123_v39 = vld [vmem:[#allocation3 + $0x98] sm:$0xff] }
 0x237   : > { %v9186_v50 = vpack.c.bf16 %v3326_v32, %v3325_v7  ;;  %v3160_v57 = vadd.f32 %v3010_v33, %v8962_v41  ;;  %v3013_v61 = vadd.f32 %v3012_v23, %v2819_v30  ;;  %v2821_v36 = vpop.f32.mrb[155].mxu1  ;;  %3768 = vst [vmem:[#allocation2 + $0x88] sm:$0xff] %v3767_v45  ;;  %7294 = vmatmul.mubr.bf16.gmra.mrb[208].mxu1 %v3767_v45  ;;  %3627 = vst [vmem:[#allocation2 + $0x78] sm:$0xff] %v9179_v11 }
 0x238   : > { %v3494_v20 = vshrl.u32 %v9173_v42, 16  ;;  %v3497_v14 = vshll.u32 %v9173_v42, 16  ;;  %3679 = vst [vmem:[#allocation2 + $0xb0] sm:$0xff] %v9173_v42  ;;  %7297 = vmatprep.mubr.bf16.mxu1 %v3770_v40 }
 0x239   : > { %v3501_v1 = vshrl.u32 %v9186_v50, 16  ;;  %v3504_v16 = vshll.u32 %v9186_v50, 16  ;;  %3680 = vst [vmem:[#allocation2 + $0xc8] sm:$0xff] %v9186_v50  ;;  %v3287_v41 = vadd.f32 %v9089_v26, %v3160_v57  ;;  %v3161_v58 = vadd.f32 %v3013_v61, %v8970_v6  ;;  %v3778_v57 = vld [vmem:[#allocation2 + $0xe8] sm:$0xff] }
 0x23a   : > { %v3496_v49 = vrot.slane %v3494_v20, 7  ;;  %v3705_v52 = vrot.slane %v3497_v14, 1  ;;  %v9199_v18 = vpop.f32.mrb[140].mxu0 }
 0x23b   : > { %v3503_v12 = vrot.slane %v3501_v1, 7  ;;  %v3707_v31 = vrot.slane %v3504_v16, 1  ;;  %v3288_v24 = vadd.f32 %v9089_v26, %v3161_v58  ;;  %v3025_v5 = vpop.f32.mrb[141].mxu0  ;;  %v3327_v43 = vmax.f32 %v3287_v41, 0.0  ;;  %v3637_v41 = vld [vmem:[#allocation2 + $0xd8] sm:$0xff]  ;;  %v3124_v58 = vld [vmem:[#allocation3 + $0xa0] sm:$0xff] }
 0x23c   : > { %v2824_v21 = vpop.f32.mrb[156].mxu1  ;;  %v9202_v54 = vpop.f32.mrb[142].mxu0  ;;  %4147 = vmatmul.mubr.bf16.gmra.mrb[176].mxu0 %v9138_v35  ;;  %v3706_v15 = vor.u32 %v3705_v52, %v3494_v20  ;;  %v3499_v6 = vor.u32 %v3497_v14, %v3496_v49 }
 0x23d   : > { %v3328_v13 = vmax.f32 %v3288_v24, 0.0  ;;  %v3018_v47 = vadd.f32 %v9158_v0, %v2824_v21  ;;  %v2826_v10 = vpop.f32.mrb[157].mxu1  ;;  %v3028_v51 = vpop.f32.mrb[143].mxu0  ;;  %4154 = vmatprep.mubr.bf16.mxu0 %v9140_v19  ;;  %v3708_v44 = vor.u32 %v3707_v31, %v3501_v1  ;;  %v3506_v22 = vor.u32 %v3504_v16, %v3503_v12 }
 0x23e   : > { %v2827_v37 = vpop.f32.mrb[158].mxu1  ;;  %v3773_v27 = vsel %vm9117_vm6, %v3706_v15, %v3772_v48  ;;  %v9211_v35 = vsel %vm9127_vm7, %v3499_v6, %v3631_v62  ;;  %v3125_v62 = vld [vmem:[#allocation3 + $0xa8] sm:$0xff] }
 0x23f   : > { %v9213_v17 = vpack.c.bf16 %v3328_v13, %v3327_v43  ;;  %v3162_v55 = vadd.f32 %v3122_v9, %v3018_v47  ;;  %v3021_v0 = vadd.f32 %v9163_v53, %v2827_v37  ;;  %v2829_v28 = vpop.f32.mrb[159].mxu1  ;;  %3774 = vst [vmem:[#allocation2 + $0xb8] sm:$0xff] %v3773_v27  ;;  %7298 = vmatmul.mubr.bf16.gmra.mrb[212].mxu1 %v3773_v27  ;;  %3633 = vst [vmem:[#allocation2 + $0xa8] sm:$0xff] %v9211_v35 }
 0x240   : > { %v3776_v19 = vsel %vm9117_vm6, %v3708_v44, %v3775_v56  ;;  %v9221_v34 = vsel %vm9127_vm7, %v3506_v22, %v3634_v59  ;;  %v3781_v59 = vld [vmem:[#allocation2 + $0x100] sm:$0xff] }
 0x241   : > { %3777 = vst [vmem:[#allocation2 + $0xd0] sm:$0xff] %v3776_v19  ;;  %7301 = vmatprep.mubr.bf16.mxu1 %v3776_v19  ;;  %v3508_v4 = vshrl.u32 %v9213_v17, 16  ;;  %v3511_v2 = vshll.u32 %v9213_v17, 16  ;;  %3681 = vst [vmem:[#allocation2 + $0xe0] sm:$0xff] %v9213_v17  ;;  %v3289_v53 = vadd.f32 %v9089_v26, %v3162_v55  ;;  %v3163_v46 = vadd.f32 %v3123_v39, %v3021_v0  ;;  %v3640_v19 = vld [vmem:[#allocation2 + $0xf0] sm:$0xff]  ;;  %v3126_v39 = vld [vmem:[#allocation3 + $0xb0] sm:$0xff] }
 0x242   : > { %3636 = vst [vmem:[#allocation2 + $0xc0] sm:$0xff] %v9221_v34  ;;  %v9228_v7 = vpop.f32.mrb[144].mxu0 }
 0x243   : > { %v3510_v32 = vrot.slane %v3508_v4, 7  ;;  %v3709_v33 = vrot.slane %v3511_v2, 1  ;;  %v3290_v38 = vadd.f32 %v9089_v26, %v3163_v46  ;;  %v9231_v23 = vpop.f32.mrb[145].mxu0  ;;  %v3329_v40 = vmax.f32 %v3289_v53, 0.0 }
 0x244   : > { %v2832_v30 = vpop.f32.mrb[160].mxu1  ;;  %v9233_v45 = vpop.f32.mrb[146].mxu0  ;;  %4155 = vmatmul.mubr.bf16.gmra.mrb[180].mxu0 %v9179_v11 }
 0x245   : > { %v3330_v61 = vmax.f32 %v3290_v38, 0.0  ;;  %v3026_v36 = vadd.f32 %v3025_v5, %v2832_v30  ;;  %v2834_v20 = vpop.f32.mrb[161].mxu1  ;;  %v9236_v14 = vpop.f32.mrb[147].mxu0  ;;  %v3710_v1 = vor.u32 %v3709_v33, %v3508_v4  ;;  %4162 = vmatprep.mubr.bf16.mxu0 %v9132_v60  ;;  %v3513_v16 = vor.u32 %v3511_v2, %v3510_v32 }
 0x246   : > { %v2835_v49 = vpop.f32.mrb[162].mxu1 }
 0x247   : > { %v9239_v52 = vpack.c.bf16 %v3330_v61, %v3329_v40  ;;  %v3164_v12 = vadd.f32 %v3124_v58, %v3026_v36  ;;  %v3029_v31 = vadd.f32 %v3028_v51, %v2835_v49  ;;  %v2837_v24 = vpop.f32.mrb[163].mxu1  ;;  %v3779_v48 = vsel %vm9117_vm6, %v3710_v1, %v3778_v57  ;;  %v3784_v58 = vld [vmem:[#allocation2 + $0x118] sm:$0xff] }
 0x248   : > { %3780 = vst [vmem:[#allocation2 + $0xe8] sm:$0xff] %v3779_v48  ;;  %7302 = vmatmul.mubr.bf16.gmra.mrb[216].mxu1 %v3779_v48  ;;  %v9245_v5 = vsel %vm9127_vm7, %v3513_v16, %v3637_v41 }
 0x249   : > { %v3515_v60 = vshrl.u32 %v9239_v52, 16  ;;  %v3518_v43 = vshll.u32 %v9239_v52, 16  ;;  %3682 = vst [vmem:[#allocation2 + $0xf8] sm:$0xff] %v9239_v52  ;;  %v3291_v21 = vadd.f32 %v9089_v26, %v3164_v12  ;;  %v3165_v15 = vadd.f32 %v3125_v62, %v3029_v31  ;;  %3639 = vst [vmem:[#allocation2 + $0xd8] sm:$0xff] %v9245_v5 }
 0x24a   : > { %v9252_v56 = vpop.f32.mrb[148].mxu0 }
 0x24b   : > { %v3517_v6 = vrot.slane %v3515_v60, 7  ;;  %v3711_v13 = vrot.slane %v3518_v43, 1  ;;  %v3292_v47 = vadd.f32 %v9089_v26, %v3165_v15  ;;  %v9255_v10 = vpop.f32.mrb[149].mxu0  ;;  %v3331_v51 = vmax.f32 %v3291_v21, 0.0  ;;  %v3128_v21 = vld [vmem:[#allocation3 + $0xc0] sm:$0xff] }
 0x24c   : > { %v2840_v44 = vpop.f32.mrb[164].mxu1  ;;  %v9257_v22 = vpop.f32.mrb[150].mxu0  ;;  %4163 = vmatmul.mubr.bf16.gmra.mrb[184].mxu0 %v9183_v63 }
 0x24d   : > { %v3332_v9 = vmax.f32 %v3292_v47, 0.0  ;;  %v3034_v37 = vadd.f32 %v9199_v18, %v2840_v44  ;;  %v2842_v27 = vpop.f32.mrb[165].mxu1  ;;  %v9261_v55 = vpop.f32.mrb[151].mxu0  ;;  %v3712_v0 = vor.u32 %v3711_v13, %v3515_v60  ;;  %4170 = vmatprep.mubr.bf16.mxu0 %v9173_v42  ;;  %v3520_v28 = vor.u32 %v3518_v43, %v3517_v6  ;;  %v3127_v18 = vld [vmem:[#allocation3 + $0xb8] sm:$0xff] }
 0x24e   : > { %v2843_v4 = vpop.f32.mrb[166].mxu1  ;;  %v3643_v43 = vld [vmem:[#allocation2 + $0x108] sm:$0xff] }
 0x24f   : > { %v9264_v2 = vpack.c.bf16 %v3332_v9, %v3331_v51  ;;  %v3166_v53 = vadd.f32 %v3126_v39, %v3034_v37  ;;  %v3037_v46 = vadd.f32 %v9202_v54, %v2843_v4  ;;  %v2845_v32 = vpop.f32.mrb[167].mxu1  ;;  %v3782_v33 = vsel %vm9117_vm6, %v3712_v0, %v3781_v59 }
 0x250   : > { %3783 = vst [vmem:[#allocation2 + $0x100] sm:$0xff] %v3782_v33  ;;  %7305 = vmatprep.mubr.bf16.mxu1 %v3782_v33  ;;  %v9271_v38 = vsel %vm9127_vm7, %v3520_v28, %v3640_v19 }
 0x251   : > { %v3522_v42 = vshrl.u32 %v9264_v2, 16  ;;  %v3525_v40 = vshll.u32 %v9264_v2, 16  ;;  %3683 = vst [vmem:[#allocation2 + $0x110] sm:$0xff] %v9264_v2  ;;  %v3293_v30 = vadd.f32 %v9089_v26, %v3166_v53  ;;  %v3167_v54 = vadd.f32 %v3127_v18, %v3037_v46  ;;  %3642 = vst [vmem:[#allocation2 + $0xf0] sm:$0xff] %v9271_v38  ;;  %v3787_v46 = vld [vmem:[#allocation2 + $0x130] sm:$0xff] }
 0x252   : > { %v9278_v57 = vpop.f32.mrb[152].mxu0 }
 0x253   : > { %v3524_v61 = vrot.slane %v3522_v42, 7  ;;  %v3713_v36 = vrot.slane %v3525_v40, 1  ;;  %v3294_v20 = vadd.f32 %v9089_v26, %v3167_v54  ;;  %v9281_v1 = vpop.f32.mrb[153].mxu0  ;;  %v3333_v16 = vmax.f32 %v3293_v30, 0.0 }
 0x254   : > { %v2848_v41 = vpop.f32.mrb[168].mxu1  ;;  %4171 = vmatmul.mubr.bf16.gmra.mrb[188].mxu0 %v9211_v35  ;;  %v9284_v49 = vpop.f32.mrb[154].mxu0 }
 0x255   : > { %v3334_v12 = vmax.f32 %v3294_v20, 0.0  ;;  %v3042_v31 = vadd.f32 %v9231_v23, %v2848_v41  ;;  %v2850_v24 = vpop.f32.mrb[169].mxu1  ;;  %v3714_v48 = vor.u32 %v3713_v36, %v3522_v42  ;;  %4178 = vmatprep.mubr.bf16.mxu0 %v9186_v50  ;;  %v9288_v62 = vpop.f32.mrb[155].mxu0  ;;  %v3527_v60 = vor.u32 %v3525_v40, %v3524_v61  ;;  %v3129_v23 = vld [vmem:[#allocation3 + $0xc8] sm:$0xff]  ;;  %v3646_v61 = vld [vmem:[#allocation2 + $0x120] sm:$0xff] }
 0x256   : > { %v2851_v15 = vpop.f32.mrb[170].mxu1  ;;  %v3130_v36 = vld [vmem:[#allocation3 + $0xd0] sm:$0xff] }
 0x257   : > { %v9290_v6 = vpack.c.bf16 %v3334_v12, %v3333_v16  ;;  %v3168_v13 = vadd.f32 %v3128_v21, %v3042_v31  ;;  %v3045_v47 = vadd.f32 %v9236_v14, %v2851_v15  ;;  %v2853_v51 = vpop.f32.mrb[171].mxu1  ;;  %v9295_v44 = vsel %vm9117_vm6, %v3714_v48, %v3784_v58 }
 0x258   : > { %3786 = vst [vmem:[#allocation2 + $0x118] sm:$0xff] %v9295_v44  ;;  %7306 = vmatmul.mubr.bf16.gmra.mrb[220].mxu1 %v9295_v44  ;;  %v9301_v50 = vsel %vm9127_vm7, %v3527_v60, %v3643_v43  ;;  %v3790_v51 = vld [vmem:[#allocation2 + $0x148] sm:$0xff] }
 0x259   : > { %v3529_v59 = vshrl.u32 %v9290_v6, 16  ;;  %v3532_v9 = vshll.u32 %v9290_v6, 16  ;;  %3684 = vst [vmem:[#allocation2 + $0x128] sm:$0xff] %v9290_v6  ;;  %v3295_v14 = vadd.f32 %v9089_v26, %v3168_v13  ;;  %v3169_v37 = vadd.f32 %v3129_v23, %v3045_v47  ;;  %3645 = vst [vmem:[#allocation2 + $0x108] sm:$0xff] %v9301_v50 }
 0x25a   : > { %v7267_v27 = vpop.f32.mrb[156].mxu0 }
 0x25b   : > { %v3531_v0 = vrot.slane %v3529_v59, 7  ;;  %v3715_v28 = vrot.slane %v3532_v9, 1  ;;  %v3296_v19 = vadd.f32 %v9089_v26, %v3169_v37  ;;  %v3089_v39 = vpop.f32.mrb[157].mxu0  ;;  %v3335_v4 = vmax.f32 %v3295_v14, 0.0  ;;  %v3649_v27 = vld [vmem:[#allocation2 + $0x138] sm:$0xff] }
 0x25c   : > { %v2856_v53 = vpop.f32.mrb[172].mxu1  ;;  %4179 = vmatmul.mubr.bf16.gmra.mrb[192].mxu0 %v9221_v34  ;;  %v7268_v32 = vpop.f32.mrb[158].mxu0 }
 0x25d   : > { %v3336_v33 = vmax.f32 %v3296_v19, 0.0  ;;  %v3050_v18 = vadd.f32 %v9228_v7, %v2856_v53  ;;  %v2858_v42 = vpop.f32.mrb[173].mxu1  ;;  %v3716_v40 = vor.u32 %v3715_v28, %v3529_v59  ;;  %4186 = vmatprep.mubr.bf16.mxu0 %v9213_v17  ;;  %v3092_v30 = vpop.f32.mrb[159].mxu0  ;;  %v3534_v54 = vor.u32 %v3532_v9, %v3531_v0  ;;  %v3131_v7 = vld [vmem:[#allocation3 + $0xd8] sm:$0xff]  ;;  %v3132_v0 = vld [vmem:[#allocation3 + $0xe0] sm:$0xff]  ;;  %v3133_v32 = vld [vmem:[#allocation3 + $0xe8] sm:$0xff] }
 0x25e   : > { %v2859_v20 = vpop.f32.mrb[174].mxu1 }
 0x25f   : > { %v9312_v16 = vpack.c.bf16 %v3336_v33, %v3335_v4  ;;  %v3170_v41 = vadd.f32 %v3130_v36, %v3050_v18  ;;  %v3053_v58 = vadd.f32 %v9233_v45, %v2859_v20  ;;  %v2861_v12 = vpop.f32.mrb[175].mxu1  ;;  %v9317_v31 = vsel %vm9117_vm6, %v3716_v40, %v3787_v46  ;;  %v3793_v36 = vld [vmem:[#allocation2 + $0x160] sm:$0xff] }
 0x260   : > { %3789 = vst [vmem:[#allocation2 + $0x130] sm:$0xff] %v9317_v31  ;;  %7309 = vmatprep.mubr.bf16.mxu1 %v9317_v31  ;;  %v9323_v17 = vsel %vm9127_vm7, %v3534_v54, %v3646_v61 }
 0x261   : > { %v3536_v24 = vshrl.u32 %v9312_v16, 16  ;;  %v3539_v48 = vshll.u32 %v9312_v16, 16  ;;  %3685 = vst [vmem:[#allocation2 + $0x140] sm:$0xff] %v9312_v16  ;;  %v3297_v45 = vadd.f32 %v9089_v26, %v3170_v41  ;;  %v3171_v60 = vadd.f32 %v3131_v7, %v3053_v58  ;;  %3648 = vst [vmem:[#allocation2 + $0x120] sm:$0xff] %v9323_v17 }
 0x263   : > { %v3538_v43 = vrot.slane %v3536_v24, 7  ;;  %v3717_v21 = vrot.slane %v3539_v48, 1  ;;  %v3298_v15 = vadd.f32 %v9089_v26, %v3171_v60  ;;  %v3337_v13 = vmax.f32 %v3297_v45, 0.0  ;;  %v3134_v60 = vld [vmem:[#allocation3 + $0xf0] sm:$0xff] }
 0x264   : > { %v2864_v47 = vpop.f32.mrb[176].mxu1  ;;  %4187 = vmatmul.mubr.bf16.gmra.mrb[196].mxu0 %v9245_v5  ;;  %v4116_v20 = vpop.f32.mrb[160].mxu0 }
 0x265   : > { %v3338_v23 = vmax.f32 %v3298_v15, 0.0  ;;  %v3058_v59 = vadd.f32 %v9255_v10, %v2864_v47  ;;  %v2866_v9 = vpop.f32.mrb[177].mxu1  ;;  %v3718_v14 = vor.u32 %v3717_v21, %v3536_v24  ;;  %4194 = vmatprep.mubr.bf16.mxu0 %v9239_v52  ;;  %v3541_v37 = vor.u32 %v3539_v48, %v3538_v43  ;;  %v3652_v48 = vld [vmem:[#allocation2 + $0x150] sm:$0xff]  ;;  %v4118_v45 = vpop.f32.mrb[161].mxu0 }
 0x266   : > { %v2867_v28 = vpop.f32.mrb[178].mxu1  ;;  %v4119_v21 = vpop.f32.mrb[162].mxu0 }
 0x267   : > { %v9334_v19 = vpack.c.bf16 %v3338_v23, %v3337_v13  ;;  %v3172_v39 = vadd.f32 %v3132_v0, %v3058_v59  ;;  %v3061_v4 = vadd.f32 %v9261_v55, %v2867_v28  ;;  %v2869_v53 = vpop.f32.mrb[179].mxu1  ;;  %v9339_v46 = vsel %vm9117_vm6, %v3718_v14, %v3790_v51  ;;  %v3135_v59 = vld [vmem:[#allocation3 + $0xf8] sm:$0xff] }
 0x268   : > { %3792 = vst [vmem:[#allocation2 + $0x148] sm:$0xff] %v9339_v46  ;;  %7310 = vmatmul.mubr.bf16.gmra.mrb[224].mxu1 %v9339_v46  ;;  %v9345_v52 = vsel %vm9127_vm7, %v3541_v37, %v3649_v27  ;;  %v3796_v53 = vld [vmem:[#allocation2 + $0x178] sm:$0xff] }
 0x269   : > { %v3543_v10 = vshrl.u32 %v9334_v19, 16  ;;  %v3546_v33 = vshll.u32 %v9334_v19, 16  ;;  %3686 = vst [vmem:[#allocation2 + $0x158] sm:$0xff] %v9334_v19  ;;  %v3299_v55 = vadd.f32 %v9089_v26, %v3172_v39  ;;  %v3173_v18 = vadd.f32 %v3133_v32, %v3061_v4  ;;  %3651 = vst [vmem:[#allocation2 + $0x138] sm:$0xff] %v9345_v52 }
 0x26b   : > { %v3545_v42 = vrot.slane %v3543_v10, 7  ;;  %v3719_v40 = vrot.slane %v3546_v33, 1  ;;  %v3300_v30 = vadd.f32 %v9089_v26, %v3173_v18  ;;  %v3339_v54 = vmax.f32 %v3299_v55, 0.0 }
 0x26c   : > { %v2872_v61 = vpop.f32.mrb[180].mxu1  ;;  %4195 = vmatmul.mubr.bf16.gmra.mrb[200].mxu0 %v9271_v38 }
 0x26d   : > { %v3340_v41 = vmax.f32 %v3300_v30, 0.0  ;;  %v3066_v58 = vadd.f32 %v9252_v56, %v2872_v61  ;;  %v2874_v12 = vpop.f32.mrb[181].mxu1  ;;  %v3720_v7 = vor.u32 %v3719_v40, %v3543_v10  ;;  %4202 = vmatprep.mubr.bf16.mxu0 %v9264_v2  ;;  %v3548_v24 = vor.u32 %v3546_v33, %v3545_v42  ;;  %v4121_v56 = vpop.f32.mrb[163].mxu0  ;;  %v3655_v40 = vld [vmem:[#allocation2 + $0x168] sm:$0xff] }
 0x26e   : > { %v2875_v43 = vpop.f32.mrb[182].mxu1  ;;  %v4124_v32 = vpop.f32.mrb[164].mxu0  ;;  %v3799_v56 = vld [vmem:[#allocation2 + $0x190] sm:$0xff] }
 0x26f   : > { %v9356_v15 = vpack.c.bf16 %v3340_v41, %v3339_v54  ;;  %v3174_v13 = vadd.f32 %v3134_v60, %v3066_v58  ;;  %v3069_v47 = vadd.f32 %v9257_v22, %v2875_v43  ;;  %v2877_v51 = vpop.f32.mrb[183].mxu1  ;;  %v9361_v23 = vsel %vm9117_vm6, %v3720_v7, %v3793_v36  ;;  %v4126_v30 = vpop.f32.mrb[165].mxu0  ;;  %v3136_v54 = vld [vmem:[#allocation3 + $0x100] sm:$0xff] }
 0x270   : > { %3795 = vst [vmem:[#allocation2 + $0x160] sm:$0xff] %v9361_v23  ;;  %7313 = vmatprep.mubr.bf16.mxu1 %v9361_v23  ;;  %v9367_v2 = vsel %vm9127_vm7, %v3548_v24, %v3652_v48  ;;  %v4127_v36 = vpop.f32.mrb[166].mxu0  ;;  %v3137_v24 = vld [vmem:[#allocation3 + $0x108] sm:$0xff] }
 0x271   : > { %v3550_v9 = vshrl.u32 %v9356_v15, 16  ;;  %v3553_v14 = vshll.u32 %v9356_v15, 16  ;;  %3687 = vst [vmem:[#allocation2 + $0x170] sm:$0xff] %v9356_v15  ;;  %v3301_v22 = vadd.f32 %v9089_v26, %v3174_v13  ;;  %v3175_v37 = vadd.f32 %v3135_v59, %v3069_v47  ;;  %3654 = vst [vmem:[#allocation2 + $0x150] sm:$0xff] %v9367_v2 }
 0x273   : > { %v3552_v27 = vrot.slane %v3550_v9, 7  ;;  %v3721_v0 = vrot.slane %v3553_v14, 1  ;;  %v3302_v28 = vadd.f32 %v9089_v26, %v3175_v37  ;;  %v3341_v39 = vmax.f32 %v3301_v22, 0.0 }
 0x274   : > { %v2880_v4 = vpop.f32.mrb[184].mxu1  ;;  %4203 = vmatmul.mubr.bf16.gmra.mrb[204].mxu0 %v9301_v50 }
 0x275   : > { %v3342_v10 = vmax.f32 %v3302_v28, 0.0  ;;  %v3074_v33 = vadd.f32 %v9281_v1, %v2880_v4  ;;  %v2882_v55 = vpop.f32.mrb[185].mxu1  ;;  %v3722_v18 = vor.u32 %v3721_v0, %v3550_v9  ;;  %4210 = vmatprep.mubr.bf16.mxu0 %v9290_v6  ;;  %v3555_v42 = vor.u32 %v3553_v14, %v3552_v27  ;;  %v4129_v1 = vpop.f32.mrb[167].mxu0  ;;  %v3658_v0 = vld [vmem:[#allocation2 + $0x180] sm:$0xff] }
 0x276   : > { %v2883_v61 = vpop.f32.mrb[186].mxu1  ;;  %v9398_v59 = vpop.f32.mrb[168].mxu0  ;;  %v3661_v1 = vld [vmem:[#allocation2 + $0x198] sm:$0xff] }
 0x277   : > { %v9378_v20 = vpack.c.bf16 %v3342_v10, %v3341_v39  ;;  %v3176_v41 = vadd.f32 %v3136_v54, %v3074_v33  ;;  %v3077_v58 = vadd.f32 %v9288_v62, %v2883_v61  ;;  %v2885_v12 = vpop.f32.mrb[187].mxu1  ;;  %v9383_v7 = vsel %vm9117_vm6, %v3722_v18, %v3796_v53  ;;  %v4134_v28 = vpop.f32.mrb[169].mxu0  ;;  %v3138_v39 = vld [vmem:[#allocation3 + $0x110] sm:$0xff] }
 0x278   : > { %3798 = vst [vmem:[#allocation2 + $0x178] sm:$0xff] %v9383_v7  ;;  %7314 = vmatmul.mubr.bf16.gmra.mrb[228].mxu1 %v9383_v7  ;;  %v9389_v6 = vsel %vm9127_vm7, %v3555_v42, %v3655_v40  ;;  %v9402_v53 = vpop.f32.mrb[170].mxu0  ;;  %v3139_v42 = vld [vmem:[#allocation3 + $0x118] sm:$0xff] }
 0x279   : > { %v3557_v48 = vshrl.u32 %v9378_v20, 16  ;;  %v3560_v45 = vshll.u32 %v9378_v20, 16  ;;  %3688 = vst [vmem:[#allocation2 + $0x188] sm:$0xff] %v9378_v20  ;;  %v3303_v62 = vadd.f32 %v9089_v26, %v3176_v41  ;;  %v3177_v60 = vadd.f32 %v3137_v24, %v3077_v58  ;;  %3657 = vst [vmem:[#allocation2 + $0x168] sm:$0xff] %v9389_v6  ;;  %v4137_v18 = vpop.f32.mrb[171].mxu0  ;;  %v3802_v12 = vld [vmem:[#allocation2 + $0x1a8] sm:$0xff] }
 0x27b   : > { %v3559_v43 = vrot.slane %v3557_v48, 7  ;;  %v3723_v21 = vrot.slane %v3560_v45, 1  ;;  %v3304_v13 = vadd.f32 %v9089_v26, %v3177_v60  ;;  %v3343_v47 = vmax.f32 %v3303_v62, 0.0 }
 0x27c   : > { %v2888_v51 = vpop.f32.mrb[188].mxu1  ;;  %4211 = vmatmul.mubr.bf16.gmra.mrb[208].mxu0 %v9323_v17 }
 0x27d   : > { %v3344_v9 = vmax.f32 %v3304_v13, 0.0  ;;  %v3082_v14 = vadd.f32 %v9278_v57, %v2888_v51  ;;  %v2890_v22 = vpop.f32.mrb[189].mxu1  ;;  %v3724_v37 = vor.u32 %v3723_v21, %v3557_v48  ;;  %4218 = vmatprep.mubr.bf16.mxu0 %v9312_v16  ;;  %v3562_v27 = vor.u32 %v3560_v45, %v3559_v43 }
 0x27e   : > { %v2891_v4 = vpop.f32.mrb[190].mxu1  ;;  %v3805_v22 = vld [vmem:[#allocation2 + $0x1c0] sm:$0xff] }
 0x27f   : > { %v9404_v32 = vpack.c.bf16 %v3344_v9, %v3343_v47  ;;  %v3178_v10 = vadd.f32 %v3138_v39, %v3082_v14  ;;  %v3085_v33 = vadd.f32 %v9284_v49, %v2891_v4  ;;  %v2893_v55 = vpop.f32.mrb[191].mxu1  ;;  %v9409_v57 = vsel %vm9117_vm6, %v3724_v37, %v3799_v56  ;;  %v3664_v37 = vld [vmem:[#allocation2 + $0x1b0] sm:$0xff] }
 0x280   : > { %3801 = vst [vmem:[#allocation2 + $0x190] sm:$0xff] %v9409_v57  ;;  %7317 = vmatprep.mubr.bf16.mxu1 %v9409_v57  ;;  %v9415_v16 = vsel %vm9127_vm7, %v3562_v27, %v3658_v0  ;;  %v7586_v55 = vld [vmem:[%s10097_s5 + $0x208] sm:$0xff]  }
 0x281   : > { %v3564_v40 = vshrl.u32 %v9404_v32, 16  ;;  %v3567_v30 = vshll.u32 %v9404_v32, 16  ;;  %3689 = vst [vmem:[#allocation2 + $0x1a0] sm:$0xff] %v9404_v32  ;;  %v3305_v49 = vadd.f32 %v9089_v26, %v3178_v10  ;;  %v3179_v54 = vadd.f32 %v3139_v42, %v3085_v33  ;;  %3660 = vst [vmem:[#allocation2 + $0x180] sm:$0xff] %v9415_v16  ;;  %v7591_v42 = vld [vmem:[%s10097_s5 + $0x210] sm:$0xff]  }
 0x283   : > { %v3566_v61 = vrot.slane %v3564_v40, 7  ;;  %v3725_v36 = vrot.slane %v3567_v30, 1  ;;  %v3306_v41 = vadd.f32 %v9089_v26, %v3179_v54  ;;  %v3345_v24 = vmax.f32 %v3305_v49, 0.0  ;;  %v9481_v49 = vld [vmem:[#allocation2 + $0x68] sm:$0xff]  ;;  %v9486_v54 = vld [vmem:[#allocation2 + $0x60] sm:$0xff] }
 0x284   : > { %v2896_v58 = vpop.f32.mrb[192].mxu1  ;;  %4219 = vmatmul.mubr.bf16.gmra.mrb[212].mxu0 %v9345_v52 }
 0x285   : > { %v3346_v48 = vmax.f32 %v3306_v41, 0.0  ;;  %v2898_v45 = vpop.f32.mrb[193].mxu1  ;;  %v3726_v62 = vor.u32 %v3725_v36, %v3564_v40  ;;  %4226 = vmatprep.mubr.bf16.mxu0 %v9334_v19  ;;  %v3569_v60 = vor.u32 %v3567_v30, %v3566_v61  ;;  %v9468_v40 = vld [vmem:[#allocation2 + $0x50] sm:$0xff]  ;;  %v9478_v30 = vld [vmem:[#allocation2 + $0x48] sm:$0xff]  ;;  %v9492_v36 = vld [vmem:[#allocation2 + $0x80] sm:$0xff] }
 0x286   : > { %v2899_v43 = vpop.f32.mrb[194].mxu1  ;;  %v7604_v61 = vld [vmem:[%s10097_s5 + $0x230] sm:$0xff]   ;;  %v9495_v41 = vld [vmem:[#allocation2] sm:$0xff]  ;;  %v9503_v58 = vld [vmem:[#allocation2 + $0x98] sm:$0xff] }
 0x287   : > { %v3448_v21 = vpack.c.bf16 %v3346_v48, %v3345_v24  ;;  %v2901_v13 = vpop.f32.mrb[195].mxu1  ;;  %v9427_v47 = vsel %vm9117_vm6, %v3726_v62, %v3802_v12  ;;  %v9431_v26 = vsel %vm9127_vm7, %v3569_v60, %v3661_v1  ;;  %v7583_v12 = vld [vmem:[%s10097_s5 + $0x180] sm:$0xff]   ;;  %v9510_v1 = vld [vmem:[#allocation2 + $0x58] sm:$0xff]  ;;  %v9518_v24 = vld [vmem:[#allocation2 + $0xb0] sm:$0xff] }
 0x288   : > { %3804 = vst [vmem:[#allocation2 + $0x1a8] sm:$0xff] %v9427_v47  ;;  %7318 = vmatmul.mubr.bf16.gmra.mrb[232].mxu1 %v9427_v47  ;;  %3663 = vst [vmem:[#allocation2 + $0x198] sm:$0xff] %v9431_v26  ;;  %v7585_v48 = vld [vmem:[%s10097_s5 + $0x190] sm:$0xff]   ;;  %v9528_v62 = vld [vmem:[#allocation2 + $0x88] sm:$0xff] }
 0x289   : > { %v3571_v51 = vshrl.u32 %v3448_v21, 16  ;;  %v3574_v19 = vshll.u32 %v3448_v21, 16  ;;  %3690 = vst [vmem:[#allocation2 + $0x1b8] sm:$0xff] %v3448_v21  ;;  %v9525_v45 = vld [vmem:[#allocation2 + $0x70] sm:$0xff]  ;;  %v9536_v60 = vld [vmem:[#allocation2 + $0xc8] sm:$0xff]  ;;  %v7588_v43 = vld [vmem:[%s10097_s5 + $0x1a0] sm:$0xff]  }
 0x28a   : > { %v9546_v13 = vld [vmem:[#allocation2 + $0xb8] sm:$0xff] }
 0x28b   : > { %v3573_v56 = vrot.slane %v3571_v51, 7  ;;  %v3727_v9 = vrot.slane %v3574_v19, 1 }
 0x28c   : > { %v2904_v14 = vpop.f32.mrb[196].mxu1  ;;  %4227 = vmatmul.mubr.bf16.gmra.mrb[216].mxu0 %v9367_v2 }
 0x28d   : > { %v2906_v27 = vpop.f32.mrb[197].mxu1  ;;  %v3728_v0 = vor.u32 %v3727_v9, %v3571_v51  ;;  %4234 = vmatprep.mubr.bf16.mxu0 %v9356_v15  ;;  %v3576_v28 = vor.u32 %v3574_v19, %v3573_v56  ;;  %v9554_v51 = vld [vmem:[#allocation2 + $0xe0] sm:$0xff]  ;;  %v7590_v19 = vld [vmem:[%s10097_s5 + $0x1b0] sm:$0xff]   ;;  %v9564_v9 = vld [vmem:[#allocation2 + $0xe8] sm:$0xff] }
 0x28e   : > { %v2907_v39 = vpop.f32.mrb[198].mxu1  ;;  %v9561_v56 = vld [vmem:[#allocation2 + $0xd0] sm:$0xff]  ;;  %v9572_v14 = vld [vmem:[#allocation2 + $0xf8] sm:$0xff] }
 0x28f   : > { %v9440_v4 = vsel %vm9117_vm6, %v3728_v0, %v3805_v22  ;;  %v9444_v10 = vsel %vm9127_vm7, %v3576_v28, %v3664_v37  ;;  %v2909_v33 = vpop.f32.mrb[199].mxu1  ;;  %v7593_v22 = vld [vmem:[%s10097_s5 + $0x1c0] sm:$0xff]   ;;  %v9588_v27 = vld [vmem:[#allocation2 + $0x110] sm:$0xff] }
 0x290   : > { %3807 = vst [vmem:[#allocation2 + $0x1c0] sm:$0xff] %v9440_v4  ;;  %7321 = vmatprep.mubr.bf16.mxu1 %v9440_v4  ;;  %3666 = vst [vmem:[#allocation2 + $0x1b0] sm:$0xff] %v9444_v10  ;;  %v9579_v37 = vld [vmem:[#allocation2 + $0x100] sm:$0xff]  ;;  %v7595_v0 = vld [vmem:[%s10097_s5 + $0x1d0] sm:$0xff]  }
 0x291   : > { %7322 = vmatmul.mubr.bf16.gmra.mrb[236].mxu1 %v9122_v8  ;;  %v7598_v28 = vld [vmem:[%s10097_s5 + $0x1e0] sm:$0xff]  }
 0x292   : > { %4793 = vmatprep.mubr.bf16.mxu1 %v9122_v8 }
 0x294   : > { %4235 = vmatmul.mubr.bf16.gmra.mrb[220].mxu0 %v9389_v6  ;;  %v7287_v3 = vpop.f32.mrb[200].mxu1 }
 0x295   : > { %4242 = vmatprep.mubr.bf16.mxu0 %v9378_v20  ;;  %v4309_v15 = vpop.f32.mrb[201].mxu1  ;;  %v7596_v20 = vld [vmem:[%s10097_s5 + $0x218] sm:$0xff]  }
 0x296   : > { %v7288_v25 = vpop.f32.mrb[202].mxu1 }
 0x297   : > { %v4312_v18 = vpop.f32.mrb[203].mxu1 }
 0x299   : > { %4794 = vmatmul.mubr.bf16.vlgmr.msra.gmra.mrb[240].mxu1 %v9122_v8 }
 0x29a   : > { %4801 = vmatprep.mubr.bf16.mxu1 %v9122_v8  ;;  %7382 = vmatpush3.bf16.msra.mxu1 %v9168_v29  ;;  %v7601_v29 = vld [vmem:[%s10097_s5 + $0x220] sm:$0xff]  }
 0x29b   : > { %7383 = vmatprep.subr.bf16.mxu1 %v7586_v55 }
 0x29c   : > { %4243 = vmatmul.mubr.bf16.gmra.mrb[224].mxu0 %v9415_v16 }
 0x29d   : > { %4250 = vmatprep.mubr.bf16.mxu0 %v9404_v32  ;;  %v7603_v32 = vld [vmem:[%s10097_s5 + $0x228] sm:$0xff]  }
 0x29e   : > { %7384 = vmatpush3.bf16.msra.mxu1 %v7586_v55  ;;  %v9650_v55 = vld [vmem:[#allocation2 + $0x188] sm:$0xff] }
 0x29f   : > { %7385 = vmatprep.subr.bf16.mxu1 %v7591_v42 }
 0x2a1   : > { %4802 = vmatmul.mubr.bf16.gmra.mrb[244].mxu1 %v9122_v8 }
 0x2a2   : > { %4809 = vmatprep.mubr.bf16.mxu1 %v9468_v40  ;;  %7386 = vmatpush3.bf16.msra.mxu1 %v7591_v42 }
 0x2a3   : > { %7387 = vmatprep.subr.bf16.mxu1 %v7596_v20 }
 0x2a4   : > { %4251 = vmatmul.mubr.bf16.gmra.mrb[228].mxu0 %v9431_v26 }
 0x2a5   : > { %4258 = vmatprep.mubr.bf16.mxu0 %v3448_v21  ;;  %v9543_v21 = vld [vmem:[#allocation2 + $0xa0] sm:$0xff] }
 0x2a6   : > { %7388 = vmatpush3.bf16.msra.mxu1 %v7596_v20 }
 0x2a7   : > { %7389 = vmatprep.subr.bf16.mxu1 %v7601_v29 }
 0x2a9   : > { %4810 = vmatmul.mubr.bf16.gmra.mrb[248].mxu1 %v9478_v30 }
 0x2aa   : > { %4817 = vmatprep.mubr.bf16.mxu1 %v9481_v49  ;;  %7390 = vmatpush3.bf16.msra.mxu1 %v7601_v29 }
 0x2ab   : > { %7391 = vmatprep.subr.bf16.mxu1 %v7603_v32 }
 0x2ac   : > { %4259 = vmatmul.mubr.bf16.gmra.mrb[232].mxu0 %v9444_v10 }
 0x2ad   : > { %4266 = vmatprep.mubr.bf16.mxu0 %v9122_v8  ;;  %v7605_v8 = vld [vmem:[%s10097_s5 + $0x238] sm:$0xff]  }
 0x2ae   : > { %7392 = vmatpush3.bf16.msra.mxu1 %v7603_v32 }
 0x2af   : > { %7393 = vmatprep.subr.bf16.mxu1 %v7604_v61 }
 0x2b1   : > { %4818 = vmatmul.mubr.bf16.gmra.mrb[252].mxu1 %v9486_v54 }
 0x2b2   : > { %4825 = vmatprep.mubr.bf16.mxu1 %v9492_v36  ;;  %7394 = vmatpush3.bf16.msra.mxu1 %v7604_v61 }
 0x2b3   : > { %7395 = vmatprep.subr.bf16.mxu1 %v7605_v8 }
 0x2b4   : > { %4267 = vmatmul.mubr.bf16.gmra.mrb[236].mxu0 %v9495_v41 }
 0x2b5   : > { %7341 = vmatprep.mubr.bf16.mxu0 %v9495_v41 }
 0x2b6   : > { %7396 = vmatpush3.bf16.msra.mxu1 %v7605_v8 }
 0x2b9   : > { %4826 = vmatmul.mubr.bf16.gmra.mrb[0].mxu1 %v9179_v11  ;;  %v7584_v11 = vld [vmem:[%s10097_s5 + $0x188] sm:$0xff]  }
 0x2ba   : > { %4833 = vmatprep.mubr.bf16.mxu1 %v9503_v58 }
 0x2bc   : > { %7342 = vmatmul.mubr.bf16.vlgmr.msra.gmra.mrb[240].mxu0 %v9495_v41 }
 0x2bd   : > { %7345 = vmatprep.mubr.bf16.mxu0 %v9510_v1  ;;  %5521 = vmatpush1.bf16.msra.mxu0 %v7583_v12  ;;  %v9660_v12 = vld [vmem:[#allocation2 + $0x1a0] sm:$0xff] }
 0x2be   : > { %5522 = vmatprep.subr.bf16.mxu0 %v9495_v41 }
 0x2c1   : > { %5523 = vmatpush1.bf16.msra.mxu0 %v7584_v11  ;;  %4834 = vmatmul.mubr.bf16.gmra.mrb[4].mxu1 %v9183_v63  ;;  %v7587_v63 = vld [vmem:[%s10097_s5 + $0x198] sm:$0xff]  }
 0x2c2   : > { %4841 = vmatprep.mubr.bf16.mxu1 %v9518_v24  ;;  %5524 = vmatprep.subr.bf16.mxu0 %v9495_v41 }
 0x2c4   : > { %7346 = vmatmul.mubr.bf16.gmra.mrb[244].mxu0 %v9525_v45 }
 0x2c5   : > { %7349 = vmatprep.mubr.bf16.mxu0 %v9528_v62  ;;  %5525 = vmatpush1.bf16.msra.mxu0 %v7585_v48 }
 0x2c6   : > { %5526 = vmatprep.subr.bf16.mxu0 %v9495_v41 }
 0x2c9   : > { %4842 = vmatmul.mubr.bf16.gmra.mrb[8].mxu1 %v9211_v35  ;;  %5527 = vmatpush1.bf16.msra.mxu0 %v7587_v63  ;;  %v7589_v35 = vld [vmem:[%s10097_s5 + $0x1a8] sm:$0xff]  }
 0x2ca   : > { %4849 = vmatprep.mubr.bf16.mxu1 %v9536_v60  ;;  %5528 = vmatprep.subr.bf16.mxu0 %v9495_v41 }
 0x2cc   : > { %7350 = vmatmul.mubr.bf16.gmra.mrb[248].mxu0 %v9543_v21 }
 0x2cd   : > { %7353 = vmatprep.mubr.bf16.mxu0 %v9546_v13  ;;  %5529 = vmatpush1.bf16.msra.mxu0 %v7588_v43 }
 0x2ce   : > { %5530 = vmatprep.subr.bf16.mxu0 %v9495_v41 }
 0x2d1   : > { %4850 = vmatmul.mubr.bf16.gmra.mrb[12].mxu1 %v9221_v34  ;;  %5531 = vmatpush1.bf16.msra.mxu0 %v7589_v35  ;;  %v7592_v34 = vld [vmem:[%s10097_s5 + $0x1b8] sm:$0xff]  }
 0x2d2   : > { %4857 = vmatprep.mubr.bf16.mxu1 %v9554_v51  ;;  %5532 = vmatprep.subr.bf16.mxu0 %v9495_v41 }
 0x2d4   : > { %7354 = vmatmul.mubr.bf16.gmra.mrb[252].mxu0 %v9561_v56 }
 0x2d5   : > { %7357 = vmatprep.mubr.bf16.mxu0 %v9564_v9  ;;  %5533 = vmatpush1.bf16.msra.mxu0 %v7590_v19 }
 0x2d6   : > { %5534 = vmatprep.subr.bf16.mxu0 %v9495_v41 }
 0x2d9   : > { %4858 = vmatmul.mubr.bf16.gmra.mrb[16].mxu1 %v9245_v5  ;;  %5535 = vmatpush1.bf16.msra.mxu0 %v7592_v34  ;;  %v7594_v5 = vld [vmem:[%s10097_s5 + $0x1c8] sm:$0xff]  }
 0x2da   : > { %4865 = vmatprep.mubr.bf16.mxu1 %v9572_v14  ;;  %5536 = vmatprep.subr.bf16.mxu0 %v9495_v41 }
 0x2dc   : > { %7358 = vmatmul.mubr.bf16.gmra.mrb[0].mxu0 %v9579_v37 }
 0x2dd   : > { %7361 = vmatprep.mubr.bf16.mxu0 %v9295_v44  ;;  %5537 = vmatpush1.bf16.msra.mxu0 %v7593_v22  ;;  %v9602_v44 = vld [vmem:[#allocation2 + $0x128] sm:$0xff] }
 0x2de   : > { %5538 = vmatprep.subr.bf16.mxu0 %v9495_v41 }
 0x2e1   : > { %4866 = vmatmul.mubr.bf16.gmra.mrb[20].mxu1 %v9271_v38  ;;  %5539 = vmatpush1.bf16.msra.mxu0 %v7594_v5  ;;  %v7597_v38 = vld [vmem:[%s10097_s5 + $0x1d8] sm:$0xff]  }
 0x2e2   : > { %4873 = vmatprep.mubr.bf16.mxu1 %v9588_v27  ;;  %5540 = vmatprep.subr.bf16.mxu0 %v9495_v41  ;;  %v9670_v5 = vld [vmem:[#allocation2 + $0x1b8] sm:$0xff] }
 0x2e4   : > { %7362 = vmatmul.mubr.bf16.gmra.mrb[4].mxu0 %v9317_v31  ;;  %v9616_v31 = vld [vmem:[#allocation2 + $0x140] sm:$0xff] }
 0x2e5   : > { %7365 = vmatprep.mubr.bf16.mxu0 %v9339_v46  ;;  %5541 = vmatpush1.bf16.msra.mxu0 %v7595_v0  ;;  %v7600_v46 = vld [vmem:[%s10097_s5 + $0x1f0] sm:$0xff]  }
 0x2e6   : > { %5542 = vmatprep.subr.bf16.mxu0 %v9495_v41 }
 0x2e9   : > { %4874 = vmatmul.mubr.bf16.gmra.mrb[24].mxu1 %v9301_v50  ;;  %5543 = vmatpush1.bf16.msra.mxu0 %v7597_v38  ;;  %v7599_v50 = vld [vmem:[%s10097_s5 + $0x1e8] sm:$0xff]  }
 0x2ea   : > { %4881 = vmatprep.mubr.bf16.mxu1 %v9602_v44  ;;  %5544 = vmatprep.subr.bf16.mxu0 %v9495_v41 }
 0x2ec   : > { %7366 = vmatmul.mubr.bf16.gmra.mrb[8].mxu0 %v9361_v23  ;;  %v9630_v23 = vld [vmem:[#allocation2 + $0x158] sm:$0xff] }
 0x2ed   : > { %7369 = vmatprep.mubr.bf16.mxu0 %v9383_v7  ;;  %5545 = vmatpush1.bf16.msra.mxu0 %v7598_v28  ;;  %v9636_v7 = vld [vmem:[#allocation2 + $0x170] sm:$0xff] }
 0x2ee   : > { %5546 = vmatprep.subr.bf16.mxu0 %v9495_v41 }
 0x2f1   : > { %4882 = vmatmul.mubr.bf16.gmra.mrb[28].mxu1 %v9323_v17  ;;  %5547 = vmatpush1.bf16.msra.mxu0 %v7599_v50  ;;  %v7602_v17 = vld [vmem:[%s10097_s5 + $0x1f8] sm:$0xff]  }
 0x2f2   : > { %4889 = vmatprep.mubr.bf16.mxu1 %v9616_v31  ;;  %5548 = vmatprep.subr.bf16.mxu0 %v9495_v41 }
 0x2f4   : > { %7370 = vmatmul.mubr.bf16.gmra.mrb[12].mxu0 %v9409_v57 }
 0x2f5   : > { %7373 = vmatprep.mubr.bf16.mxu0 %v9427_v47  ;;  %5549 = vmatpush1.bf16.msra.mxu0 %v7600_v46 }
 0x2f6   : > { %5550 = vmatprep.subr.bf16.mxu0 %v9495_v41 }
 0x2f9   : > { %4890 = vmatmul.mubr.bf16.gmra.mrb[32].mxu1 %v9345_v52  ;;  %5551 = vmatpush1.bf16.msra.mxu0 %v7602_v17 }
 0x2fa   : > { %4897 = vmatprep.mubr.bf16.mxu1 %v9630_v23 }
 0x2fc   : > { %7374 = vmatmul.mubr.bf16.gmra.mrb[16].mxu0 %v9440_v4 }
 0x2fd   : > { %7377 = vmatprep.mubr.bf16.mxu0 %v9495_v41 }
 0x301   : > { %4898 = vmatmul.mubr.bf16.gmra.mrb[36].mxu1 %v9367_v2 }
 0x302   : > { %v7291_v57 = vpop.f32.mrb[204].mxu1  ;;  %4905 = vmatprep.mubr.bf16.mxu1 %v9636_v7 }
 0x303   : > { %v4325_v47 = vpop.f32.mrb[205].mxu1 }
 0x304   : > { %v9640_v39 = vadd.f32 %v4325_v47, %v9398_v59  ;;  %v7292_v52 = vpop.f32.mrb[206].mxu1  ;;  %7378 = vmatmul.mubr.bf16.gmra.mrb[20].mxu0 %v9495_v41 }
 0x305   : > { %v4328_v33 = vpop.f32.mrb[207].mxu1  ;;  %5552 = vmatprep.mubr.bf16.mxu0 %v9495_v41 }
 0x306   : > { %v9645_v4 = vadd.f32 %v4328_v33, %v9402_v53  ;;  %v5276_v33 = vld [vmem:[#allocation2 + $0x78] sm:$0xff] }
 0x307   : > { %v4140_v3 = vpop.f32.mrb[172].mxu0 }
 0x308   : > { %v9647_v2 = vadd.f32 %v7291_v57, %v4140_v3  ;;  %v4142_v15 = vpop.f32.mrb[173].mxu0 }
 0x309   : > { %v4143_v25 = vpop.f32.mrb[174].mxu0  ;;  %4906 = vmatmul.mubr.bf16.gmra.mrb[40].mxu1 %v9389_v6 }
 0x30a   : > { %v7295_v59 = vpop.f32.mrb[208].mxu1  ;;  %v9652_v18 = vadd.f32 %v7292_v52, %v4143_v25  ;;  %v4145_v42 = vpop.f32.mrb[175].mxu0  ;;  %4913 = vmatprep.mubr.bf16.mxu1 %v9650_v55 }
 0x30b   : > { %v4341_v20 = vpop.f32.mrb[209].mxu1  ;;  %v5279_v42 = vld [vmem:[#allocation2 + $0x90] sm:$0xff] }
 0x30c   : > { %v7296_v29 = vpop.f32.mrb[210].mxu1  ;;  %5553 = vmatmul.mubr.bf16.vlgmr.msra.gmra.mrb[24].mxu0 %v9495_v41 }
 0x30d   : > { %v4344_v53 = vpop.f32.mrb[211].mxu1  ;;  %5560 = vmatprep.mubr.bf16.mxu0 %v9468_v40 }
 0x30f   : > { %v4148_v32 = vpop.f32.mrb[176].mxu0 }
 0x310   : > { %v9657_v61 = vadd.f32 %v4341_v20, %v4148_v32  ;;  %v4150_v8 = vpop.f32.mrb[177].mxu0 }
 0x311   : > { %v4151_v6 = vpop.f32.mrb[178].mxu0  ;;  %4914 = vmatmul.mubr.bf16.gmra.mrb[44].mxu1 %v9415_v16 }
 0x312   : > { %v7299_v11 = vpop.f32.mrb[212].mxu1  ;;  %v9662_v48 = vadd.f32 %v4344_v53, %v4151_v6  ;;  %v4153_v63 = vpop.f32.mrb[179].mxu0  ;;  %4921 = vmatprep.mubr.bf16.mxu1 %v9660_v12 }
 0x313   : > { %v4357_v43 = vpop.f32.mrb[213].mxu1 }
 0x314   : > { %v7300_v35 = vpop.f32.mrb[214].mxu1  ;;  %5561 = vmatmul.mubr.bf16.gmra.mrb[28].mxu0 %v9478_v30 }
 0x315   : > { %v4360_v40 = vpop.f32.mrb[215].mxu1  ;;  %5568 = vmatprep.mubr.bf16.mxu0 %v9481_v49 }
 0x317   : > { %v4156_v19 = vpop.f32.mrb[180].mxu0 }
 0x318   : > { %v9667_v34 = vadd.f32 %v7295_v59, %v4156_v19  ;;  %v4158_v22 = vpop.f32.mrb[181].mxu0 }
 0x319   : > { %v4159_v16 = vpop.f32.mrb[182].mxu0  ;;  %4922 = vmatmul.mubr.bf16.gmra.mrb[48].mxu1 %v9431_v26 }
 0x31a   : > { %v9672_v0 = vadd.f32 %v7296_v29, %v4159_v16  ;;  %v4161_v38 = vpop.f32.mrb[183].mxu0  ;;  %4929 = vmatprep.mubr.bf16.mxu1 %v9670_v5 }
 0x31b   : > { %v7303_v28 = vpop.f32.mrb[216].mxu1 }
 0x31c   : > { %v4373_v50 = vpop.f32.mrb[217].mxu1  ;;  %5569 = vmatmul.mubr.bf16.gmra.mrb[32].mxu0 %v9486_v54 }
 0x31d   : > { %v7304_v30 = vpop.f32.mrb[218].mxu1  ;;  %5576 = vmatprep.mubr.bf16.mxu0 %v9492_v36 }
 0x31e   : > { %v4376_v49 = vpop.f32.mrb[219].mxu1 }
 0x31f   : > { %v4164_v46 = vpop.f32.mrb[184].mxu0 }
 0x320   : > { %v9677_v17 = vadd.f32 %v4357_v43, %v4164_v46  ;;  %v4166_v57 = vpop.f32.mrb[185].mxu0  ;;  %v5282_v43 = vld [vmem:[#allocation2 + $0xa8] sm:$0xff] }
 0x321   : > { %v4167_v26 = vpop.f32.mrb[186].mxu0  ;;  %4930 = vmatmul.mubr.bf16.gmra.mrb[52].mxu1 %v9444_v10 }
 0x322   : > { %v9680_v47 = vadd.f32 %v4360_v40, %v4167_v26  ;;  %v4169_v52 = vpop.f32.mrb[187].mxu0  ;;  %4937 = vmatprep.mubr.bf16.mxu1 %v9495_v41 }
 0x324   : > { %5577 = vmatmul.mubr.bf16.gmra.mrb[36].mxu0 %v5276_v33 }
 0x325   : > { %5584 = vmatprep.mubr.bf16.mxu0 %v9503_v58 }
 0x327   : > { %v4172_v54 = vpop.f32.mrb[188].mxu0 }
 0x328   : > { %v9684_v3 = vadd.f32 %v7299_v11, %v4172_v54  ;;  %v4174_v36 = vpop.f32.mrb[189].mxu0 }
 0x329   : > { %v4175_v15 = vpop.f32.mrb[190].mxu0  ;;  %4938 = vmatmul.mubr.bf16.gmra.mrb[56].mxu1 %v9495_v41 }
 0x32a   : > { %v9687_v25 = vadd.f32 %v7300_v35, %v4175_v15  ;;  %v4177_v59 = vpop.f32.mrb[191].mxu0  ;;  %4945 = vmatprep.mubr.bf16.mxu1 %v9495_v41 }
 0x32b   : > { %v7307_v10 = vpop.f32.mrb[220].mxu1 }
 0x32c   : > { %v4389_v20 = vpop.f32.mrb[221].mxu1  ;;  %5585 = vmatmul.mubr.bf16.gmra.mrb[40].mxu0 %v5279_v42  ;;  %v5291_v42 = vld [vmem:[#allocation2 + $0xf0] sm:$0xff] }
 0x32d   : > { %v7308_v29 = vpop.f32.mrb[222].mxu1  ;;  %5592 = vmatprep.mubr.bf16.mxu0 %v9518_v24 }
 0x32e   : > { %v4392_v58 = vpop.f32.mrb[223].mxu1 }
 0x32f   : > { %v4180_v53 = vpop.f32.mrb[192].mxu0 }
 0x330   : > { %v9691_v32 = vadd.f32 %v4373_v50, %v4180_v53  ;;  %v4182_v8 = vpop.f32.mrb[193].mxu0  ;;  %v5285_v50 = vld [vmem:[#allocation2 + $0xc0] sm:$0xff] }
 0x331   : > { %v4183_v6 = vpop.f32.mrb[194].mxu0  ;;  %4946 = vmatmul.mubr.bf16.gmra.mrb[60].mxu1 %v9495_v41 }
 0x332   : > { %v9694_v11 = vadd.f32 %v4376_v49, %v4183_v6  ;;  %v4185_v63 = vpop.f32.mrb[195].mxu0  ;;  %7397 = vmatprep.mubr.bf16.mxu1 %v9495_v41 }
 0x334   : > { %5593 = vmatmul.mubr.bf16.gmra.mrb[44].mxu0 %v5282_v43  ;;  %v5296_v43 = vld [vmem:[#allocation2 + $0x118] sm:$0xff] }
 0x335   : > { %5600 = vmatprep.mubr.bf16.mxu0 %v9536_v60 }
 0x337   : > { %v4188_v35 = vpop.f32.mrb[196].mxu0 }
 0x338   : > { %v9698_v40 = vadd.f32 %v7303_v28, %v4188_v35  ;;  %v4190_v24 = vpop.f32.mrb[197].mxu0 }
 0x339   : > { %v4191_v19 = vpop.f32.mrb[198].mxu0  ;;  %7398 = vmatmul.mubr.bf16.vlgmr.msra.gmra.mrb[64].mxu1 %v9510_v1  ;;  %v5299_v24 = vld [vmem:[#allocation2 + $0x130] sm:$0xff] }
 0x33a   : > { %v9701_v22 = vadd.f32 %v7304_v30, %v4191_v19  ;;  %v4193_v16 = vpop.f32.mrb[199].mxu0  ;;  %7401 = vmatprep.mubr.bf16.mxu1 %v9525_v45  ;;  %v5288_v45 = vld [vmem:[#allocation2 + $0xd8] sm:$0xff] }
 0x33b   : > { %v7311_v38 = vpop.f32.mrb[224].mxu1 }
 0x33c   : > { %v4405_v49 = vpop.f32.mrb[225].mxu1  ;;  %5601 = vmatmul.mubr.bf16.gmra.mrb[48].mxu0 %v5285_v50  ;;  %v5297_v50 = vld [vmem:[#allocation2 + $0x120] sm:$0xff] }
 0x33d   : > { %v7312_v46 = vpop.f32.mrb[226].mxu1  ;;  %5608 = vmatprep.mubr.bf16.mxu0 %v9554_v51 }
 0x33e   : > { %v4408_v60 = vpop.f32.mrb[227].mxu1 }
 0x33f   : > { %v4196_v57 = vpop.f32.mrb[200].mxu0 }
 0x340   : > { %v9705_v28 = vadd.f32 %v4389_v20, %v4196_v57  ;;  %v4198_v26 = vpop.f32.mrb[201].mxu0 }
 0x341   : > { %v4199_v52 = vpop.f32.mrb[202].mxu0  ;;  %7402 = vmatmul.mubr.bf16.gmra.mrb[68].mxu1 %v9528_v62  ;;  %v5302_v26 = vld [vmem:[#allocation2 + $0x148] sm:$0xff] }
 0x342   : > { %v9708_v1 = vadd.f32 %v4392_v58, %v4199_v52  ;;  %v4201_v30 = vpop.f32.mrb[203].mxu0  ;;  %7405 = vmatprep.mubr.bf16.mxu1 %v9543_v21 }
 0x343   : > { %v5305_v30 = vld [vmem:[#allocation2 + $0x160] sm:$0xff] }
 0x344   : > { %5609 = vmatmul.mubr.bf16.gmra.mrb[52].mxu0 %v5288_v45 }
 0x345   : > { %5616 = vmatprep.mubr.bf16.mxu0 %v9572_v14 }
 0x347   : > { %v4204_v33 = vpop.f32.mrb[204].mxu0 }
 0x348   : > { %v9712_v54 = vadd.f32 %v7307_v10, %v4204_v33  ;;  %v4206_v51 = vpop.f32.mrb[205].mxu0  ;;  %v5300_v33 = vld [vmem:[#allocation2 + $0x138] sm:$0xff] }
 0x349   : > { %v4207_v36 = vpop.f32.mrb[206].mxu0  ;;  %7406 = vmatmul.mubr.bf16.gmra.mrb[72].mxu1 %v9546_v13 }
 0x34a   : > { %v9715_v15 = vadd.f32 %v7308_v29, %v4207_v36  ;;  %v4209_v59 = vpop.f32.mrb[207].mxu0  ;;  %7409 = vmatprep.mubr.bf16.mxu1 %v9561_v56  ;;  %v5294_v56 = vld [vmem:[#allocation2 + $0x108] sm:$0xff] }
 0x34b   : > { %v7315_v62 = vpop.f32.mrb[228].mxu1 }
 0x34c   : > { %v4421_v20 = vpop.f32.mrb[229].mxu1  ;;  %5617 = vmatmul.mubr.bf16.gmra.mrb[56].mxu0 %v5291_v42 }
 0x34d   : > { %v7316_v21 = vpop.f32.mrb[230].mxu1  ;;  %5624 = vmatprep.mubr.bf16.mxu0 %v9588_v27 }
 0x34e   : > { %v4424_v14 = vpop.f32.mrb[231].mxu1 }
 0x34f   : > { %v4212_v58 = vpop.f32.mrb[208].mxu0 }
 0x350   : > { %v9719_v10 = vadd.f32 %v4405_v49, %v4212_v58  ;;  %v4214_v53 = vpop.f32.mrb[209].mxu0 }
 0x351   : > { %v4215_v8 = vpop.f32.mrb[210].mxu0  ;;  %7410 = vmatmul.mubr.bf16.gmra.mrb[76].mxu1 %v9564_v9  ;;  %v5308_v53 = vld [vmem:[#allocation2 + $0x178] sm:$0xff] }
 0x352   : > { %v9722_v13 = vadd.f32 %v4408_v60, %v4215_v8  ;;  %v4217_v29 = vpop.f32.mrb[211].mxu0  ;;  %7413 = vmatprep.mubr.bf16.mxu1 %v9579_v37 }
 0x354   : > { %5625 = vmatmul.mubr.bf16.gmra.mrb[60].mxu0 %v5294_v56 }
 0x355   : > { %5632 = vmatprep.mubr.bf16.mxu0 %v9602_v44 }
 0x357   : > { %v4220_v6 = vpop.f32.mrb[212].mxu0 }
 0x358   : > { %v9726_v63 = vadd.f32 %v7311_v38, %v4220_v6  ;;  %v4222_v27 = vpop.f32.mrb[213].mxu0  ;;  %v5303_v6 = vld [vmem:[#allocation2 + $0x150] sm:$0xff] }
 0x359   : > { %v4223_v35 = vpop.f32.mrb[214].mxu0  ;;  %7414 = vmatmul.mubr.bf16.gmra.mrb[80].mxu1 %v5296_v43 }
 0x35a   : > { %v9728_v19 = vadd.f32 %v7312_v46, %v4223_v35  ;;  %v4225_v9 = vpop.f32.mrb[215].mxu0  ;;  %7417 = vmatprep.mubr.bf16.mxu1 %v5299_v24 }
 0x35b   : > { %v7319_v16 = vpop.f32.mrb[232].mxu1 }
 0x35c   : > { %v4437_v49 = vpop.f32.mrb[233].mxu1  ;;  %5633 = vmatmul.mubr.bf16.gmra.mrb[64].mxu0 %v5297_v50  ;;  %v5314_v50 = vld [vmem:[#allocation2 + $0x1a8] sm:$0xff] }
 0x35d   : > { %v7320_v37 = vpop.f32.mrb[234].mxu1  ;;  %5640 = vmatprep.mubr.bf16.mxu0 %v9616_v31 }
 0x35e   : > { %v4440_v44 = vpop.f32.mrb[235].mxu1 }
 0x35f   : > { %v4228_v60 = vpop.f32.mrb[216].mxu0 }
 0x360   : > { %v9731_v38 = vadd.f32 %v4421_v20, %v4228_v60  ;;  %v4230_v57 = vpop.f32.mrb[217].mxu0 }
 0x361   : > { %v4231_v52 = vpop.f32.mrb[218].mxu0  ;;  %7418 = vmatmul.mubr.bf16.gmra.mrb[84].mxu1 %v5302_v26  ;;  %v5317_v57 = vld [vmem:[#allocation2 + $0x1c0] sm:$0xff] }
 0x362   : > { %v9733_v46 = vadd.f32 %v4424_v14, %v4231_v52  ;;  %v4233_v45 = vpop.f32.mrb[219].mxu0  ;;  %7421 = vmatprep.mubr.bf16.mxu1 %v5305_v30  ;;  %v5311_v14 = vld [vmem:[#allocation2 + $0x190] sm:$0xff]  ;;  %v5306_v52 = vld [vmem:[#allocation2 + $0x168] sm:$0xff] }
 0x364   : > { %5641 = vmatmul.mubr.bf16.gmra.mrb[68].mxu0 %v5300_v33  ;;  %v9735_v51 = vpop.f32.mrb[236].mxu1 }
 0x365   : > { %5648 = vmatprep.mubr.bf16.mxu0 %v9630_v23  ;;  %v4453_v31 = vpop.f32.mrb[237].mxu1 }
 0x366   : > { %v9738_v36 = vpop.f32.mrb[238].mxu1 }
 0x367   : > { %v4236_v59 = vpop.f32.mrb[220].mxu0  ;;  %v4456_v42 = vpop.f32.mrb[239].mxu1 }
 0x368   : > { %v9740_v20 = vadd.f32 %v7315_v62, %v4236_v59  ;;  %v4238_v58 = vpop.f32.mrb[221].mxu0 }
 0x369   : > { %v4239_v8 = vpop.f32.mrb[222].mxu0  ;;  %7422 = vmatmul.mubr.bf16.gmra.mrb[88].mxu1 %v5308_v53 }
 0x36a   : > { %v9742_v29 = vadd.f32 %v7316_v21, %v4239_v8  ;;  %v4241_v56 = vpop.f32.mrb[223].mxu0  ;;  %7425 = vmatprep.mubr.bf16.mxu1 %v5311_v14  ;;  %v5309_v14 = vld [vmem:[#allocation2 + $0x180] sm:$0xff] }
 0x36c   : > { %5649 = vmatmul.mubr.bf16.gmra.mrb[72].mxu0 %v5303_v6  ;;  %v4795_v27 = vpop.f32.mrb[240].mxu1 }
 0x36d   : > { %5656 = vmatprep.mubr.bf16.mxu0 %v9636_v7  ;;  %v4797_v23 = vpop.f32.mrb[241].mxu1 }
 0x36e   : > { %v4798_v43 = vpop.f32.mrb[242].mxu1 }
 0x36f   : > { %v4244_v35 = vpop.f32.mrb[224].mxu0  ;;  %v4800_v24 = vpop.f32.mrb[243].mxu1 }
 0x370   : > { %v9745_v62 = vadd.f32 %v4437_v49, %v4244_v35  ;;  %v4246_v9 = vpop.f32.mrb[225].mxu0 }
 0x371   : > { %v4247_v60 = vpop.f32.mrb[226].mxu0  ;;  %7426 = vmatmul.mubr.bf16.gmra.mrb[92].mxu1 %v5314_v50  ;;  %v5312_v9 = vld [vmem:[#allocation2 + $0x198] sm:$0xff] }
 0x372   : > { %v9747_v21 = vadd.f32 %v4440_v44, %v4247_v60  ;;  %v4249_v26 = vpop.f32.mrb[227].mxu0  ;;  %7429 = vmatprep.mubr.bf16.mxu1 %v5317_v57 }
 0x374   : > { %5657 = vmatmul.mubr.bf16.gmra.mrb[76].mxu0 %v5306_v52  ;;  %v4803_v30 = vpop.f32.mrb[244].mxu1 }
 0x375   : > { %5664 = vmatprep.mubr.bf16.mxu0 %v9650_v55  ;;  %v4805_v7 = vpop.f32.mrb[245].mxu1 }
 0x376   : > { %v4806_v45 = vpop.f32.mrb[246].mxu1 }
 0x377   : > { %v4252_v33 = vpop.f32.mrb[228].mxu0  ;;  %v4808_v59 = vpop.f32.mrb[247].mxu1  ;;  %v5315_v45 = vld [vmem:[#allocation2 + $0x1b0] sm:$0xff] }
 0x378   : > { %v9750_v49 = vadd.f32 %v7319_v16, %v4252_v33  ;;  %v4254_v58 = vpop.f32.mrb[229].mxu0 }
 0x379   : > { %v4255_v53 = vpop.f32.mrb[230].mxu0  ;;  %7430 = vmatmul.mubr.bf16.gmra.mrb[96].mxu1 %v9495_v41 }
 0x37a   : > { %v9753_v8 = vadd.f32 %v7320_v37, %v4255_v53  ;;  %v4257_v44 = vpop.f32.mrb[231].mxu0  ;;  %7433 = vmatprep.mubr.bf16.mxu1 %v9495_v41 }
 0x37c   : > { %5665 = vmatmul.mubr.bf16.gmra.mrb[80].mxu0 %v5309_v14  ;;  %v4811_v56 = vpop.f32.mrb[248].mxu1 }
 0x37d   : > { %5672 = vmatprep.mubr.bf16.mxu0 %v9660_v12  ;;  %v4813_v55 = vpop.f32.mrb[249].mxu1 }
 0x37e   : > { %v4814_v6 = vpop.f32.mrb[250].mxu1 }
 0x37f   : > { %v4260_v27 = vpop.f32.mrb[232].mxu0  ;;  %v4816_v23 = vpop.f32.mrb[251].mxu1 }
 0x380   : > { %v9757_v16 = vadd.f32 %v4453_v31, %v4260_v27  ;;  %v4262_v43 = vpop.f32.mrb[233].mxu0 }
 0x381   : > { %v4263_v35 = vpop.f32.mrb[234].mxu0  ;;  %7434 = vmatmul.mubr.bf16.gmra.mrb[100].mxu1 %v9495_v41 }
 0x382   : > { %v9760_v37 = vadd.f32 %v4456_v42, %v4263_v35  ;;  %v4265_v24 = vpop.f32.mrb[235].mxu0 }
 0x384   : > { %5673 = vmatmul.mubr.bf16.gmra.mrb[84].mxu0 %v5312_v9  ;;  %v4819_v50 = vpop.f32.mrb[252].mxu1 }
 0x385   : > { %5680 = vmatprep.mubr.bf16.mxu0 %v9670_v5  ;;  %v4821_v60 = vpop.f32.mrb[253].mxu1 }
 0x386   : > { %v4822_v12 = vpop.f32.mrb[254].mxu1 }
 0x387   : > { %v4268_v57 = vpop.f32.mrb[236].mxu0  ;;  %v4824_v26 = vpop.f32.mrb[255].mxu1 }
 0x388   : > { %v9764_v52 = vadd.f32 %v9735_v51, %v4268_v57  ;;  %v4270_v31 = vpop.f32.mrb[237].mxu0 }
 0x389   : > { %v4271_v30 = vpop.f32.mrb[238].mxu0 }
 0x38a   : > { %v9767_v7 = vadd.f32 %v9738_v36, %v4271_v30  ;;  %v4273_v42 = vpop.f32.mrb[239].mxu0 }
 0x38c   : > { %5681 = vmatmul.mubr.bf16.gmra.mrb[88].mxu0 %v5315_v45  ;;  %v4827_v33 = vpop.f32.mrb[0].mxu1 }
 0x38d   : > { %v4829_v59 = vpop.f32.mrb[1].mxu1  ;;  %5688 = vmatprep.mubr.bf16.mxu0 %v9495_v41 }
 0x38e   : > { %v4830_v5 = vpop.f32.mrb[2].mxu1 }
 0x38f   : > { %v7343_v58 = vpop.f32.mrb[240].mxu0  ;;  %v4832_v53 = vpop.f32.mrb[3].mxu1 }
 0x390   : > { %v4988_v44 = vpop.f32.mrb[241].mxu0 }
 0x391   : > { %v7344_v14 = vpop.f32.mrb[242].mxu0 }
 0x392   : > { %v4991_v55 = vpop.f32.mrb[243].mxu0 }
 0x394   : > { %5689 = vmatmul.mubr.bf16.gmra.mrb[92].mxu0 %v9495_v41  ;;  %v4835_v51 = vpop.f32.mrb[4].mxu1 }
 0x395   : > { %v4837_v27 = vpop.f32.mrb[5].mxu1  ;;  %5696 = vmatprep.mubr.bf16.mxu0 %v9495_v41 }
 0x396   : > { %v4838_v36 = vpop.f32.mrb[6].mxu1 }
 0x397   : > { %v7347_v23 = vpop.f32.mrb[244].mxu0  ;;  %v4840_v43 = vpop.f32.mrb[7].mxu1 }
 0x398   : > { %v5013_v35 = vadd.f32 %v7347_v23, %v4819_v50  ;;  %v5004_v24 = vpop.f32.mrb[245].mxu0 }
 0x399   : > { %v5005_v9 = vadd.f32 %v5004_v24, %v4811_v56  ;;  %v7348_v60 = vpop.f32.mrb[246].mxu0 }
 0x39a   : > { %v9773_v57 = vadd.f32 %v5013_v35, %v9647_v2  ;;  %v5016_v26 = vadd.f32 %v7348_v60, %v4822_v12  ;;  %v5007_v31 = vpop.f32.mrb[247].mxu0 }
 0x39b   : > { %v9776_v30 = vadd.f32 %v5005_v9, %v9640_v39  ;;  %v5008_v42 = vadd.f32 %v5007_v31, %v4814_v6 }
 0x39c   : > { %v9779_v45 = vadd.f32 %v5016_v26, %v9652_v18  ;;  %5697 = vmatmul.mubr.bf16.gmra.mrb[96].mxu0 %v9495_v41  ;;  %v4843_v59 = vpop.f32.mrb[8].mxu1 }
 0x39d   : > { %v9783_v50 = vadd.f32 %v5008_v42, %v9645_v4  ;;  %v4845_v56 = vpop.f32.mrb[9].mxu1  ;;  %5704 = vmatprep.mubr.bf16.mxu0 %v9495_v41 }
 0x39e   : > { %v4846_v2 = vpop.f32.mrb[10].mxu1 }
 0x39f   : > { %v7351_v58 = vpop.f32.mrb[248].mxu0  ;;  %v4848_v12 = vpop.f32.mrb[11].mxu1 }
 0x3a0   : > { %v5029_v53 = vadd.f32 %v7351_v58, %v4835_v51  ;;  %v5020_v44 = vpop.f32.mrb[249].mxu0 }
 0x3a1   : > { %v5021_v39 = vadd.f32 %v5020_v44, %v4827_v33  ;;  %v7352_v14 = vpop.f32.mrb[250].mxu0 }
 0x3a2   : > { %v9787_v6 = vadd.f32 %v5029_v53, %v9667_v34  ;;  %v5032_v18 = vadd.f32 %v7352_v14, %v4838_v36  ;;  %v5023_v55 = vpop.f32.mrb[251].mxu0 }
 0x3a3   : > { %v9790_v27 = vadd.f32 %v5021_v39, %v9657_v61  ;;  %v5024_v4 = vadd.f32 %v5023_v55, %v4830_v5 }
 0x3a4   : > { %v9793_v23 = vadd.f32 %v5032_v18, %v9672_v0  ;;  %5705 = vmatmul.mubr.bf16.gmra.mrb[100].mxu0 %v9495_v41  ;;  %v4851_v43 = vpop.f32.mrb[12].mxu1 }
 0x3a5   : > { %v9797_v51 = vadd.f32 %v5024_v4, %v9662_v48  ;;  %v4853_v33 = vpop.f32.mrb[13].mxu1 }
 0x3a6   : > { %v4854_v35 = vpop.f32.mrb[14].mxu1 }
 0x3a7   : > { %v7355_v24 = vpop.f32.mrb[252].mxu0  ;;  %v4856_v34 = vpop.f32.mrb[15].mxu1 }
 0x3a8   : > { %v5045_v9 = vadd.f32 %v7355_v24, %v4851_v43  ;;  %v5036_v36 = vpop.f32.mrb[253].mxu0 }
 0x3a9   : > { %v5037_v60 = vadd.f32 %v5036_v36, %v4843_v59  ;;  %v7356_v26 = vpop.f32.mrb[254].mxu0 }
 0x3aa   : > { %v9800_v61 = vadd.f32 %v5045_v9, %v9684_v3  ;;  %v5048_v5 = vadd.f32 %v7356_v26, %v4854_v35  ;;  %v5039_v0 = vpop.f32.mrb[255].mxu0 }
 0x3ab   : > { %v9803_v31 = vadd.f32 %v5037_v60, %v9677_v17  ;;  %v5040_v41 = vadd.f32 %v5039_v0, %v4846_v2 }
 0x3ac   : > { %v9806_v48 = vadd.f32 %v5048_v5, %v9687_v25  ;;  %v4859_v42 = vpop.f32.mrb[16].mxu1 }
 0x3ad   : > { %v9809_v56 = vadd.f32 %v5040_v41, %v9680_v47  ;;  %v4861_v58 = vpop.f32.mrb[17].mxu1 }
 0x3ae   : > { %v4862_v12 = vpop.f32.mrb[18].mxu1 }
 0x3af   : > { %v7359_v59 = vpop.f32.mrb[0].mxu0  ;;  %v4864_v53 = vpop.f32.mrb[19].mxu1 }
 0x3b0   : > { %v5052_v44 = vpop.f32.mrb[1].mxu0 }
 0x3b1   : > { %v5053_v3 = vadd.f32 %v5052_v44, %v4859_v42  ;;  %v7360_v39 = vpop.f32.mrb[2].mxu0 }
 0x3b2   : > { %v5055_v14 = vpop.f32.mrb[3].mxu0 }
 0x3b3   : > { %v9812_v18 = vadd.f32 %v5053_v3, %v9691_v32  ;;  %v5056_v17 = vadd.f32 %v5055_v14, %v4862_v12 }
 0x3b4   : > { %v4867_v2 = vpop.f32.mrb[20].mxu1 }
 0x3b5   : > { %v9815_v25 = vadd.f32 %v5056_v17, %v9694_v11  ;;  %v5061_v55 = vadd.f32 %v7359_v59, %v4867_v2  ;;  %v4869_v4 = vpop.f32.mrb[21].mxu1 }
 0x3b6   : > { %v4870_v47 = vpop.f32.mrb[22].mxu1 }
 0x3b7   : > { %v9818_v43 = vadd.f32 %v5061_v55, %v9698_v40  ;;  %v7363_v33 = vpop.f32.mrb[4].mxu0  ;;  %v5064_v35 = vadd.f32 %v7360_v39, %v4870_v47  ;;  %v4872_v24 = vpop.f32.mrb[23].mxu1 }
 0x3b8   : > { %v5068_v34 = vpop.f32.mrb[5].mxu0 }
 0x3b9   : > { %v9821_v9 = vadd.f32 %v5064_v35, %v9701_v22  ;;  %v7364_v32 = vpop.f32.mrb[6].mxu0 }
 0x3ba   : > { %v5071_v36 = vpop.f32.mrb[7].mxu0 }
 0x3bc   : > { %v4875_v60 = vpop.f32.mrb[24].mxu1 }
 0x3bd   : > { %v5069_v26 = vadd.f32 %v5068_v34, %v4875_v60  ;;  %v4877_v5 = vpop.f32.mrb[25].mxu1 }
 0x3be   : > { %v4878_v11 = vpop.f32.mrb[26].mxu1 }
 0x3bf   : > { %v9824_v0 = vadd.f32 %v5069_v26, %v9705_v28  ;;  %v7367_v41 = vpop.f32.mrb[8].mxu0  ;;  %v5072_v42 = vadd.f32 %v5071_v36, %v4878_v11  ;;  %v4880_v40 = vpop.f32.mrb[27].mxu1 }
 0x3c0   : > { %v5084_v58 = vpop.f32.mrb[9].mxu0 }
 0x3c1   : > { %v9827_v12 = vadd.f32 %v5072_v42, %v9708_v1  ;;  %v7368_v59 = vpop.f32.mrb[10].mxu0 }
 0x3c2   : > { %v5087_v53 = vpop.f32.mrb[11].mxu0 }
 0x3c4   : > { %v4883_v22 = vpop.f32.mrb[28].mxu1 }
 0x3c5   : > { %v5077_v44 = vadd.f32 %v7363_v33, %v4883_v22  ;;  %v4885_v3 = vpop.f32.mrb[29].mxu1 }
 0x3c6   : > { %v4886_v39 = vpop.f32.mrb[30].mxu1 }
 0x3c7   : > { %v9830_v14 = vadd.f32 %v5077_v44, %v9712_v54  ;;  %v7371_v17 = vpop.f32.mrb[12].mxu0  ;;  %v5080_v2 = vadd.f32 %v7364_v32, %v4886_v39  ;;  %v4888_v28 = vpop.f32.mrb[31].mxu1 }
 0x3c8   : > { %v5100_v55 = vpop.f32.mrb[13].mxu0 }
 0x3c9   : > { %v9833_v4 = vadd.f32 %v5080_v2, %v9715_v15  ;;  %v7372_v47 = vpop.f32.mrb[14].mxu0 }
 0x3ca   : > { %v5103_v35 = vpop.f32.mrb[15].mxu0 }
 0x3cc   : > { %v4891_v1 = vpop.f32.mrb[32].mxu1 }
 0x3cd   : > { %v5085_v24 = vadd.f32 %v5084_v58, %v4891_v1  ;;  %v4893_v34 = vpop.f32.mrb[33].mxu1 }
 0x3ce   : > { %v4894_v36 = vpop.f32.mrb[34].mxu1 }
 0x3cf   : > { %v9836_v33 = vadd.f32 %v5085_v24, %v9719_v10  ;;  %v7375_v60 = vpop.f32.mrb[16].mxu0  ;;  %v5088_v26 = vadd.f32 %v5087_v53, %v4894_v36  ;;  %v4896_v54 = vpop.f32.mrb[35].mxu1 }
 0x3d0   : > { %v5116_v5 = vpop.f32.mrb[17].mxu0 }
 0x3d1   : > { %v9839_v32 = vadd.f32 %v5088_v26, %v9722_v13  ;;  %v7376_v11 = vpop.f32.mrb[18].mxu0 }
 0x3d2   : > { %v5119_v42 = vpop.f32.mrb[19].mxu0 }
 0x3d4   : > { %v4899_v15 = vpop.f32.mrb[36].mxu1 }
 0x3d5   : > { %v5093_v40 = vadd.f32 %v7367_v41, %v4899_v15  ;;  %v4901_v22 = vpop.f32.mrb[37].mxu1 }
 0x3d6   : > { %v4902_v44 = vpop.f32.mrb[38].mxu1 }
 0x3d7   : > { %v9842_v58 = vadd.f32 %v5093_v40, %v9726_v63  ;;  %v9844_v3 = vpop.f32.mrb[20].mxu0  ;;  %v5096_v10 = vadd.f32 %v7368_v59, %v4902_v44  ;;  %v4904_v39 = vpop.f32.mrb[39].mxu1 }
 0x3d8   : > { %v5132_v2 = vpop.f32.mrb[21].mxu0 }
 0x3d9   : > { %v9847_v53 = vadd.f32 %v5096_v10, %v9728_v19  ;;  %v9849_v28 = vpop.f32.mrb[22].mxu0 }
 0x3da   : > { %v5135_v13 = vpop.f32.mrb[23].mxu0 }
 0x3dc   : > { %v4907_v1 = vpop.f32.mrb[40].mxu1 }
 0x3dd   : > { %v5101_v24 = vadd.f32 %v5100_v55, %v4907_v1  ;;  %v4909_v34 = vpop.f32.mrb[41].mxu1 }
 0x3de   : > { %v4910_v41 = vpop.f32.mrb[42].mxu1 }
 0x3df   : > { %v9852_v36 = vadd.f32 %v5101_v24, %v9731_v38  ;;  %v5554_v63 = vpop.f32.mrb[24].mxu0  ;;  %v5104_v26 = vadd.f32 %v5103_v35, %v4910_v41  ;;  %v4912_v54 = vpop.f32.mrb[43].mxu1 }
 0x3e0   : > { %v5556_v15 = vpop.f32.mrb[25].mxu0 }
 0x3e1   : > { %v9855_v59 = vadd.f32 %v5104_v26, %v9733_v46  ;;  %v5557_v40 = vpop.f32.mrb[26].mxu0 }
 0x3e2   : > { %v5559_v19 = vpop.f32.mrb[27].mxu0 }
 0x3e4   : > { %v4915_v22 = vpop.f32.mrb[44].mxu1 }
 0x3e5   : > { %v5109_v44 = vadd.f32 %v7371_v17, %v4915_v22  ;;  %v4917_v10 = vpop.f32.mrb[45].mxu1 }
 0x3e6   : > { %v4918_v39 = vpop.f32.mrb[46].mxu1 }
 0x3e7   : > { %v9858_v55 = vadd.f32 %v5109_v44, %v9740_v20  ;;  %v5562_v1 = vpop.f32.mrb[28].mxu0  ;;  %v5112_v34 = vadd.f32 %v7372_v47, %v4918_v39  ;;  %v4920_v38 = vpop.f32.mrb[47].mxu1 }
 0x3e8   : > { %v5564_v24 = vpop.f32.mrb[29].mxu0 }
 0x3e9   : > { %v9861_v35 = vadd.f32 %v5112_v34, %v9742_v29  ;;  %v5565_v41 = vpop.f32.mrb[30].mxu0 }
 0x3ea   : > { %v5567_v63 = vpop.f32.mrb[31].mxu0 }
 0x3ec   : > { %v4923_v46 = vpop.f32.mrb[48].mxu1 }
 0x3ed   : > { %v5117_v26 = vadd.f32 %v5116_v5, %v4923_v46  ;;  %v4925_v54 = vpop.f32.mrb[49].mxu1 }
 0x3ee   : > { %v4926_v15 = vpop.f32.mrb[50].mxu1 }
 0x3ef   : > { %v9864_v17 = vadd.f32 %v5117_v26, %v9745_v62  ;;  %v5570_v40 = vpop.f32.mrb[32].mxu0  ;;  %v5120_v19 = vadd.f32 %v5119_v42, %v4926_v15  ;;  %v4928_v20 = vpop.f32.mrb[51].mxu1 }
 0x3f0   : > { %v5572_v22 = vpop.f32.mrb[33].mxu0 }
 0x3f1   : > { %v5220_v47 = vadd.f32 %v5120_v19, %v9747_v21  ;;  %v9867_v44 = vpop.f32.mrb[34].mxu0 }
 0x3f2   : > { %v5575_v10 = vpop.f32.mrb[35].mxu0 }
 0x3f3   : > { %5260 = vst [vmem:[#allocation3 + $0x108] sm:$0xff] %v5220_v47 }
 0x3f4   : > { %v4931_v29 = vpop.f32.mrb[52].mxu1 }
 0x3f5   : > { %v5125_v39 = vadd.f32 %v7375_v60, %v4931_v29  ;;  %v4933_v1 = vpop.f32.mrb[53].mxu1 }
 0x3f6   : > { %v4934_v34 = vpop.f32.mrb[54].mxu1 }
 0x3f7   : > { %v5221_v5 = vadd.f32 %v5125_v39, %v9750_v49  ;;  %v5578_v38 = vpop.f32.mrb[36].mxu0  ;;  %v5128_v24 = vadd.f32 %v7376_v11, %v4934_v34  ;;  %v4936_v62 = vpop.f32.mrb[55].mxu1 }
 0x3f8   : > { %v5580_v41 = vpop.f32.mrb[37].mxu0 }
 0x3f9   : > { %5261 = vst [vmem:[#allocation3 + $0x110] sm:$0xff] %v5221_v5  ;;  %v5222_v42 = vadd.f32 %v5128_v24, %v9753_v8  ;;  %v5581_v63 = vpop.f32.mrb[38].mxu0 }
 0x3fa   : > { %v5583_v46 = vpop.f32.mrb[39].mxu0 }
 0x3fb   : > { %5262 = vst [vmem:[#allocation3 + $0x118] sm:$0xff] %v5222_v42 }
 0x3fc   : > { %v4939_v21 = vpop.f32.mrb[56].mxu1 }
 0x3fd   : > { %v5133_v26 = vadd.f32 %v5132_v2, %v4939_v21  ;;  %v4941_v54 = vpop.f32.mrb[57].mxu1 }
 0x3fe   : > { %v4942_v15 = vpop.f32.mrb[58].mxu1 }
 0x3ff   : > { %v5223_v60 = vadd.f32 %v5133_v26, %v9757_v16  ;;  %v9872_v19 = vpop.f32.mrb[40].mxu0  ;;  %v5136_v20 = vadd.f32 %v5135_v13, %v4942_v15  ;;  %v4944_v49 = vpop.f32.mrb[59].mxu1 }
 0x400   : > { %v5588_v22 = vpop.f32.mrb[41].mxu0 }
 0x401   : > { %5263 = vst [vmem:[#allocation3 + $0x120] sm:$0xff] %v5223_v60  ;;  %v5224_v11 = vadd.f32 %v5136_v20, %v9760_v37  ;;  %v9875_v47 = vpop.f32.mrb[42].mxu0 }
 0x402   : > { %v5591_v8 = vpop.f32.mrb[43].mxu0 }
 0x403   : > { %5264 = vst [vmem:[#allocation3 + $0x128] sm:$0xff] %v5224_v11 }
 0x404   : > { %v4947_v10 = vpop.f32.mrb[60].mxu1 }
 0x405   : > { %v5141_v29 = vadd.f32 %v9844_v3, %v4947_v10  ;;  %v4949_v2 = vpop.f32.mrb[61].mxu1  ;;  %v9884_v3 = vld [vmem:[%s10098_s6] ss:$0 sm:$0xff] }
 0x406   : > { %v4950_v39 = vpop.f32.mrb[62].mxu1 }
 0x407   : > { %v5225_v1 = vadd.f32 %v5141_v29, %v9764_v52  ;;  %v5594_v16 = vpop.f32.mrb[44].mxu0  ;;  %v5144_v34 = vadd.f32 %v9849_v28, %v4950_v39  ;;  %v4952_v13 = vpop.f32.mrb[63].mxu1 }
 0x408   : > { %v5596_v5 = vpop.f32.mrb[45].mxu0 }
 0x409   : > { %5265 = vst [vmem:[#allocation3 + $0x130] sm:$0xff] %v5225_v1  ;;  %v5226_v24 = vadd.f32 %v5144_v34, %v9767_v7  ;;  %v5597_v37 = vpop.f32.mrb[46].mxu0 }
 0x40a   : > { %v5599_v62 = vpop.f32.mrb[47].mxu0 }
 0x40b   : > { %5266 = vst [vmem:[#allocation3 + $0x138] sm:$0xff] %v5226_v24 }
 0x40c   : > { %v7399_v41 = vpop.f32.mrb[64].mxu1 }
 0x40d   : > { %v5747_v42 = vpop.f32.mrb[65].mxu1 }
 0x40e   : > { %v7400_v46 = vpop.f32.mrb[66].mxu1 }
 0x40f   : > { %v9886_v52 = vpop.f32.mrb[48].mxu0  ;;  %v5750_v21 = vpop.f32.mrb[67].mxu1 }
 0x410   : > { %v5604_v28 = vpop.f32.mrb[49].mxu0 }
 0x411   : > { %v9888_v26 = vpop.f32.mrb[50].mxu0 }
 0x412   : > { %v5607_v54 = vpop.f32.mrb[51].mxu0 }
 0x414   : > { %v7403_v7 = vpop.f32.mrb[68].mxu1 }
 0x415   : > { %v5772_v15 = vadd.f32 %v7403_v7, %v5578_v38  ;;  %v5763_v60 = vpop.f32.mrb[69].mxu1 }
 0x416   : > { %v5764_v20 = vadd.f32 %v5763_v60, %v5570_v40  ;;  %v7404_v49 = vpop.f32.mrb[70].mxu1 }
 0x417   : > { %v5610_v22 = vpop.f32.mrb[52].mxu0  ;;  %v5952_v11 = vadd.f32 %v5772_v15, %v9773_v57  ;;  %v5775_v8 = vadd.f32 %v7404_v49, %v5581_v63  ;;  %v5766_v10 = vpop.f32.mrb[71].mxu1 }
 0x418   : > { %v5612_v29 = vpop.f32.mrb[53].mxu0  ;;  %v5950_v2 = vadd.f32 %v5764_v20, %v9776_v30  ;;  %v5767_v39 = vadd.f32 %v5766_v10, %v9867_v44 }
 0x419   : > { %v6079_v1 = vadd.f32 %v9884_v3, %v5952_v11  ;;  %v9894_v34 = vpop.f32.mrb[54].mxu0  ;;  %v5953_v13 = vadd.f32 %v5775_v8, %v9779_v45 }
 0x41a   : > { %v6077_v57 = vadd.f32 %v9884_v3, %v5950_v2  ;;  %v5615_v30 = vpop.f32.mrb[55].mxu0  ;;  %v5951_v40 = vadd.f32 %v5767_v39, %v9783_v50 }
 0x41b   : > { %v6119_v44 = vmax.f32 %v6079_v1, 0.0  ;;  %v6080_v38 = vadd.f32 %v9884_v3, %v5953_v13 }
 0x41c   : > { %v6117_v63 = vmax.f32 %v6077_v57, 0.0  ;;  %v6078_v45 = vadd.f32 %v9884_v3, %v5951_v40  ;;  %v7407_v5 = vpop.f32.mrb[72].mxu1 }
 0x41d   : > { %6159 = vst [vmem:[#allocation3 + $0x30] sm:$0xff] %v6119_v44  ;;  %6229 = vst.msk [vmem:[%s9902_s20 + $0x10] sm:$0xff] %vm6226_vm8, %v6119_v44  ;;  %v6120_v24 = vmax.f32 %v6080_v38, 0.0  ;;  %v5788_v62 = vadd.f32 %v7407_v5, %v5594_v16  ;;  %v5779_v41 = vpop.f32.mrb[73].mxu1 }
 0x41e   : > { %6157 = vst [vmem:[#allocation3 + $0x20] sm:$0xff] %v6117_v63  ;;  %6227 = vst.msk [vmem:[%s9902_s20] sm:$0xff] %vm6226_vm8, %v6117_v63  ;;  %v6118_v42 = vmax.f32 %v6078_v45, 0.0  ;;  %v5780_v50 = vadd.f32 %v5779_v41, %v9872_v19  ;;  %v7408_v46 = vpop.f32.mrb[74].mxu1 }
 0x41f   : > { %6160 = vst [vmem:[#allocation3 + $0x38] sm:$0xff] %v6120_v24  ;;  %6230 = vst.msk [vmem:[%s9902_s20 + $0x18] sm:$0xff] %vm6226_vm8, %v6120_v24  ;;  %v9915_v21 = vpop.f32.mrb[56].mxu0  ;;  %v5956_v28 = vadd.f32 %v5788_v62, %v9787_v6  ;;  %v5791_v54 = vadd.f32 %v7408_v46, %v5597_v37  ;;  %v5782_v7 = vpop.f32.mrb[75].mxu1 }
 0x420   : > { %6158 = vst [vmem:[#allocation3 + $0x28] sm:$0xff] %v6118_v42  ;;  %6228 = vst.msk [vmem:[%s9902_s20 + $0x8] sm:$0xff] %vm6226_vm8, %v6118_v42  ;;  %v5620_v16 = vpop.f32.mrb[57].mxu0  ;;  %v5954_v15 = vadd.f32 %v5780_v50, %v9790_v27  ;;  %v5783_v19 = vadd.f32 %v5782_v7, %v9875_v47 }
 0x421   : > { %v6083_v60 = vadd.f32 %v9884_v3, %v5956_v28  ;;  %v9923_v20 = vpop.f32.mrb[58].mxu0  ;;  %v5957_v49 = vadd.f32 %v5791_v54, %v9793_v23 }
 0x422   : > { %v6081_v6 = vadd.f32 %v9884_v3, %v5954_v15  ;;  %v5623_v37 = vpop.f32.mrb[59].mxu0  ;;  %v5955_v11 = vadd.f32 %v5783_v19, %v9797_v51 }
 0x423   : > { %v6123_v8 = vmax.f32 %v6083_v60, 0.0  ;;  %v6084_v10 = vadd.f32 %v9884_v3, %v5957_v49 }
 0x424   : > { %v6121_v29 = vmax.f32 %v6081_v6, 0.0  ;;  %v6082_v27 = vadd.f32 %v9884_v3, %v5955_v11  ;;  %v7411_v2 = vpop.f32.mrb[76].mxu1 }
 0x425   : > { %6163 = vst [vmem:[#allocation3 + $0x50] sm:$0xff] %v6123_v8  ;;  %6233 = vst.msk [vmem:[%s9902_s20 + $0x30] sm:$0xff] %vm6226_vm8, %v6123_v8  ;;  %v6124_v47 = vmax.f32 %v6084_v10, 0.0  ;;  %v5804_v23 = vadd.f32 %v7411_v2, %v5610_v22  ;;  %v5795_v39 = vpop.f32.mrb[77].mxu1 }
 0x426   : > { %v6291_v1 = vld [vmem:[#allocation3 + $0x30] ss:$2 sm:$0xff]  ;;  %v6307_v13 = vld [vmem:[#allocation3 + $0x31] ss:$2 sm:$0xff]  ;;  %6161 = vst [vmem:[#allocation3 + $0x40] sm:$0xff] %v6121_v29  ;;  %6231 = vst.msk [vmem:[%s9902_s20 + $0x20] sm:$0xff] %vm6226_vm8, %v6121_v29  ;;  %v5796_v57 = vadd.f32 %v5795_v39, %v9886_v52 }
 0x427   : > { %v6122_v51 = vmax.f32 %v6082_v27, 0.0  ;;  %v7412_v30 = vpop.f32.mrb[78].mxu1  ;;  %v6330_v40 = vmax.f32 %v6291_v1, %v6307_v13  ;;  %v6259_v44 = vld [vmem:[#allocation3 + $0x20] ss:$2 sm:$0xff]  ;;  %v6275_v38 = vld [vmem:[#allocation3 + $0x21] ss:$2 sm:$0xff]  ;;  %v5960_v22 = vadd.f32 %v5804_v23, %v9800_v61 }
 0x428   : > { %6164 = vst [vmem:[#allocation3 + $0x58] sm:$0xff] %v6124_v47  ;;  %6234 = vst.msk [vmem:[%s9902_s20 + $0x38] sm:$0xff] %vm6226_vm8, %v6124_v47  ;;  %v5626_v63 = vpop.f32.mrb[60].mxu0  ;;  %v5807_v45 = vadd.f32 %v7412_v30, %v9894_v34  ;;  %v5798_v5 = vpop.f32.mrb[79].mxu1  ;;  %v6322_v24 = vmax.f32 %v6259_v44, %v6275_v38  ;;  %v5958_v52 = vadd.f32 %v5796_v57, %v9803_v31 }
 0x429   : > { %6162 = vst [vmem:[#allocation3 + $0x48] sm:$0xff] %v6122_v51  ;;  %6232 = vst.msk [vmem:[%s9902_s20 + $0x28] sm:$0xff] %vm6226_vm8, %v6122_v51  ;;  %v5628_v62 = vpop.f32.mrb[61].mxu0  ;;  %v5799_v41 = vadd.f32 %v5798_v5, %v9888_v26  ;;  %v6087_v61 = vadd.f32 %v9884_v3, %v5960_v22 }
 0x42a   : > { %v5629_v34 = vpop.f32.mrb[62].mxu0  ;;  %v5961_v42 = vadd.f32 %v5807_v45, %v9806_v48  ;;  %v6338_v50 = vmax.f32 %v6322_v24, %v6330_v40  ;;  %v6085_v46 = vadd.f32 %v9884_v3, %v5958_v52 }
 0x42b   : > { %v5631_v28 = vpop.f32.mrb[63].mxu0  ;;  %v5959_v31 = vadd.f32 %v5799_v41, %v9809_v56  ;;  %v6127_v26 = vmax.f32 %v6087_v61, 0.0 }
 0x42c   : > { %v6088_v54 = vadd.f32 %v9884_v3, %v5961_v42  ;;  %6346 = vst.msk [vmem:[%s9947_s22] sm:$0xff] %vm6226_vm8, %v6338_v50  ;;  %v6125_v7 = vmax.f32 %v6085_v46, 0.0  ;;  %v7415_v15 = vpop.f32.mrb[80].mxu1 }
 0x42d   : > { %v6086_v16 = vadd.f32 %v9884_v3, %v5959_v31  ;;  %6167 = vst [vmem:[#allocation3 + $0x70] sm:$0xff] %v6127_v26  ;;  %6237 = vst.msk [vmem:[%s9902_s20 + $0x50] sm:$0xff] %vm6226_vm8, %v6127_v26  ;;  %v5820_v19 = vadd.f32 %v7415_v15, %v5626_v63  ;;  %v5811_v60 = vpop.f32.mrb[81].mxu1 }
 0x42e   : > { %v6128_v48 = vmax.f32 %v6088_v54, 0.0  ;;  %6165 = vst [vmem:[#allocation3 + $0x60] sm:$0xff] %v6125_v7  ;;  %6235 = vst.msk [vmem:[%s9902_s20 + $0x40] sm:$0xff] %vm6226_vm8, %v6125_v7  ;;  %v5812_v37 = vadd.f32 %v5811_v60, %v9915_v21  ;;  %v7416_v11 = vpop.f32.mrb[82].mxu1 }
 0x42f   : > { %v6293_v49 = vld [vmem:[#allocation3 + $0x50] ss:$2 sm:$0xff]  ;;  %v6309_v6 = vld [vmem:[#allocation3 + $0x51] ss:$2 sm:$0xff]  ;;  %v6126_v56 = vmax.f32 %v6086_v16, 0.0  ;;  %v5634_v27 = vpop.f32.mrb[64].mxu0  ;;  %v5964_v2 = vadd.f32 %v5820_v19, %v9818_v43  ;;  %v5823_v47 = vadd.f32 %v7416_v11, %v5629_v34 }
 0x430   : > { %v6331_v8 = vmax.f32 %v6293_v49, %v6309_v6  ;;  %v6261_v10 = vld [vmem:[#allocation3 + $0x40] ss:$2 sm:$0xff]  ;;  %v6277_v29 = vld [vmem:[#allocation3 + $0x41] ss:$2 sm:$0xff]  ;;  %6168 = vst [vmem:[#allocation3 + $0x78] sm:$0xff] %v6128_v48  ;;  %6238 = vst.msk [vmem:[%s9902_s20 + $0x58] sm:$0xff] %vm6226_vm8, %v6128_v48  ;;  %v5962_v21 = vadd.f32 %v5812_v37, %v9812_v18 }
 0x431   : > { %v5814_v23 = vpop.f32.mrb[83].mxu1  ;;  %v6323_v39 = vmax.f32 %v6261_v10, %v6277_v29  ;;  %6166 = vst [vmem:[#allocation3 + $0x68] sm:$0xff] %v6126_v56  ;;  %6236 = vst.msk [vmem:[%s9902_s20 + $0x48] sm:$0xff] %vm6226_vm8, %v6126_v56  ;;  %v5636_v1 = vpop.f32.mrb[65].mxu0  ;;  %v6091_v51 = vadd.f32 %v9884_v3, %v5964_v2  ;;  %v5965_v30 = vadd.f32 %v5823_v47, %v9821_v9 }
 0x432   : > { %v5815_v13 = vadd.f32 %v5814_v23, %v9923_v20  ;;  %v5637_v57 = vpop.f32.mrb[66].mxu0  ;;  %v6089_v43 = vadd.f32 %v9884_v3, %v5962_v21 }
 0x433   : > { %v6339_v40 = vmax.f32 %v6323_v39, %v6331_v8  ;;  %v5639_v44 = vpop.f32.mrb[67].mxu0  ;;  %v6131_v63 = vmax.f32 %v6091_v51, 0.0  ;;  %v6092_v22 = vadd.f32 %v9884_v3, %v5965_v30 }
 0x434   : > { %v5963_v38 = vadd.f32 %v5815_v13, %v9815_v25  ;;  %v6129_v18 = vmax.f32 %v6089_v43, 0.0  ;;  %v7419_v45 = vpop.f32.mrb[84].mxu1 }
 0x435   : > { %6347 = vst.msk [vmem:[%s9947_s22 + $0x8] sm:$0xff] %vm6226_vm8, %v6339_v40  ;;  %6171 = vst [vmem:[#allocation3 + $0x90] sm:$0xff] %v6131_v63  ;;  %v6132_v9 = vmax.f32 %v6092_v22, 0.0  ;;  %v5827_v5 = vpop.f32.mrb[85].mxu1 }
 0x436   : > { %v6090_v20 = vadd.f32 %v9884_v3, %v5963_v38  ;;  %6241 = vst.msk [vmem:[%s9902_s20 + $0x70] sm:$0xff] %vm6226_vm8, %v6131_v63  ;;  %6169 = vst [vmem:[#allocation3 + $0x80] sm:$0xff] %v6129_v18  ;;  %v5828_v52 = vadd.f32 %v5827_v5, %v5634_v27  ;;  %v7420_v41 = vpop.f32.mrb[86].mxu1 }
 0x437   : > { %v6295_v24 = vld [vmem:[#allocation3 + $0x70] ss:$2 sm:$0xff]  ;;  %v6311_v62 = vld [vmem:[#allocation3 + $0x71] ss:$2 sm:$0xff]  ;;  %6239 = vst.msk [vmem:[%s9902_s20 + $0x60] sm:$0xff] %vm6226_vm8, %v6129_v18  ;;  %6172 = vst [vmem:[#allocation3 + $0x98] sm:$0xff] %v6132_v9 }
 0x438   : > { %v6130_v25 = vmax.f32 %v6090_v20, 0.0  ;;  %v6332_v61 = vmax.f32 %v6295_v24, %v6311_v62  ;;  %v6263_v34 = vld [vmem:[#allocation3 + $0x60] ss:$2 sm:$0xff]  ;;  %v6279_v42 = vld [vmem:[#allocation3 + $0x61] ss:$2 sm:$0xff]  ;;  %6242 = vst.msk [vmem:[%s9902_s20 + $0x78] sm:$0xff] %vm6226_vm8, %v6132_v9  ;;  %v5966_v54 = vadd.f32 %v5828_v52, %v9824_v0 }
 0x439   : > { %v5642_v50 = vpop.f32.mrb[68].mxu0  ;;  %v5830_v46 = vpop.f32.mrb[87].mxu1  ;;  %v6324_v28 = vmax.f32 %v6263_v34, %v6279_v42 }
 0x43a   : > { %6170 = vst [vmem:[#allocation3 + $0x88] sm:$0xff] %v6130_v25  ;;  %6240 = vst.msk [vmem:[%s9902_s20 + $0x68] sm:$0xff] %vm6226_vm8, %v6130_v25  ;;  %v5836_v31 = vadd.f32 %v7419_v45, %v5642_v50  ;;  %v5644_v26 = vpop.f32.mrb[69].mxu0  ;;  %v5831_v7 = vadd.f32 %v5830_v46, %v5637_v57  ;;  %v6093_v19 = vadd.f32 %v9884_v3, %v5966_v54 }
 0x43b   : > { %v5645_v16 = vpop.f32.mrb[70].mxu0  ;;  %v6340_v15 = vmax.f32 %v6324_v28, %v6332_v61 }
 0x43c   : > { %v5968_v48 = vadd.f32 %v5836_v31, %v9830_v14  ;;  %v5839_v60 = vadd.f32 %v7420_v41, %v5645_v16  ;;  %v5647_v49 = vpop.f32.mrb[71].mxu0  ;;  %v5967_v6 = vadd.f32 %v5831_v7, %v9827_v12  ;;  %v6133_v37 = vmax.f32 %v6093_v19, 0.0  ;;  %v7423_v0 = vpop.f32.mrb[88].mxu1 }
 0x43d   : > { %6348 = vst.msk [vmem:[%s9947_s22 + $0x10] sm:$0xff] %vm6226_vm8, %v6340_v15  ;;  %v5843_v10 = vpop.f32.mrb[89].mxu1 }
 0x43e   : > { %v6095_v56 = vadd.f32 %v9884_v3, %v5968_v48  ;;  %v5969_v11 = vadd.f32 %v5839_v60, %v9833_v4  ;;  %v6094_v8 = vadd.f32 %v9884_v3, %v5967_v6  ;;  %v6297_v14 = vld [vmem:[#allocation3 + $0x90] ss:$2 sm:$0xff]  ;;  %v6313_v29 = vld [vmem:[#allocation3 + $0x91] ss:$2 sm:$0xff]  ;;  %6173 = vst [vmem:[#allocation3 + $0xa0] sm:$0xff] %v6133_v37  ;;  %6243 = vst.msk [vmem:[%s9902_s20 + $0x80] sm:$0xff] %vm6226_vm8, %v6133_v37 }
 0x43f   : > { %v7424_v2 = vpop.f32.mrb[90].mxu1  ;;  %v6333_v47 = vmax.f32 %v6297_v14, %v6313_v29  ;;  %v5650_v1 = vpop.f32.mrb[72].mxu0 }
 0x440   : > { %v6135_v27 = vmax.f32 %v6095_v56, 0.0  ;;  %v6096_v12 = vadd.f32 %v9884_v3, %v5969_v11  ;;  %v6134_v4 = vmax.f32 %v6094_v8, 0.0  ;;  %v5652_v51 = vpop.f32.mrb[73].mxu0  ;;  %v5844_v57 = vadd.f32 %v5843_v10, %v5650_v1  ;;  %v5846_v30 = vpop.f32.mrb[91].mxu1 }
 0x441   : > { %v6265_v23 = vld [vmem:[#allocation3 + $0x80] ss:$2 sm:$0xff]  ;;  %v6281_v39 = vld [vmem:[#allocation3 + $0x81] ss:$2 sm:$0xff]  ;;  %v5653_v40 = vpop.f32.mrb[74].mxu0 }
 0x442   : > { %v6325_v21 = vmax.f32 %v6265_v23, %v6281_v39  ;;  %6175 = vst [vmem:[#allocation3 + $0xb0] sm:$0xff] %v6135_v27  ;;  %6245 = vst.msk [vmem:[%s9902_s20 + $0x90] sm:$0xff] %vm6226_vm8, %v6135_v27  ;;  %v6136_v13 = vmax.f32 %v6096_v12, 0.0  ;;  %v5970_v44 = vadd.f32 %v5844_v57, %v9836_v33  ;;  %v5655_v38 = vpop.f32.mrb[75].mxu0  ;;  %v5847_v63 = vadd.f32 %v5846_v30, %v5653_v40 }
 0x443   : > { %6174 = vst [vmem:[#allocation3 + $0xa8] sm:$0xff] %v6134_v4  ;;  %6244 = vst.msk [vmem:[%s9902_s20 + $0x88] sm:$0xff] %vm6226_vm8, %v6134_v4 }
 0x444   : > { %v6341_v43 = vmax.f32 %v6325_v21, %v6333_v47  ;;  %6176 = vst [vmem:[#allocation3 + $0xb8] sm:$0xff] %v6136_v13  ;;  %6246 = vst.msk [vmem:[%s9902_s20 + $0x98] sm:$0xff] %vm6226_vm8, %v6136_v13  ;;  %v6097_v22 = vadd.f32 %v9884_v3, %v5970_v44  ;;  %v5971_v18 = vadd.f32 %v5847_v63, %v9839_v32  ;;  %v7427_v20 = vpop.f32.mrb[92].mxu1 }
 0x445   : > { %v5859_v45 = vpop.f32.mrb[93].mxu1 }
 0x446   : > { %6349 = vst.msk [vmem:[%s9947_s22 + $0x18] sm:$0xff] %vm6226_vm8, %v6341_v43  ;;  %v6137_v9 = vmax.f32 %v6097_v22, 0.0  ;;  %v6098_v5 = vadd.f32 %v9884_v3, %v5971_v18  ;;  %v10009_v24 = vpop.f32.mrb[94].mxu1 }
 0x447   : > { %v5658_v62 = vpop.f32.mrb[76].mxu0  ;;  %v5862_v25 = vpop.f32.mrb[95].mxu1 }
 0x448   : > { %6177 = vst [vmem:[#allocation3 + $0xc0] sm:$0xff] %v6137_v9  ;;  %6247 = vst.msk [vmem:[%s9902_s20 + $0xa0] sm:$0xff] %vm6226_vm8, %v6137_v9  ;;  %v6138_v41 = vmax.f32 %v6098_v5, 0.0  ;;  %v5852_v61 = vadd.f32 %v7423_v0, %v5658_v62  ;;  %v5660_v34 = vpop.f32.mrb[77].mxu0 }
 0x449   : > { %v5661_v46 = vpop.f32.mrb[78].mxu0 }
 0x44a   : > { %v6267_v33 = vld [vmem:[#allocation3 + $0xa0] ss:$2 sm:$0xff]  ;;  %v6283_v52 = vld [vmem:[#allocation3 + $0xa1] ss:$2 sm:$0xff]  ;;  %6178 = vst [vmem:[#allocation3 + $0xc8] sm:$0xff] %v6138_v41  ;;  %6248 = vst.msk [vmem:[%s9902_s20 + $0xa8] sm:$0xff] %vm6226_vm8, %v6138_v41  ;;  %v5972_v31 = vadd.f32 %v5852_v61, %v9842_v58  ;;  %v5855_v26 = vadd.f32 %v7424_v2, %v5661_v46 }
 0x44b   : > { %v6299_v32 = vld [vmem:[#allocation3 + $0xb0] ss:$2 sm:$0xff]  ;;  %v6315_v42 = vld [vmem:[#allocation3 + $0xb1] ss:$2 sm:$0xff]  ;;  %v6326_v50 = vmax.f32 %v6267_v33, %v6283_v52  ;;  %v5663_v54 = vpop.f32.mrb[79].mxu0  ;;  %v5939_v61 = vld [vmem:[#allocation3 + $0x108] sm:$0xff] }
 0x44c   : > { %v6334_v28 = vmax.f32 %v6299_v32, %v6315_v42  ;;  %v6099_v16 = vadd.f32 %v9884_v3, %v5972_v31  ;;  %v5973_v15 = vadd.f32 %v5855_v26, %v9847_v53  ;;  %v10018_v48 = vpop.f32.mrb[96].mxu1 }
 0x44d   : > { %v5875_v19 = vpop.f32.mrb[97].mxu1 }
 0x44e   : > { %v6342_v7 = vmax.f32 %v6326_v50, %v6334_v28  ;;  %v6139_v60 = vmax.f32 %v6099_v16, 0.0  ;;  %v6100_v49 = vadd.f32 %v9884_v3, %v5973_v15  ;;  %v10023_v6 = vpop.f32.mrb[98].mxu1  ;;  %v5940_v15 = vld [vmem:[#allocation3 + $0x110] sm:$0xff] }
 0x44f   : > { %v5666_v56 = vpop.f32.mrb[80].mxu0  ;;  %v5878_v58 = vpop.f32.mrb[99].mxu1 }
 0x450   : > { %6350 = vst.msk [vmem:[%s9947_s22 + $0x20] sm:$0xff] %vm6226_vm8, %v6342_v7  ;;  %6179 = vst [vmem:[#allocation3 + $0xd0] sm:$0xff] %v6139_v60  ;;  %v6140_v37 = vmax.f32 %v6100_v49, 0.0  ;;  %v5860_v11 = vadd.f32 %v5859_v45, %v5666_v56  ;;  %v5668_v0 = vpop.f32.mrb[81].mxu0 }
 0x451   : > { %6249 = vst.msk [vmem:[%s9902_s20 + $0xb0] sm:$0xff] %vm6226_vm8, %v6139_v60  ;;  %v5669_v53 = vpop.f32.mrb[82].mxu0  ;;  %v6269_v4 = vld [vmem:[#allocation3 + $0xc0] ss:$2 sm:$0xff]  ;;  %v6285_v1 = vld [vmem:[#allocation3 + $0xc1] ss:$2 sm:$0xff] }
 0x452   : > { %6180 = vst [vmem:[#allocation3 + $0xd8] sm:$0xff] %v6140_v37  ;;  %6250 = vst.msk [vmem:[%s9902_s20 + $0xb8] sm:$0xff] %vm6226_vm8, %v6140_v37  ;;  %v5974_v8 = vadd.f32 %v5860_v11, %v9852_v36  ;;  %v5863_v10 = vadd.f32 %v5862_v25, %v5669_v53  ;;  %v5671_v14 = vpop.f32.mrb[83].mxu0  ;;  %v6327_v43 = vmax.f32 %v6269_v4, %v6285_v1  ;;  %v5941_v11 = vld [vmem:[#allocation3 + $0x118] sm:$0xff] }
 0x454   : > { %v6101_v29 = vadd.f32 %v9884_v3, %v5974_v8  ;;  %v5975_v27 = vadd.f32 %v5863_v10, %v9855_v59  ;;  %v10032_v12 = vpop.f32.mrb[100].mxu1 }
 0x455   : > { %v10034_v2 = vpop.f32.mrb[101].mxu1 }
 0x456   : > { %v6141_v47 = vmax.f32 %v6101_v29, 0.0  ;;  %v6102_v23 = vadd.f32 %v9884_v3, %v5975_v27  ;;  %v10037_v39 = vpop.f32.mrb[102].mxu1 }
 0x457   : > { %v5674_v21 = vpop.f32.mrb[84].mxu0  ;;  %v10039_v36 = vpop.f32.mrb[103].mxu1 }
 0x458   : > { %6181 = vst [vmem:[#allocation3 + $0xe0] sm:$0xff] %v6141_v47  ;;  %6251 = vst.msk [vmem:[%s9902_s20 + $0xc0] sm:$0xff] %vm6226_vm8, %v6141_v47  ;;  %v6142_v13 = vmax.f32 %v6102_v23, 0.0  ;;  %v5868_v59 = vadd.f32 %v7427_v20, %v5674_v21  ;;  %v5676_v51 = vpop.f32.mrb[85].mxu0  ;;  %v5942_v47 = vld [vmem:[#allocation3 + $0x120] sm:$0xff] }
 0x459   : > { %v6301_v57 = vld [vmem:[#allocation3 + $0xd0] ss:$2 sm:$0xff]  ;;  %v6317_v30 = vld [vmem:[#allocation3 + $0xd1] ss:$2 sm:$0xff]  ;;  %v5677_v40 = vpop.f32.mrb[86].mxu0 }
 0x45a   : > { %v6335_v44 = vmax.f32 %v6301_v57, %v6317_v30  ;;  %6182 = vst [vmem:[#allocation3 + $0xe8] sm:$0xff] %v6142_v13  ;;  %6252 = vst.msk [vmem:[%s9902_s20 + $0xc8] sm:$0xff] %vm6226_vm8, %v6142_v13  ;;  %v5976_v38 = vadd.f32 %v5868_v59, %v9858_v55  ;;  %v5871_v63 = vadd.f32 %v10009_v24, %v5677_v40  ;;  %v5679_v22 = vpop.f32.mrb[87].mxu0  ;;  %v5943_v13 = vld [vmem:[#allocation3 + $0x128] sm:$0xff] }
 0x45c   : > { %v6343_v18 = vmax.f32 %v6327_v43, %v6335_v44  ;;  %v6103_v45 = vadd.f32 %v9884_v3, %v5976_v38  ;;  %v5977_v20 = vadd.f32 %v5871_v63, %v9861_v35 }
 0x45e   : > { %6351 = vst.msk [vmem:[%s9947_s22 + $0x28] sm:$0xff] %vm6226_vm8, %v6343_v18  ;;  %v6143_v9 = vmax.f32 %v6103_v45, 0.0  ;;  %v6104_v5 = vadd.f32 %v9884_v3, %v5977_v20 }
 0x45f   : > { %v5682_v62 = vpop.f32.mrb[88].mxu0 }
 0x460   : > { %6183 = vst [vmem:[#allocation3 + $0xf0] sm:$0xff] %v6143_v9  ;;  %6253 = vst.msk [vmem:[%s9902_s20 + $0xd0] sm:$0xff] %vm6226_vm8, %v6143_v9  ;;  %v6144_v25 = vmax.f32 %v6104_v5, 0.0  ;;  %v5876_v55 = vadd.f32 %v5875_v19, %v5682_v62  ;;  %v5684_v33 = vpop.f32.mrb[89].mxu0 }
 0x461   : > { %v5685_v24 = vpop.f32.mrb[90].mxu0  ;;  %v6271_v46 = vld [vmem:[#allocation3 + $0xe0] ss:$2 sm:$0xff]  ;;  %v6287_v28 = vld [vmem:[#allocation3 + $0xe1] ss:$2 sm:$0xff] }
 0x462   : > { %6184 = vst [vmem:[#allocation3 + $0xf8] sm:$0xff] %v6144_v25  ;;  %6254 = vst.msk [vmem:[%s9902_s20 + $0xd8] sm:$0xff] %vm6226_vm8, %v6144_v25  ;;  %v5978_v52 = vadd.f32 %v5876_v55, %v9864_v17  ;;  %v5879_v35 = vadd.f32 %v5878_v58, %v5685_v24  ;;  %v5687_v41 = vpop.f32.mrb[91].mxu0  ;;  %v6328_v60 = vmax.f32 %v6271_v46, %v6287_v28  ;;  %v5945_v55 = vld [vmem:[#allocation3 + $0x138] sm:$0xff] }
 0x464   : > { %v6105_v34 = vadd.f32 %v9884_v3, %v5978_v52  ;;  %v5979_v32 = vadd.f32 %v5939_v61, %v5879_v35 }
 0x466   : > { %v6145_v42 = vmax.f32 %v6105_v34, 0.0  ;;  %v6106_v50 = vadd.f32 %v9884_v3, %v5979_v32 }
 0x467   : > { %v5690_v31 = vpop.f32.mrb[92].mxu0 }
 0x468   : > { %6185 = vst [vmem:[#allocation3 + $0x100] sm:$0xff] %v6145_v42  ;;  %6255 = vst.msk [vmem:[%s9902_s20 + $0xe0] sm:$0xff] %vm6226_vm8, %v6145_v42  ;;  %v6146_v26 = vmax.f32 %v6106_v50, 0.0  ;;  %v5884_v54 = vadd.f32 %v10018_v48, %v5690_v31  ;;  %v5692_v17 = vpop.f32.mrb[93].mxu0 }
 0x469   : > { %v6303_v7 = vld [vmem:[#allocation3 + $0xf0] ss:$2 sm:$0xff]  ;;  %v6319_v16 = vld [vmem:[#allocation3 + $0xf1] ss:$2 sm:$0xff]  ;;  %v5693_v19 = vpop.f32.mrb[94].mxu0 }
 0x46a   : > { %v6336_v49 = vmax.f32 %v6303_v7, %v6319_v16  ;;  %6186 = vst [vmem:[#allocation3 + $0x108] sm:$0xff] %v6146_v26  ;;  %6256 = vst.msk [vmem:[%s9902_s20 + $0xe8] sm:$0xff] %vm6226_vm8, %v6146_v26  ;;  %v5980_v56 = vadd.f32 %v5940_v15, %v5884_v54  ;;  %v5887_v58 = vadd.f32 %v10023_v6, %v5693_v19  ;;  %v5695_v37 = vpop.f32.mrb[95].mxu0 }
 0x46c   : > { %v6344_v0 = vmax.f32 %v6328_v60, %v6336_v49  ;;  %v6107_v48 = vadd.f32 %v9884_v3, %v5980_v56  ;;  %v5981_v53 = vadd.f32 %v5941_v11, %v5887_v58 }
 0x46e   : > { %6352 = vst.msk [vmem:[%s9947_s22 + $0x30] sm:$0xff] %vm6226_vm8, %v6344_v0  ;;  %v6147_v8 = vmax.f32 %v6107_v48, 0.0  ;;  %v6108_v10 = vadd.f32 %v9884_v3, %v5981_v53 }
 0x46f   : > { %v5698_v14 = vpop.f32.mrb[96].mxu0 }
 0x470   : > { %6187 = vst [vmem:[#allocation3 + $0x110] sm:$0xff] %v6147_v8  ;;  %6257 = vst.msk [vmem:[%s9902_s20 + $0xf0] sm:$0xff] %vm6226_vm8, %v6147_v8  ;;  %v6148_v29 = vmax.f32 %v6108_v10, 0.0  ;;  %v5892_v27 = vadd.f32 %v10034_v2, %v5698_v14  ;;  %v5700_v6 = vpop.f32.mrb[97].mxu0 }
 0x471   : > { %v5701_v23 = vpop.f32.mrb[98].mxu0  ;;  %v6273_v40 = vld [vmem:[#allocation3 + $0x100] ss:$2 sm:$0xff]  ;;  %v6289_v43 = vld [vmem:[#allocation3 + $0x101] ss:$2 sm:$0xff] }
 0x472   : > { %6188 = vst [vmem:[#allocation3 + $0x118] sm:$0xff] %v6148_v29  ;;  %6258 = vst.msk [vmem:[%s9902_s20 + $0xf8] sm:$0xff] %vm6226_vm8, %v6148_v29  ;;  %v5982_v4 = vadd.f32 %v5942_v47, %v5892_v27  ;;  %v5895_v1 = vadd.f32 %v10039_v36, %v5701_v23  ;;  %v5703_v21 = vpop.f32.mrb[99].mxu0  ;;  %v5944_v36 = vld [vmem:[#allocation3 + $0x130] sm:$0xff]  ;;  %v6329_v20 = vmax.f32 %v6273_v40, %v6289_v43 }
 0x474   : > { %v6109_v59 = vadd.f32 %v9884_v3, %v5982_v4  ;;  %v5983_v51 = vadd.f32 %v5943_v13, %v5895_v1 }
 0x476   : > { %v6149_v57 = vmax.f32 %v6109_v59, 0.0  ;;  %v6110_v30 = vadd.f32 %v9884_v3, %v5983_v51 }
 0x477   : > { %v5706_v2 = vpop.f32.mrb[100].mxu0 }
 0x478   : > { %6189 = vst [vmem:[#allocation3 + $0x120] sm:$0xff] %v6149_v57  ;;  %v6150_v44 = vmax.f32 %v6110_v30, 0.0  ;;  %v5900_v38 = vadd.f32 %v10032_v12, %v5706_v2  ;;  %v5708_v63 = vpop.f32.mrb[101].mxu0 }
 0x479   : > { %v6305_v22 = vld [vmem:[#allocation3 + $0x110] ss:$2 sm:$0xff]  ;;  %v6321_v18 = vld [vmem:[#allocation3 + $0x111] ss:$2 sm:$0xff]  ;;  %v5709_v45 = vpop.f32.mrb[102].mxu0 }
 0x47a   : > { %v6337_v9 = vmax.f32 %v6305_v22, %v6321_v18  ;;  %6190 = vst [vmem:[#allocation3 + $0x128] sm:$0xff] %v6150_v44  ;;  %v5984_v5 = vadd.f32 %v5944_v36, %v5900_v38  ;;  %v5903_v62 = vadd.f32 %v10037_v39, %v5709_v45  ;;  %v5711_v25 = vpop.f32.mrb[103].mxu0 }
 0x47c   : > { %v6345_v33 = vmax.f32 %v6329_v20, %v6337_v9  ;;  %v6111_v24 = vadd.f32 %v9884_v3, %v5984_v5  ;;  %v5985_v52 = vadd.f32 %v5945_v55, %v5903_v62 }
 0x47e   : > { %6353 = vst.msk [vmem:[%s9947_s22 + $0x38] sm:$0xff] %vm6226_vm8, %v6345_v33  ;;  %v6151_v12 = vmax.f32 %v6111_v24, 0.0  ;;  %v6112_v35 = vadd.f32 %v9884_v3, %v5985_v52 }
 0x480   : > { %6191 = vst [vmem:[#allocation3 + $0x130] sm:$0xff] %v6151_v12  ;;  %v6152_v41 = vmax.f32 %v6112_v35, 0.0 }
 0x482   : > { %6192 = vst [vmem:[#allocation3 + $0x138] sm:$0xff] %v6152_v41 }
 0x483 PF: > { %s19_s27 = sadd.s32 1, %s7651_s27   ;;  %s10133_s26 = smov %s7647_s2 }
 0x484   : > { %p16_p5 = scmp.ge.s32.totalorder %s19_s27, 4   ;;  %s10134_s2 = smov %s10136_s28 }
 0x486   :  { %18 = sbr.rel (!%p16_p5) target bundleno = 2 (0x2), region = 159 }

</bundles_post_ra>
